<compile_context>
chip_gen: v7x
topology: tpu7x:2x2x1
jax: 0.10.0
libtpu: 0.0.40
codegen_flags: <defaults>
</compile_context>

<pallas_src>
import functools

import jax
import jax.numpy as jnp
from jax import lax
from jax.experimental import pallas as pl
from jax.experimental.pallas import tpu as pltpu

LANE = 128  # TPU lane width


def _round_up(x, m):
    return ((x + m - 1) // m) * m


# --------------------------------------------------------------------------
# In-kernel helpers
# --------------------------------------------------------------------------
def _zero_halo_border(pad_ref, H, W, Wp2, Cp, dtype):
    """Zero only the 1-pixel border of the (H+2, Wp2, Cp) halo scratch."""
    zrow = jnp.zeros((1, Wp2, Cp), dtype)
    zcol = jnp.zeros((H + 2, 1, Cp), dtype)
    pad_ref[0:1, :, :] = zrow
    pad_ref[H + 1:H + 2, :, :] = zrow
    pad_ref[:, 0:1, :] = zcol
    pad_ref[:, W + 1:W + 2, :] = zcol


def _conv3x3_accum(h_f32, w_ref, pad_ref, H, W, Wp2, Cp, compute_dtype):
    """3x3 "same" conv of h:(H,W,Cp) f32 against im2col weights (9*Cp, Cp).

    No (H*W, 9*Cp) slab is materialized: 9 accumulating (H*W,Cp)x(Cp,Cp)
    matmuls into one f32 accumulator, taps sliced straight from the
    compute_dtype halo scratch.
    """
    _zero_halo_border(pad_ref, H, W, Wp2, Cp, compute_dtype)
    pad_ref[1:H + 1, 1:W + 1, :] = h_f32.astype(compute_dtype)

    acc = jnp.zeros((H * W, Cp), jnp.float32)
    for ky in range(3):                       # static -> fully unrolled
        for kx in range(3):
            tap = pad_ref[ky:ky + H, kx:kx + W, :].reshape(H * W, Cp)
            k0 = (ky * 3 + kx) * Cp           # 128-aligned static offset
            acc = acc + jnp.dot(tap, w_ref[k0:k0 + Cp, :],
                                preferred_element_type=jnp.float32)
    return acc                                # (H*W, Cp) f32


def _tile_stats(acc, H, W):
    """Per-tile (mean, M2) partials for a numerically-safe Welford/Chan merge."""
    mean = jnp.sum(acc, axis=0, keepdims=True) * (1.0 / float(H * W))
    d = acc - mean
    m2 = jnp.sum(d * d, axis=0, keepdims=True)
    return mean, m2                           # each (1, Cp) f32


def _conv1_stats_kernel(x_ref, w_ref, y_ref, mean_ref, m2_ref, pad_ref,
                        *, H, W, Wp2, Cp, compute_dtype):
    """conv1 + per-tile partial BN statistics (mean, M2)."""
    acc = _conv3x3_accum(x_ref[0], w_ref, pad_ref, H, W, Wp2, Cp, compute_dtype)
    y_ref[0] = acc.reshape(H, W, Cp).astype(y_ref.dtype)
    mean, m2 = _tile_stats(acc, H, W)
    mean_ref[0] = mean
    m2_ref[0] = m2


def _bn_relu_conv2_stats_kernel(y1_ref, sc_ref, sh_ref, w_ref,
                                y2_ref, mean_ref, m2_ref, pad_ref,
                                *, H, W, Wp2, Cp, compute_dtype):
    """bn1 (folded scale/shift, f32) + ReLU + conv2 + partial BN statistics."""
    h = jnp.maximum(y1_ref[0].astype(jnp.float32) * sc_ref[...] + sh_ref[...],
                    0.0)                                        # (H,W,Cp) f32
    acc = _conv3x3_accum(h, w_ref, pad_ref, H, W, Wp2, Cp, compute_dtype)
    y2_ref[0] = acc.reshape(H, W, Cp).astype(y2_ref.dtype)
    mean, m2 = _tile_stats(acc, H, W)
    mean_ref[0] = mean
    m2_ref[0] = m2


def _bn_add_relu_kernel(y2_ref, sc_ref, sh_ref, xres_ref, out_ref):
    """bn2 (folded scale/shift) + identity residual add + ReLU (multi-image block)."""
    o = (y2_ref[...].astype(jnp.float32) * sc_ref[...] + sh_ref[...]
         + xres_ref[...])
    out_ref[...] = jnp.maximum(o, 0.0).astype(out_ref.dtype)


# --------------------------------------------------------------------------
# Wrapper-side helpers
# --------------------------------------------------------------------------
def _im2col_weight(w_pt, Cp):
    """PyTorch (Cout, Cin, 3, 3) -> (9*Cp, Cp) im2col weight, channel-padded."""
    Cout, Cin, KH, KW = w_pt.shape
    w = jnp.transpose(w_pt.astype(jnp.float32), (2, 3, 1, 0))      # (3,3,Cin,Cout)
    w = jnp.pad(w, ((0, 0), (0, 0), (0, Cp - Cin), (0, Cp - Cout)))
    return w.reshape(KH * KW * Cp, Cp)


def _bn_affine(mean_parts, m2_parts, gamma, beta, n_per_tile, eps):
    """Chan-merge per-tile (mean, M2) partials -> global biased var; fold BN."""
    mp = mean_parts[:, 0, :]                                       # (T, Cp)
    m2p = m2_parts[:, 0, :]
    n_tiles = mp.shape[0]
    mean = jnp.mean(mp, axis=0)                                    # (Cp,)
    m2 = jnp.sum(m2p, axis=0) + n_per_tile * jnp.sum(
        (mp - mean[None, :]) ** 2, axis=0)
    var = jnp.maximum(m2 / (n_tiles * n_per_tile), 0.0)            # biased var
    scale = gamma * lax.rsqrt(var + eps)                           # 0 on padded lanes
    shift = beta - mean * scale
    return scale[None, :], shift[None, :]                          # (1, Cp)


def _pick_batch_tile(n, h, w, cp, budget_bytes=4 * 1024 * 1024):
    """Largest divisor of n whose per-image-block f32 tile fits the budget."""
    per_img = h * w * cp * 4
    best = 1
    for d in range(1, n + 1):
        if n % d == 0 and d * per_img <= budget_bytes:
            best = d
    return best


@functools.partial(jax.jit, static_argnames=("compute_dtype",))
def basic_block_forward(x_nchw, params, eps=1e-5, compute_dtype=jnp.bfloat16):
    """Runs the BasicBlock forward. Input/output are NCHW f32 like PyTorch."""
    # TODO(synk): if the surrounding model runs NHWC with padded channels, accept
    # that layout directly to avoid these wrapper-side transpose/pad HBM passes.
    x = jnp.transpose(x_nchw, (0, 2, 3, 1)).astype(jnp.float32)    # NHWC f32
    N, H, W, C = x.shape
    Cout = params["conv1_w"].shape[0]
    assert C == Cout, "identity shortcut requires in_channels == out_channels"

    Cp = _round_up(C, LANE)                                        # lane-dense C
    Wp2 = _round_up(W + 2, 16)                                     # aligned halo sublanes
    x_p = jnp.pad(x, ((0, 0), (0, 0), (0, 0), (0, Cp - C)))        # pad once

    w1 = _im2col_weight(params["conv1_w"], Cp).astype(compute_dtype)
    w2 = _im2col_weight(params["conv2_w"], Cp).astype(compute_dtype)
    # gamma padded with 0 -> scale on dead lanes is exactly 0 (never amplified).
    g1 = jnp.pad(params["bn1_gamma"].astype(jnp.float32), (0, Cp - C))
    b1 = jnp.pad(params["bn1_beta"].astype(jnp.float32), (0, Cp - C))
    g2 = jnp.pad(params["bn2_gamma"].astype(jnp.float32), (0, Cp - C))
    b2 = jnp.pad(params["bn2_beta"].astype(jnp.float32), (0, Cp - C))

    cparams = pltpu.CompilerParams(
        dimension_semantics=("parallel",),          # shard batch across TCs
        vmem_limit_bytes=32 * 1024 * 1024)          # small tiles; safe on v7x too

    img = pl.BlockSpec((1, H, W, Cp), lambda n: (n, 0, 0, 0))
    vec = pl.BlockSpec((1, Cp), lambda n: (0, 0))
    wspec = pl.BlockSpec((9 * Cp, Cp), lambda n: (0, 0))
    stat = pl.BlockSpec((1, 1, Cp), lambda n: (n, 0, 0))
    halo = pltpu.VMEM((H + 2, Wp2, Cp), compute_dtype)

    # ---- pass 1: conv1 + per-image partial BN stats ---------------------
    y1, mean1, m2_1 = pl.pallas_call(
        functools.partial(_conv1_stats_kernel, H=H, W=W, Wp2=Wp2, Cp=Cp,
                          compute_dtype=compute_dtype),
        grid=(N,),
        in_specs=[img, wspec],
        out_specs=[img, stat, stat],
        out_shape=[jax.ShapeDtypeStruct((N, H, W, Cp), compute_dtype),
                   jax.ShapeDtypeStruct((N, 1, Cp), jnp.float32),
                   jax.ShapeDtypeStruct((N, 1, Cp), jnp.float32)],
        scratch_shapes=[halo],
        compiler_params=cparams,
    )(x_p, w1)

    n_per_tile = jnp.float32(H * W)
    scale1, shift1 = _bn_affine(mean1, m2_1, g1, b1, n_per_tile, eps)

    # ---- pass 2: bn1 + ReLU + conv2 + partial BN stats -------------------
    y2, mean2, m2_2 = pl.pallas_call(
        functools.partial(_bn_relu_conv2_stats_kernel, H=H, W=W, Wp2=Wp2, Cp=Cp,
                          compute_dtype=compute_dtype),
        grid=(N,),
        in_specs=[img, vec, vec, wspec],
        out_specs=[img, stat, stat],
        out_shape=[jax.ShapeDtypeStruct((N, H, W, Cp), compute_dtype),
                   jax.ShapeDtypeStruct((N, 1, Cp), jnp.float32),
                   jax.ShapeDtypeStruct((N, 1, Cp), jnp.float32)],
        scratch_shapes=[halo],
        compiler_params=cparams,
    )(y1, scale1, shift1, w2)

    scale2, shift2 = _bn_affine(mean2, m2_2, g2, b2, n_per_tile, eps)

    # ---- pass 3: bn2 + residual add + ReLU (multi-image blocks) ---------
    BT = _pick_batch_tile(N, H, W, Cp)
    img_bt = pl.BlockSpec((BT, H, W, Cp), lambda n: (n, 0, 0, 0))
    out_p = pl.pallas_call(
        _bn_add_relu_kernel,
        grid=(N // BT,),
        in_specs=[img_bt, vec, vec, img_bt],
        out_specs=img_bt,
        out_shape=jax.ShapeDtypeStruct((N, H, W, Cp), jnp.float32),
        compiler_params=cparams,
    )(y2, scale2, shift2, x_p)

    out = out_p[..., :C]                                        # strip channel pad
    return jnp.transpose(out, (0, 3, 1, 2))                     # NHWC -> NCHW


# --------------------------------------------------------------------------
# Pure-JAX reference (training-mode BN, matches nn.BatchNorm2d forward)
# --------------------------------------------------------------------------
def _reference_forward(x_nchw, params, eps=1e-5):
    x = jnp.transpose(x_nchw, (0, 2, 3, 1)).astype(jnp.float32)  # NHWC

    def conv3x3(h, w_pt):
        w = jnp.transpose(w_pt, (2, 3, 1, 0))  # HWIO
        return lax.conv_general_dilated(
            h, w, window_strides=(1, 1), padding=((1, 1), (1, 1)),
            dimension_numbers=("NHWC", "HWIO", "NHWC"))

    def bn(h, gamma, beta):
        mean = jnp.mean(h, axis=(0, 1, 2), keepdims=True)
        var = jnp.mean((h - mean) ** 2, axis=(0, 1, 2), keepdims=True)
        return (h - mean) * lax.rsqrt(var + eps) * gamma + beta

    out = conv3x3(x, params["conv1_w"])
    out = bn(out, params["bn1_gamma"], params["bn1_beta"])
    out = jnp.maximum(out, 0.0)
    out = conv3x3(out, params["conv2_w"])
    out = bn(out, params["bn2_gamma"], params["bn2_beta"])
    out = jnp.maximum(out + x, 0.0)
    return jnp.transpose(out, (0, 3, 1, 2))


if __name__ == "__main__":
    key = jax.random.PRNGKey(0)
    k_x, k_w1, k_w2 = jax.random.split(key, 3)

    N, C, H, W = 2, 4, 16, 16          # in_channels == out_channels, stride=1
    x = jax.random.normal(k_x, (N, C, H, W), dtype=jnp.float32)

    params = {
        # PyTorch Conv2d weight layout: (Cout, Cin, kH, kW)
        "conv1_w": 0.1 * jax.random.normal(k_w1, (C, C, 3, 3), dtype=jnp.float32),
        "conv2_w": 0.1 * jax.random.normal(k_w2, (C, C, 3, 3), dtype=jnp.float32),
        # BatchNorm2d default init: gamma=1, beta=0
        "bn1_gamma": jnp.ones((C,), jnp.float32),
        "bn1_beta": jnp.zeros((C,), jnp.float32),
        "bn2_gamma": jnp.ones((C,), jnp.float32),
        "bn2_beta": jnp.zeros((C,), jnp.float32),
    }

    ref = jax.block_until_ready(_reference_forward(x, params))

    # f32 path (exact semantics of the PyTorch module)
    out = basic_block_forward(x, params, 1e-5, compute_dtype=jnp.float32)
    out = jax.block_until_ready(out)
    assert out.shape == (N, C, H, W)
    assert jnp.allclose(out, ref, atol=1e-3, rtol=1e-3), "f32 mismatch vs reference"

    # bf16 fast path (bf16 MXU operands + bf16 intermediates, f32 accumulation
    # and f32 BN math) — looser tolerance since y1/y2 are bf16-rounded.
    out_bf16 = basic_block_forward(x, params, 1e-5, compute_dtype=jnp.bfloat16)
    out_bf16 = jax.block_until_ready(out_bf16)
    assert jnp.allclose(out_bf16, ref, atol=2e-1, rtol=2e-1), "bf16 mismatch vs reference"

    print("KERNEL_OK")
</pallas_src>

<mosaic_0001>
module attributes {stable_mosaic.version = 11 : i64} {
  func.func @_conv1_stats_kernel(%arg0: i32, %arg1: memref<1x16x16x128xf32, #tpu.memory_space<vmem>>, %arg2: memref<1152x128xf32, #tpu.memory_space<vmem>>, %arg3: memref<1x16x16x128xf32, #tpu.memory_space<vmem>>, %arg4: memref<1x1x128xf32, #tpu.memory_space<vmem>>, %arg5: memref<1x1x128xf32, #tpu.memory_space<vmem>>, %arg6: memref<18x32x128xf32, #tpu.memory_space<vmem>>) attributes {dimension_semantics = [#tpu.dimension_semantics<parallel>], iteration_bounds = array<i64: 2>, scalar_prefetch = 0 : i64, scratch_operands = 1 : i64, tpu.core_type = #tpu.core_type<tc>, window_params = [{transform_indices = @transform_0, window_bounds = array<i64: 1, 16, 16, 128>}, {pipeline_mode = #tpu.pipeline_mode<synchronous>, transform_indices = @transform_1, window_bounds = array<i64: 1152, 128>}, {transform_indices = @transform_2, window_bounds = array<i64: 1, 16, 16, 128>}, {transform_indices = @transform_3, window_bounds = array<i64: 1, 1, 128>}, {transform_indices = @transform_4, window_bounds = array<i64: 1, 1, 128>}]} {
    %c0 = arith.constant 0 : index
    %c0_0 = arith.constant 0 : index
    %c0_1 = arith.constant 0 : index
    %c0_2 = arith.constant 0 : index
    %0 = vector.load %arg1[%c0, %c0_0, %c0_1, %c0_2] : memref<1x16x16x128xf32, #tpu.memory_space<vmem>>, vector<1x16x16x128xf32>
    %1 = vector.shape_cast %0 : vector<1x16x16x128xf32> to vector<16x16x128xf32>
    %cst = arith.constant 0.000000e+00 : f32
    %2 = vector.broadcast %cst : f32 to vector<1x32x128xf32>
    %cst_3 = arith.constant 0.000000e+00 : f32
    %3 = vector.broadcast %cst_3 : f32 to vector<18x1x128xf32>
    %c0_4 = arith.constant 0 : index
    %c0_5 = arith.constant 0 : index
    %c0_6 = arith.constant 0 : index
    %4 = vector.load %arg6[%c0_4, %c0_5, %c0_6] : memref<18x32x128xf32, #tpu.memory_space<vmem>>, vector<1x32x128xf32>
    tpu.vector_store %arg6[%c0_4, %c0_5, %c0_6], %2 {strides = array<i32>} : memref<18x32x128xf32, #tpu.memory_space<vmem>>, vector<1x32x128xf32>,
    %c17 = arith.constant 17 : index
    %c0_7 = arith.constant 0 : index
    %c0_8 = arith.constant 0 : index
    %5 = vector.load %arg6[%c17, %c0_7, %c0_8] : memref<18x32x128xf32, #tpu.memory_space<vmem>>, vector<1x32x128xf32>
    tpu.vector_store %arg6[%c17, %c0_7, %c0_8], %2 {strides = array<i32>} : memref<18x32x128xf32, #tpu.memory_space<vmem>>, vector<1x32x128xf32>,
    %c0_9 = arith.constant 0 : index
    %c0_10 = arith.constant 0 : index
    %c0_11 = arith.constant 0 : index
    %6 = vector.load %arg6[%c0_9, %c0_10, %c0_11] : memref<18x32x128xf32, #tpu.memory_space<vmem>>, vector<18x1x128xf32>
    tpu.vector_store %arg6[%c0_9, %c0_10, %c0_11], %3 {strides = array<i32>} : memref<18x32x128xf32, #tpu.memory_space<vmem>>, vector<18x1x128xf32>,
    %c0_12 = arith.constant 0 : index
    %c17_13 = arith.constant 17 : index
    %c0_14 = arith.constant 0 : index
    %7 = vector.load %arg6[%c0_12, %c17_13, %c0_14] : memref<18x32x128xf32, #tpu.memory_space<vmem>>, vector<18x1x128xf32>
    tpu.vector_store %arg6[%c0_12, %c17_13, %c0_14], %3 {strides = array<i32>} : memref<18x32x128xf32, #tpu.memory_space<vmem>>, vector<18x1x128xf32>,
    %c1 = arith.constant 1 : index
    %c1_15 = arith.constant 1 : index
    %c0_16 = arith.constant 0 : index
    %8 = vector.load %arg6[%c1, %c1_15, %c0_16] : memref<18x32x128xf32, #tpu.memory_space<vmem>>, vector<16x16x128xf32>
    tpu.vector_store %arg6[%c1, %c1_15, %c0_16], %1 {strides = array<i32>} : memref<18x32x128xf32, #tpu.memory_space<vmem>>, vector<16x16x128xf32>,
    %cst_17 = arith.constant 0.000000e+00 : f32
    %9 = vector.broadcast %cst_17 : f32 to vector<256x128xf32>
    %c0_18 = arith.constant 0 : index
    %c0_19 = arith.constant 0 : index
    %c0_20 = arith.constant 0 : index
    %10 = vector.load %arg6[%c0_18, %c0_19, %c0_20] : memref<18x32x128xf32, #tpu.memory_space<vmem>>, vector<16x16x128xf32>
    %11 = vector.shape_cast %10 : vector<16x16x128xf32> to vector<256x128xf32>
    %c0_21 = arith.constant 0 : index
    %c0_22 = arith.constant 0 : index
    %12 = vector.load %arg2[%c0_21, %c0_22] : memref<1152x128xf32, #tpu.memory_space<vmem>>, vector<128x128xf32>
    %cst_23 = arith.constant dense<0.000000e+00> : vector<256x128xf32>
    %13 = tpu.matmul %11, %12, %cst_23 {dimension_numbers = #tpu.dot_dimension_numbers<[1], [0], [0], [1], [0, 0, 1, 1], [], []>} : vector<256x128xf32>, vector<128x128xf32>, vector<256x128xf32> -> vector<256x128xf32>
    %14 = arith.addf %9, %13 : vector<256x128xf32>
    %c0_24 = arith.constant 0 : index
    %c1_25 = arith.constant 1 : index
    %c0_26 = arith.constant 0 : index
    %15 = vector.load %arg6[%c0_24, %c1_25, %c0_26] : memref<18x32x128xf32, #tpu.memory_space<vmem>>, vector<16x16x128xf32>
    %16 = vector.shape_cast %15 : vector<16x16x128xf32> to vector<256x128xf32>
    %c128 = arith.constant 128 : index
    %c0_27 = arith.constant 0 : index
    %17 = vector.load %arg2[%c128, %c0_27] : memref<1152x128xf32, #tpu.memory_space<vmem>>, vector<128x128xf32>
    %cst_28 = arith.constant dense<0.000000e+00> : vector<256x128xf32>
    %18 = tpu.matmul %16, %17, %cst_28 {dimension_numbers = #tpu.dot_dimension_numbers<[1], [0], [0], [1], [0, 0, 1, 1], [], []>} : vector<256x128xf32>, vector<128x128xf32>, vector<256x128xf32> -> vector<256x128xf32>
    %19 = arith.addf %14, %18 : vector<256x128xf32>
    %c0_29 = arith.constant 0 : index
    %c2 = arith.constant 2 : index
    %c0_30 = arith.constant 0 : index
    %20 = vector.load %arg6[%c0_29, %c2, %c0_30] : memref<18x32x128xf32, #tpu.memory_space<vmem>>, vector<16x16x128xf32>
    %21 = vector.shape_cast %20 : vector<16x16x128xf32> to vector<256x128xf32>
    %c256 = arith.constant 256 : index
    %c0_31 = arith.constant 0 : index
    %22 = vector.load %arg2[%c256, %c0_31] : memref<1152x128xf32, #tpu.memory_space<vmem>>, vector<128x128xf32>
    %cst_32 = arith.constant dense<0.000000e+00> : vector<256x128xf32>
    %23 = tpu.matmul %21, %22, %cst_32 {dimension_numbers = #tpu.dot_dimension_numbers<[1], [0], [0], [1], [0, 0, 1, 1], [], []>} : vector<256x128xf32>, vector<128x128xf32>, vector<256x128xf32> -> vector<256x128xf32>
    %24 = arith.addf %19, %23 : vector<256x128xf32>
    %c1_33 = arith.constant 1 : index
    %c0_34 = arith.constant 0 : index
    %c0_35 = arith.constant 0 : index
    %25 = vector.load %arg6[%c1_33, %c0_34, %c0_35] : memref<18x32x128xf32, #tpu.memory_space<vmem>>, vector<16x16x128xf32>
    %26 = vector.shape_cast %25 : vector<16x16x128xf32> to vector<256x128xf32>
    %c384 = arith.constant 384 : index
    %c0_36 = arith.constant 0 : index
    %27 = vector.load %arg2[%c384, %c0_36] : memref<1152x128xf32, #tpu.memory_space<vmem>>, vector<128x128xf32>
    %cst_37 = arith.constant dense<0.000000e+00> : vector<256x128xf32>
    %28 = tpu.matmul %26, %27, %cst_37 {dimension_numbers = #tpu.dot_dimension_numbers<[1], [0], [0], [1], [0, 0, 1, 1], [], []>} : vector<256x128xf32>, vector<128x128xf32>, vector<256x128xf32> -> vector<256x128xf32>
    %29 = arith.addf %24, %28 : vector<256x128xf32>
    %c1_38 = arith.constant 1 : index
    %c1_39 = arith.constant 1 : index
    %c0_40 = arith.constant 0 : index
    %30 = vector.load %arg6[%c1_38, %c1_39, %c0_40] : memref<18x32x128xf32, #tpu.memory_space<vmem>>, vector<16x16x128xf32>
    %31 = vector.shape_cast %30 : vector<16x16x128xf32> to vector<256x128xf32>
    %c512 = arith.constant 512 : index
    %c0_41 = arith.constant 0 : index
    %32 = vector.load %arg2[%c512, %c0_41] : memref<1152x128xf32, #tpu.memory_space<vmem>>, vector<128x128xf32>
    %cst_42 = arith.constant dense<0.000000e+00> : vector<256x128xf32>
    %33 = tpu.matmul %31, %32, %cst_42 {dimension_numbers = #tpu.dot_dimension_numbers<[1], [0], [0], [1], [0, 0, 1, 1], [], []>} : vector<256x128xf32>, vector<128x128xf32>, vector<256x128xf32> -> vector<256x128xf32>
    %34 = arith.addf %29, %33 : vector<256x128xf32>
    %c1_43 = arith.constant 1 : index
    %c2_44 = arith.constant 2 : index
    %c0_45 = arith.constant 0 : index
    %35 = vector.load %arg6[%c1_43, %c2_44, %c0_45] : memref<18x32x128xf32, #tpu.memory_space<vmem>>, vector<16x16x128xf32>
    %36 = vector.shape_cast %35 : vector<16x16x128xf32> to vector<256x128xf32>
    %c640 = arith.constant 640 : index
    %c0_46 = arith.constant 0 : index
    %37 = vector.load %arg2[%c640, %c0_46] : memref<1152x128xf32, #tpu.memory_space<vmem>>, vector<128x128xf32>
    %cst_47 = arith.constant dense<0.000000e+00> : vector<256x128xf32>
    %38 = tpu.matmul %36, %37, %cst_47 {dimension_numbers = #tpu.dot_dimension_numbers<[1], [0], [0], [1], [0, 0, 1, 1], [], []>} : vector<256x128xf32>, vector<128x128xf32>, vector<256x128xf32> -> vector<256x128xf32>
    %39 = arith.addf %34, %38 : vector<256x128xf32>
    %c2_48 = arith.constant 2 : index
    %c0_49 = arith.constant 0 : index
    %c0_50 = arith.constant 0 : index
    %40 = vector.load %arg6[%c2_48, %c0_49, %c0_50] : memref<18x32x128xf32, #tpu.memory_space<vmem>>, vector<16x16x128xf32>
    %41 = vector.shape_cast %40 : vector<16x16x128xf32> to vector<256x128xf32>
    %c768 = arith.constant 768 : index
    %c0_51 = arith.constant 0 : index
    %42 = vector.load %arg2[%c768, %c0_51] : memref<1152x128xf32, #tpu.memory_space<vmem>>, vector<128x128xf32>
    %cst_52 = arith.constant dense<0.000000e+00> : vector<256x128xf32>
    %43 = tpu.matmul %41, %42, %cst_52 {dimension_numbers = #tpu.dot_dimension_numbers<[1], [0], [0], [1], [0, 0, 1, 1], [], []>} : vector<256x128xf32>, vector<128x128xf32>, vector<256x128xf32> -> vector<256x128xf32>
    %44 = arith.addf %39, %43 : vector<256x128xf32>
    %c2_53 = arith.constant 2 : index
    %c1_54 = arith.constant 1 : index
    %c0_55 = arith.constant 0 : index
    %45 = vector.load %arg6[%c2_53, %c1_54, %c0_55] : memref<18x32x128xf32, #tpu.memory_space<vmem>>, vector<16x16x128xf32>
    %46 = vector.shape_cast %45 : vector<16x16x128xf32> to vector<256x128xf32>
    %c896 = arith.constant 896 : index
    %c0_56 = arith.constant 0 : index
    %47 = vector.load %arg2[%c896, %c0_56] : memref<1152x128xf32, #tpu.memory_space<vmem>>, vector<128x128xf32>
    %cst_57 = arith.constant dense<0.000000e+00> : vector<256x128xf32>
    %48 = tpu.matmul %46, %47, %cst_57 {dimension_numbers = #tpu.dot_dimension_numbers<[1], [0], [0], [1], [0, 0, 1, 1], [], []>} : vector<256x128xf32>, vector<128x128xf32>, vector<256x128xf32> -> vector<256x128xf32>
    %49 = arith.addf %44, %48 : vector<256x128xf32>
    %c2_58 = arith.constant 2 : index
    %c2_59 = arith.constant 2 : index
    %c0_60 = arith.constant 0 : index
    %50 = vector.load %arg6[%c2_58, %c2_59, %c0_60] : memref<18x32x128xf32, #tpu.memory_space<vmem>>, vector<16x16x128xf32>
    %51 = vector.shape_cast %50 : vector<16x16x128xf32> to vector<256x128xf32>
    %c1024 = arith.constant 1024 : index
    %c0_61 = arith.constant 0 : index
    %52 = vector.load %arg2[%c1024, %c0_61] : memref<1152x128xf32, #tpu.memory_space<vmem>>, vector<128x128xf32>
    %cst_62 = arith.constant dense<0.000000e+00> : vector<256x128xf32>
    %53 = tpu.matmul %51, %52, %cst_62 {dimension_numbers = #tpu.dot_dimension_numbers<[1], [0], [0], [1], [0, 0, 1, 1], [], []>} : vector<256x128xf32>, vector<128x128xf32>, vector<256x128xf32> -> vector<256x128xf32>
    %54 = arith.addf %49, %53 : vector<256x128xf32>
    %55 = vector.shape_cast %54 : vector<256x128xf32> to vector<16x16x128xf32>
    %c0_63 = arith.constant 0 : index
    %c0_64 = arith.constant 0 : index
    %c0_65 = arith.constant 0 : index
    %c0_66 = arith.constant 0 : index
    %56 = vector.load %arg3[%c0_63, %c0_64, %c0_65, %c0_66] : memref<1x16x16x128xf32, #tpu.memory_space<vmem>>, vector<1x16x16x128xf32>
    %57 = vector.shape_cast %56 : vector<1x16x16x128xf32> to vector<16x16x128xf32>
    %58 = vector.shape_cast %55 : vector<16x16x128xf32> to vector<1x16x16x128xf32>
    tpu.vector_store %arg3[%c0_63, %c0_64, %c0_65, %c0_66], %58 {strides = array<i32>} : memref<1x16x16x128xf32, #tpu.memory_space<vmem>>, vector<1x16x16x128xf32>,
    %cst_67 = arith.constant dense<0.000000e+00> : vector<128xf32>
    %59 = vector.multi_reduction <add>, %54, %cst_67 [0] : vector<256x128xf32> to vector<128xf32>
    %60 = vector.shape_cast %59 : vector<128xf32> to vector<1x128xf32>
    %cst_68 = arith.constant 3.906250e-03 : f32
    %61 = vector.broadcast %cst_68 : f32 to vector<1x128xf32>
    %62 = arith.mulf %60, %61 : vector<1x128xf32>
    %63 = vector.broadcast %62 : vector<1x128xf32> to vector<256x128xf32>
    %64 = arith.subf %54, %63 : vector<256x128xf32>
    %65 = arith.mulf %64, %64 : vector<256x128xf32>
    %cst_69 = arith.constant dense<0.000000e+00> : vector<128xf32>
    %66 = vector.multi_reduction <add>, %65, %cst_69 [0] : vector<256x128xf32> to vector<128xf32>
    %67 = vector.shape_cast %66 : vector<128xf32> to vector<1x128xf32>
    %c0_70 = arith.constant 0 : index
    %c0_71 = arith.constant 0 : index
    %c0_72 = arith.constant 0 : index
    %68 = vector.load %arg4[%c0_70, %c0_71, %c0_72] : memref<1x1x128xf32, #tpu.memory_space<vmem>>, vector<1x1x128xf32>
    %69 = vector.shape_cast %68 : vector<1x1x128xf32> to vector<1x128xf32>
    %70 = vector.shape_cast %62 : vector<1x128xf32> to vector<1x1x128xf32>
    tpu.vector_store %arg4[%c0_70, %c0_71, %c0_72], %70 {strides = array<i32>} : memref<1x1x128xf32, #tpu.memory_space<vmem>>, vector<1x1x128xf32>,
    %c0_73 = arith.constant 0 : index
    %c0_74 = arith.constant 0 : index
    %c0_75 = arith.constant 0 : index
    %71 = vector.load %arg5[%c0_73, %c0_74, %c0_75] : memref<1x1x128xf32, #tpu.memory_space<vmem>>, vector<1x1x128xf32>
    %72 = vector.shape_cast %71 : vector<1x1x128xf32> to vector<1x128xf32>
    %73 = vector.shape_cast %67 : vector<1x128xf32> to vector<1x1x128xf32>
    tpu.vector_store %arg5[%c0_73, %c0_74, %c0_75], %73 {strides = array<i32>} : memref<1x1x128xf32, #tpu.memory_space<vmem>>, vector<1x1x128xf32>,
    return
  }
  func.func @transform_0(%arg0: i32) -> (i32, i32, i32, i32) {
    %c0_i32 = arith.constant 0 : i32
    %c0_i32_0 = arith.constant 0 : i32
    %c0_i32_1 = arith.constant 0 : i32
    %c0_i32_2 = arith.constant 0 : i32
    return %arg0, %c0_i32, %c0_i32_0, %c0_i32_1 : i32, i32, i32, i32
  }
  func.func @transform_1(%arg0: i32) -> (i32, i32) {
    %c0_i32 = arith.constant 0 : i32
    %c0_i32_0 = arith.constant 0 : i32
    %c0_i32_1 = arith.constant 0 : i32
    return %c0_i32, %c0_i32_0 : i32, i32
  }
  func.func @transform_2(%arg0: i32) -> (i32, i32, i32, i32) {
    %c0_i32 = arith.constant 0 : i32
    %c0_i32_0 = arith.constant 0 : i32
    %c0_i32_1 = arith.constant 0 : i32
    %c0_i32_2 = arith.constant 0 : i32
    return %arg0, %c0_i32, %c0_i32_0, %c0_i32_1 : i32, i32, i32, i32
  }
  func.func @transform_3(%arg0: i32) -> (i32, i32, i32) {
    %c0_i32 = arith.constant 0 : i32
    %c0_i32_0 = arith.constant 0 : i32
    %c0_i32_1 = arith.constant 0 : i32
    return %arg0, %c0_i32, %c0_i32_0 : i32, i32, i32
  }
  func.func @transform_4(%arg0: i32) -> (i32, i32, i32) {
    %c0_i32 = arith.constant 0 : i32
    %c0_i32_0 = arith.constant 0 : i32
    %c0_i32_1 = arith.constant 0 : i32
    return %arg0, %c0_i32, %c0_i32_0 : i32, i32, i32
  }
}

module attributes {stable_mosaic.version = 11 : i64} {
  func.func @_bn_relu_conv2_stats_kernel(%arg0: i32, %arg1: memref<1x16x16x128xf32, #tpu.memory_space<vmem>>, %arg2: memref<1x128xf32, #tpu.memory_space<vmem>>, %arg3: memref<1x128xf32, #tpu.memory_space<vmem>>, %arg4: memref<1152x128xf32, #tpu.memory_space<vmem>>, %arg5: memref<1x16x16x128xf32, #tpu.memory_space<vmem>>, %arg6: memref<1x1x128xf32, #tpu.memory_space<vmem>>, %arg7: memref<1x1x128xf32, #tpu.memory_space<vmem>>, %arg8: memref<18x32x128xf32, #tpu.memory_space<vmem>>) attributes {dimension_semantics = [#tpu.dimension_semantics<parallel>], iteration_bounds = array<i64: 2>, scalar_prefetch = 0 : i64, scratch_operands = 1 : i64, tpu.core_type = #tpu.core_type<tc>, window_params = [{transform_indices = @transform_0, window_bounds = array<i64: 1, 16, 16, 128>}, {pipeline_mode = #tpu.pipeline_mode<synchronous>, transform_indices = @transform_1, window_bounds = array<i64: 1, 128>}, {pipeline_mode = #tpu.pipeline_mode<synchronous>, transform_indices = @transform_2, window_bounds = array<i64: 1, 128>}, {pipeline_mode = #tpu.pipeline_mode<synchronous>, transform_indices = @transform_3, window_bounds = array<i64: 1152, 128>}, {transform_indices = @transform_4, window_bounds = array<i64: 1, 16, 16, 128>}, {transform_indices = @transform_5, window_bounds = array<i64: 1, 1, 128>}, {transform_indices = @transform_6, window_bounds = array<i64: 1, 1, 128>}]} {
    %c0 = arith.constant 0 : index
    %c0_0 = arith.constant 0 : index
    %c0_1 = arith.constant 0 : index
    %c0_2 = arith.constant 0 : index
    %0 = vector.load %arg1[%c0, %c0_0, %c0_1, %c0_2] : memref<1x16x16x128xf32, #tpu.memory_space<vmem>>, vector<1x16x16x128xf32>
    %1 = vector.shape_cast %0 : vector<1x16x16x128xf32> to vector<16x16x128xf32>
    %c0_3 = arith.constant 0 : index
    %c0_4 = arith.constant 0 : index
    %2 = vector.load %arg2[%c0_3, %c0_4] : memref<1x128xf32, #tpu.memory_space<vmem>>, vector<1x128xf32>
    %3 = vector.shape_cast %2 : vector<1x128xf32> to vector<1x1x128xf32>
    %4 = vector.broadcast %3 : vector<1x1x128xf32> to vector<16x16x128xf32>
    %5 = arith.mulf %1, %4 : vector<16x16x128xf32>
    %c0_5 = arith.constant 0 : index
    %c0_6 = arith.constant 0 : index
    %6 = vector.load %arg3[%c0_5, %c0_6] : memref<1x128xf32, #tpu.memory_space<vmem>>, vector<1x128xf32>
    %7 = vector.shape_cast %6 : vector<1x128xf32> to vector<1x1x128xf32>
    %8 = vector.broadcast %7 : vector<1x1x128xf32> to vector<16x16x128xf32>
    %9 = arith.addf %5, %8 : vector<16x16x128xf32>
    %cst = arith.constant 0.000000e+00 : f32
    %10 = vector.broadcast %cst : f32 to vector<16x16x128xf32>
    %11 = arith.maximumf %9, %10 : vector<16x16x128xf32>
    %cst_7 = arith.constant 0.000000e+00 : f32
    %12 = vector.broadcast %cst_7 : f32 to vector<1x32x128xf32>
    %cst_8 = arith.constant 0.000000e+00 : f32
    %13 = vector.broadcast %cst_8 : f32 to vector<18x1x128xf32>
    %c0_9 = arith.constant 0 : index
    %c0_10 = arith.constant 0 : index
    %c0_11 = arith.constant 0 : index
    %14 = vector.load %arg8[%c0_9, %c0_10, %c0_11] : memref<18x32x128xf32, #tpu.memory_space<vmem>>, vector<1x32x128xf32>
    tpu.vector_store %arg8[%c0_9, %c0_10, %c0_11], %12 {strides = array<i32>} : memref<18x32x128xf32, #tpu.memory_space<vmem>>, vector<1x32x128xf32>,
    %c17 = arith.constant 17 : index
    %c0_12 = arith.constant 0 : index
    %c0_13 = arith.constant 0 : index
    %15 = vector.load %arg8[%c17, %c0_12, %c0_13] : memref<18x32x128xf32, #tpu.memory_space<vmem>>, vector<1x32x128xf32>
    tpu.vector_store %arg8[%c17, %c0_12, %c0_13], %12 {strides = array<i32>} : memref<18x32x128xf32, #tpu.memory_space<vmem>>, vector<1x32x128xf32>,
    %c0_14 = arith.constant 0 : index
    %c0_15 = arith.constant 0 : index
    %c0_16 = arith.constant 0 : index
    %16 = vector.load %arg8[%c0_14, %c0_15, %c0_16] : memref<18x32x128xf32, #tpu.memory_space<vmem>>, vector<18x1x128xf32>
    tpu.vector_store %arg8[%c0_14, %c0_15, %c0_16], %13 {strides = array<i32>} : memref<18x32x128xf32, #tpu.memory_space<vmem>>, vector<18x1x128xf32>,
    %c0_17 = arith.constant 0 : index
    %c17_18 = arith.constant 17 : index
    %c0_19 = arith.constant 0 : index
    %17 = vector.load %arg8[%c0_17, %c17_18, %c0_19] : memref<18x32x128xf32, #tpu.memory_space<vmem>>, vector<18x1x128xf32>
    tpu.vector_store %arg8[%c0_17, %c17_18, %c0_19], %13 {strides = array<i32>} : memref<18x32x128xf32, #tpu.memory_space<vmem>>, vector<18x1x128xf32>,
    %c1 = arith.constant 1 : index
    %c1_20 = arith.constant 1 : index
    %c0_21 = arith.constant 0 : index
    %18 = vector.load %arg8[%c1, %c1_20, %c0_21] : memref<18x32x128xf32, #tpu.memory_space<vmem>>, vector<16x16x128xf32>
    tpu.vector_store %arg8[%c1, %c1_20, %c0_21], %11 {strides = array<i32>} : memref<18x32x128xf32, #tpu.memory_space<vmem>>, vector<16x16x128xf32>,
    %cst_22 = arith.constant 0.000000e+00 : f32
    %19 = vector.broadcast %cst_22 : f32 to vector<256x128xf32>
    %c0_23 = arith.constant 0 : index
    %c0_24 = arith.constant 0 : index
    %c0_25 = arith.constant 0 : index
    %20 = vector.load %arg8[%c0_23, %c0_24, %c0_25] : memref<18x32x128xf32, #tpu.memory_space<vmem>>, vector<16x16x128xf32>
    %21 = vector.shape_cast %20 : vector<16x16x128xf32> to vector<256x128xf32>
    %c0_26 = arith.constant 0 : index
    %c0_27 = arith.constant 0 : index
    %22 = vector.load %arg4[%c0_26, %c0_27] : memref<1152x128xf32, #tpu.memory_space<vmem>>, vector<128x128xf32>
    %cst_28 = arith.constant dense<0.000000e+00> : vector<256x128xf32>
    %23 = tpu.matmul %21, %22, %cst_28 {dimension_numbers = #tpu.dot_dimension_numbers<[1], [0], [0], [1], [0, 0, 1, 1], [], []>} : vector<256x128xf32>, vector<128x128xf32>, vector<256x128xf32> -> vector<256x128xf32>
    %24 = arith.addf %19, %23 : vector<256x128xf32>
    %c0_29 = arith.constant 0 : index
    %c1_30 = arith.constant 1 : index
    %c0_31 = arith.constant 0 : index
    %25 = vector.load %arg8[%c0_29, %c1_30, %c0_31] : memref<18x32x128xf32, #tpu.memory_space<vmem>>, vector<16x16x128xf32>
    %26 = vector.shape_cast %25 : vector<16x16x128xf32> to vector<256x128xf32>
    %c128 = arith.constant 128 : index
    %c0_32 = arith.constant 0 : index
    %27 = vector.load %arg4[%c128, %c0_32] : memref<1152x128xf32, #tpu.memory_space<vmem>>, vector<128x128xf32>
    %cst_33 = arith.constant dense<0.000000e+00> : vector<256x128xf32>
    %28 = tpu.matmul %26, %27, %cst_33 {dimension_numbers = #tpu.dot_dimension_numbers<[1], [0], [0], [1], [0, 0, 1, 1], [], []>} : vector<256x128xf32>, vector<128x128xf32>, vector<256x128xf32> -> vector<256x128xf32>
    %29 = arith.addf %24, %28 : vector<256x128xf32>
    %c0_34 = arith.constant 0 : index
    %c2 = arith.constant 2 : index
    %c0_35 = arith.constant 0 : index
    %30 = vector.load %arg8[%c0_34, %c2, %c0_35] : memref<18x32x128xf32, #tpu.memory_space<vmem>>, vector<16x16x128xf32>
    %31 = vector.shape_cast %30 : vector<16x16x128xf32> to vector<256x128xf32>
    %c256 = arith.constant 256 : index
    %c0_36 = arith.constant 0 : index
    %32 = vector.load %arg4[%c256, %c0_36] : memref<1152x128xf32, #tpu.memory_space<vmem>>, vector<128x128xf32>
    %cst_37 = arith.constant dense<0.000000e+00> : vector<256x128xf32>
    %33 = tpu.matmul %31, %32, %cst_37 {dimension_numbers = #tpu.dot_dimension_numbers<[1], [0], [0], [1], [0, 0, 1, 1], [], []>} : vector<256x128xf32>, vector<128x128xf32>, vector<256x128xf32> -> vector<256x128xf32>
    %34 = arith.addf %29, %33 : vector<256x128xf32>
    %c1_38 = arith.constant 1 : index
    %c0_39 = arith.constant 0 : index
    %c0_40 = arith.constant 0 : index
    %35 = vector.load %arg8[%c1_38, %c0_39, %c0_40] : memref<18x32x128xf32, #tpu.memory_space<vmem>>, vector<16x16x128xf32>
    %36 = vector.shape_cast %35 : vector<16x16x128xf32> to vector<256x128xf32>
    %c384 = arith.constant 384 : index
    %c0_41 = arith.constant 0 : index
    %37 = vector.load %arg4[%c384, %c0_41] : memref<1152x128xf32, #tpu.memory_space<vmem>>, vector<128x128xf32>
    %cst_42 = arith.constant dense<0.000000e+00> : vector<256x128xf32>
    %38 = tpu.matmul %36, %37, %cst_42 {dimension_numbers = #tpu.dot_dimension_numbers<[1], [0], [0], [1], [0, 0, 1, 1], [], []>} : vector<256x128xf32>, vector<128x128xf32>, vector<256x128xf32> -> vector<256x128xf32>
    %39 = arith.addf %34, %38 : vector<256x128xf32>
    %c1_43 = arith.constant 1 : index
    %c1_44 = arith.constant 1 : index
    %c0_45 = arith.constant 0 : index
    %40 = vector.load %arg8[%c1_43, %c1_44, %c0_45] : memref<18x32x128xf32, #tpu.memory_space<vmem>>, vector<16x16x128xf32>
    %41 = vector.shape_cast %40 : vector<16x16x128xf32> to vector<256x128xf32>
    %c512 = arith.constant 512 : index
    %c0_46 = arith.constant 0 : index
    %42 = vector.load %arg4[%c512, %c0_46] : memref<1152x128xf32, #tpu.memory_space<vmem>>, vector<128x128xf32>
    %cst_47 = arith.constant dense<0.000000e+00> : vector<256x128xf32>
    %43 = tpu.matmul %41, %42, %cst_47 {dimension_numbers = #tpu.dot_dimension_numbers<[1], [0], [0], [1], [0, 0, 1, 1], [], []>} : vector<256x128xf32>, vector<128x128xf32>, vector<256x128xf32> -> vector<256x128xf32>
    %44 = arith.addf %39, %43 : vector<256x128xf32>
    %c1_48 = arith.constant 1 : index
    %c2_49 = arith.constant 2 : index
    %c0_50 = arith.constant 0 : index
    %45 = vector.load %arg8[%c1_48, %c2_49, %c0_50] : memref<18x32x128xf32, #tpu.memory_space<vmem>>, vector<16x16x128xf32>
    %46 = vector.shape_cast %45 : vector<16x16x128xf32> to vector<256x128xf32>
    %c640 = arith.constant 640 : index
    %c0_51 = arith.constant 0 : index
    %47 = vector.load %arg4[%c640, %c0_51] : memref<1152x128xf32, #tpu.memory_space<vmem>>, vector<128x128xf32>
    %cst_52 = arith.constant dense<0.000000e+00> : vector<256x128xf32>
    %48 = tpu.matmul %46, %47, %cst_52 {dimension_numbers = #tpu.dot_dimension_numbers<[1], [0], [0], [1], [0, 0, 1, 1], [], []>} : vector<256x128xf32>, vector<128x128xf32>, vector<256x128xf32> -> vector<256x128xf32>
    %49 = arith.addf %44, %48 : vector<256x128xf32>
    %c2_53 = arith.constant 2 : index
    %c0_54 = arith.constant 0 : index
    %c0_55 = arith.constant 0 : index
    %50 = vector.load %arg8[%c2_53, %c0_54, %c0_55] : memref<18x32x128xf32, #tpu.memory_space<vmem>>, vector<16x16x128xf32>
    %51 = vector.shape_cast %50 : vector<16x16x128xf32> to vector<256x128xf32>
    %c768 = arith.constant 768 : index
    %c0_56 = arith.constant 0 : index
    %52 = vector.load %arg4[%c768, %c0_56] : memref<1152x128xf32, #tpu.memory_space<vmem>>, vector<128x128xf32>
    %cst_57 = arith.constant dense<0.000000e+00> : vector<256x128xf32>
    %53 = tpu.matmul %51, %52, %cst_57 {dimension_numbers = #tpu.dot_dimension_numbers<[1], [0], [0], [1], [0, 0, 1, 1], [], []>} : vector<256x128xf32>, vector<128x128xf32>, vector<256x128xf32> -> vector<256x128xf32>
    %54 = arith.addf %49, %53 : vector<256x128xf32>
    %c2_58 = arith.constant 2 : index
    %c1_59 = arith.constant 1 : index
    %c0_60 = arith.constant 0 : index
    %55 = vector.load %arg8[%c2_58, %c1_59, %c0_60] : memref<18x32x128xf32, #tpu.memory_space<vmem>>, vector<16x16x128xf32>
    %56 = vector.shape_cast %55 : vector<16x16x128xf32> to vector<256x128xf32>
    %c896 = arith.constant 896 : index
    %c0_61 = arith.constant 0 : index
    %57 = vector.load %arg4[%c896, %c0_61] : memref<1152x128xf32, #tpu.memory_space<vmem>>, vector<128x128xf32>
    %cst_62 = arith.constant dense<0.000000e+00> : vector<256x128xf32>
    %58 = tpu.matmul %56, %57, %cst_62 {dimension_numbers = #tpu.dot_dimension_numbers<[1], [0], [0], [1], [0, 0, 1, 1], [], []>} : vector<256x128xf32>, vector<128x128xf32>, vector<256x128xf32> -> vector<256x128xf32>
    %59 = arith.addf %54, %58 : vector<256x128xf32>
    %c2_63 = arith.constant 2 : index
    %c2_64 = arith.constant 2 : index
    %c0_65 = arith.constant 0 : index
    %60 = vector.load %arg8[%c2_63, %c2_64, %c0_65] : memref<18x32x128xf32, #tpu.memory_space<vmem>>, vector<16x16x128xf32>
    %61 = vector.shape_cast %60 : vector<16x16x128xf32> to vector<256x128xf32>
    %c1024 = arith.constant 1024 : index
    %c0_66 = arith.constant 0 : index
    %62 = vector.load %arg4[%c1024, %c0_66] : memref<1152x128xf32, #tpu.memory_space<vmem>>, vector<128x128xf32>
    %cst_67 = arith.constant dense<0.000000e+00> : vector<256x128xf32>
    %63 = tpu.matmul %61, %62, %cst_67 {dimension_numbers = #tpu.dot_dimension_numbers<[1], [0], [0], [1], [0, 0, 1, 1], [], []>} : vector<256x128xf32>, vector<128x128xf32>, vector<256x128xf32> -> vector<256x128xf32>
    %64 = arith.addf %59, %63 : vector<256x128xf32>
    %65 = vector.shape_cast %64 : vector<256x128xf32> to vector<16x16x128xf32>
    %c0_68 = arith.constant 0 : index
    %c0_69 = arith.constant 0 : index
    %c0_70 = arith.constant 0 : index
    %c0_71 = arith.constant 0 : index
    %66 = vector.load %arg5[%c0_68, %c0_69, %c0_70, %c0_71] : memref<1x16x16x128xf32, #tpu.memory_space<vmem>>, vector<1x16x16x128xf32>
    %67 = vector.shape_cast %66 : vector<1x16x16x128xf32> to vector<16x16x128xf32>
    %68 = vector.shape_cast %65 : vector<16x16x128xf32> to vector<1x16x16x128xf32>
    tpu.vector_store %arg5[%c0_68, %c0_69, %c0_70, %c0_71], %68 {strides = array<i32>} : memref<1x16x16x128xf32, #tpu.memory_space<vmem>>, vector<1x16x16x128xf32>,
    %cst_72 = arith.constant dense<0.000000e+00> : vector<128xf32>
    %69 = vector.multi_reduction <add>, %64, %cst_72 [0] : vector<256x128xf32> to vector<128xf32>
    %70 = vector.shape_cast %69 : vector<128xf32> to vector<1x128xf32>
    %cst_73 = arith.constant 3.906250e-03 : f32
    %71 = vector.broadcast %cst_73 : f32 to vector<1x128xf32>
    %72 = arith.mulf %70, %71 : vector<1x128xf32>
    %73 = vector.broadcast %72 : vector<1x128xf32> to vector<256x128xf32>
    %74 = arith.subf %64, %73 : vector<256x128xf32>
    %75 = arith.mulf %74, %74 : vector<256x128xf32>
    %cst_74 = arith.constant dense<0.000000e+00> : vector<128xf32>
    %76 = vector.multi_reduction <add>, %75, %cst_74 [0] : vector<256x128xf32> to vector<128xf32>
    %77 = vector.shape_cast %76 : vector<128xf32> to vector<1x128xf32>
    %c0_75 = arith.constant 0 : index
    %c0_76 = arith.constant 0 : index
    %c0_77 = arith.constant 0 : index
    %78 = vector.load %arg6[%c0_75, %c0_76, %c0_77] : memref<1x1x128xf32, #tpu.memory_space<vmem>>, vector<1x1x128xf32>
    %79 = vector.shape_cast %78 : vector<1x1x128xf32> to vector<1x128xf32>
    %80 = vector.shape_cast %72 : vector<1x128xf32> to vector<1x1x128xf32>
    tpu.vector_store %arg6[%c0_75, %c0_76, %c0_77], %80 {strides = array<i32>} : memref<1x1x128xf32, #tpu.memory_space<vmem>>, vector<1x1x128xf32>,
    %c0_78 = arith.constant 0 : index
    %c0_79 = arith.constant 0 : index
    %c0_80 = arith.constant 0 : index
    %81 = vector.load %arg7[%c0_78, %c0_79, %c0_80] : memref<1x1x128xf32, #tpu.memory_space<vmem>>, vector<1x1x128xf32>
    %82 = vector.shape_cast %81 : vector<1x1x128xf32> to vector<1x128xf32>
    %83 = vector.shape_cast %77 : vector<1x128xf32> to vector<1x1x128xf32>
    tpu.vector_store %arg7[%c0_78, %c0_79, %c0_80], %83 {strides = array<i32>} : memref<1x1x128xf32, #tpu.memory_space<vmem>>, vector<1x1x128xf32>,
    return
  }
  func.func @transform_0(%arg0: i32) -> (i32, i32, i32, i32) {
    %c0_i32 = arith.constant 0 : i32
    %c0_i32_0 = arith.constant 0 : i32
    %c0_i32_1 = arith.constant 0 : i32
    %c0_i32_2 = arith.constant 0 : i32
    return %arg0, %c0_i32, %c0_i32_0, %c0_i32_1 : i32, i32, i32, i32
  }
  func.func @transform_1(%arg0: i32) -> (i32, i32) {
    %c0_i32 = arith.constant 0 : i32
    %c0_i32_0 = arith.constant 0 : i32
    %c0_i32_1 = arith.constant 0 : i32
    return %c0_i32, %c0_i32_0 : i32, i32
  }
  func.func @transform_2(%arg0: i32) -> (i32, i32) {
    %c0_i32 = arith.constant 0 : i32
    %c0_i32_0 = arith.constant 0 : i32
    %c0_i32_1 = arith.constant 0 : i32
    return %c0_i32, %c0_i32_0 : i32, i32
  }
  func.func @transform_3(%arg0: i32) -> (i32, i32) {
    %c0_i32 = arith.constant 0 : i32
    %c0_i32_0 = arith.constant 0 : i32
    %c0_i32_1 = arith.constant 0 : i32
    return %c0_i32, %c0_i32_0 : i32, i32
  }
  func.func @transform_4(%arg0: i32) -> (i32, i32, i32, i32) {
    %c0_i32 = arith.constant 0 : i32
    %c0_i32_0 = arith.constant 0 : i32
    %c0_i32_1 = arith.constant 0 : i32
    %c0_i32_2 = arith.constant 0 : i32
    return %arg0, %c0_i32, %c0_i32_0, %c0_i32_1 : i32, i32, i32, i32
  }
  func.func @transform_5(%arg0: i32) -> (i32, i32, i32) {
    %c0_i32 = arith.constant 0 : i32
    %c0_i32_0 = arith.constant 0 : i32
    %c0_i32_1 = arith.constant 0 : i32
    return %arg0, %c0_i32, %c0_i32_0 : i32, i32, i32
  }
  func.func @transform_6(%arg0: i32) -> (i32, i32, i32) {
    %c0_i32 = arith.constant 0 : i32
    %c0_i32_0 = arith.constant 0 : i32
    %c0_i32_1 = arith.constant 0 : i32
    return %arg0, %c0_i32, %c0_i32_0 : i32, i32, i32
  }
}

module attributes {stable_mosaic.version = 11 : i64} {
  func.func @_bn_add_relu_kernel(%arg0: i32, %arg1: memref<2x16x16x128xf32, #tpu.memory_space<vmem>>, %arg2: memref<1x128xf32, #tpu.memory_space<vmem>>, %arg3: memref<1x128xf32, #tpu.memory_space<vmem>>, %arg4: memref<2x16x16x128xf32, #tpu.memory_space<vmem>>, %arg5: memref<2x16x16x128xf32, #tpu.memory_space<vmem>>) attributes {dimension_semantics = [#tpu.dimension_semantics<parallel>], iteration_bounds = array<i64: 1>, scalar_prefetch = 0 : i64, scratch_operands = 0 : i64, tpu.core_type = #tpu.core_type<tc>, window_params = [{transform_indices = @transform_0, window_bounds = array<i64: 2, 16, 16, 128>}, {pipeline_mode = #tpu.pipeline_mode<synchronous>, transform_indices = @transform_1, window_bounds = array<i64: 1, 128>}, {pipeline_mode = #tpu.pipeline_mode<synchronous>, transform_indices = @transform_2, window_bounds = array<i64: 1, 128>}, {transform_indices = @transform_3, window_bounds = array<i64: 2, 16, 16, 128>}, {transform_indices = @transform_4, window_bounds = array<i64: 2, 16, 16, 128>}]} {
    %c0 = arith.constant 0 : index
    %c0_0 = arith.constant 0 : index
    %c0_1 = arith.constant 0 : index
    %c0_2 = arith.constant 0 : index
    %0 = vector.load %arg1[%c0, %c0_0, %c0_1, %c0_2] : memref<2x16x16x128xf32, #tpu.memory_space<vmem>>, vector<2x16x16x128xf32>
    %c0_3 = arith.constant 0 : index
    %c0_4 = arith.constant 0 : index
    %1 = vector.load %arg2[%c0_3, %c0_4] : memref<1x128xf32, #tpu.memory_space<vmem>>, vector<1x128xf32>
    %2 = vector.shape_cast %1 : vector<1x128xf32> to vector<1x1x1x128xf32>
    %3 = vector.broadcast %2 : vector<1x1x1x128xf32> to vector<2x16x16x128xf32>
    %4 = arith.mulf %0, %3 : vector<2x16x16x128xf32>
    %c0_5 = arith.constant 0 : index
    %c0_6 = arith.constant 0 : index
    %5 = vector.load %arg3[%c0_5, %c0_6] : memref<1x128xf32, #tpu.memory_space<vmem>>, vector<1x128xf32>
    %6 = vector.shape_cast %5 : vector<1x128xf32> to vector<1x1x1x128xf32>
    %7 = vector.broadcast %6 : vector<1x1x1x128xf32> to vector<2x16x16x128xf32>
    %8 = arith.addf %4, %7 : vector<2x16x16x128xf32>
    %c0_7 = arith.constant 0 : index
    %c0_8 = arith.constant 0 : index
    %c0_9 = arith.constant 0 : index
    %c0_10 = arith.constant 0 : index
    %9 = vector.load %arg4[%c0_7, %c0_8, %c0_9, %c0_10] : memref<2x16x16x128xf32, #tpu.memory_space<vmem>>, vector<2x16x16x128xf32>
    %10 = arith.addf %8, %9 : vector<2x16x16x128xf32>
    %cst = arith.constant 0.000000e+00 : f32
    %11 = vector.broadcast %cst : f32 to vector<2x16x16x128xf32>
    %12 = arith.maximumf %10, %11 : vector<2x16x16x128xf32>
    %c0_11 = arith.constant 0 : index
    %c0_12 = arith.constant 0 : index
    %c0_13 = arith.constant 0 : index
    %c0_14 = arith.constant 0 : index
    %13 = vector.load %arg5[%c0_11, %c0_12, %c0_13, %c0_14] : memref<2x16x16x128xf32, #tpu.memory_space<vmem>>, vector<2x16x16x128xf32>
    tpu.vector_store %arg5[%c0_11, %c0_12, %c0_13, %c0_14], %12 {strides = array<i32>} : memref<2x16x16x128xf32, #tpu.memory_space<vmem>>, vector<2x16x16x128xf32>,
    return
  }
  func.func @transform_0(%arg0: i32) -> (i32, i32, i32, i32) {
    %c0_i32 = arith.constant 0 : i32
    %c0_i32_0 = arith.constant 0 : i32
    %c0_i32_1 = arith.constant 0 : i32
    %c0_i32_2 = arith.constant 0 : i32
    return %arg0, %c0_i32, %c0_i32_0, %c0_i32_1 : i32, i32, i32, i32
  }
  func.func @transform_1(%arg0: i32) -> (i32, i32) {
    %c0_i32 = arith.constant 0 : i32
    %c0_i32_0 = arith.constant 0 : i32
    %c0_i32_1 = arith.constant 0 : i32
    return %c0_i32, %c0_i32_0 : i32, i32
  }
  func.func @transform_2(%arg0: i32) -> (i32, i32) {
    %c0_i32 = arith.constant 0 : i32
    %c0_i32_0 = arith.constant 0 : i32
    %c0_i32_1 = arith.constant 0 : i32
    return %c0_i32, %c0_i32_0 : i32, i32
  }
  func.func @transform_3(%arg0: i32) -> (i32, i32, i32, i32) {
    %c0_i32 = arith.constant 0 : i32
    %c0_i32_0 = arith.constant 0 : i32
    %c0_i32_1 = arith.constant 0 : i32
    %c0_i32_2 = arith.constant 0 : i32
    return %arg0, %c0_i32, %c0_i32_0, %c0_i32_1 : i32, i32, i32, i32
  }
  func.func @transform_4(%arg0: i32) -> (i32, i32, i32, i32) {
    %c0_i32 = arith.constant 0 : i32
    %c0_i32_0 = arith.constant 0 : i32
    %c0_i32_1 = arith.constant 0 : i32
    %c0_i32_2 = arith.constant 0 : i32
    return %arg0, %c0_i32, %c0_i32_0, %c0_i32_1 : i32, i32, i32, i32
  }
}

</mosaic_0001>

<bundles_post_ra>
// kernel: basic_block_forward.5
= control target key start
LH: loop header
LB: loop body
LE: loop exit
PB: predicated region body
PF: predicated region fallthrough
CT: control target
= control target key end

     0   :  { %s1224_s0 = inlined_call_operand.vmem [shape: f32[2,16,16,128], index: 0, kind: input, shape index: {}]   ;;  %s1225_s1 = inlined_call_operand.vmem [shape: f32[1,128], index: 1, kind: input, shape index: {}]   ;;  %s1226_s2 = inlined_call_operand.vmem [shape: f32[1,128], index: 2, kind: input, shape index: {}]   ;;  %s1227_s3 = inlined_call_operand.vmem [shape: f32[2,16,16,128], index: 3, kind: input, shape index: {}]   ;;  %s1228_s4 = inlined_call_operand.vmem [shape: f32[2,16,16,128], index: 4, kind: output, shape index: {}]  }
   0x1   :  { %v17_v0 = vld [vmem:[%s1224_s0] sm:$0xff]  ;;  %v18_v4 = vld [vmem:[%s1224_s0 + $0x8] sm:$0xff]  ;;  %v19_v7 = vld [vmem:[%s1224_s0 + $0x10] sm:$0xff] }
   0x2   :  { %v516_v1 = vld [vmem:[%s1225_s1] ss:$0 sm:$0xff]  ;;  %v20_v8 = vld [vmem:[%s1224_s0 + $0x18] sm:$0xff]  ;;  %v224_v10 = vld [vmem:[%s1227_s3 + $0x8] sm:$0xff] }
   0x3   :  { %v521_v2 = vld [vmem:[%s1226_s2] ss:$0 sm:$0xff]  ;;  %v88_v3 = vmul.f32 %v516_v1, %v17_v0  ;;  %v89_v6 = vmul.f32 %v516_v1, %v18_v4  ;;  %v90_v11 = vmul.f32 %v516_v1, %v19_v7  ;;  %v225_v12 = vld [vmem:[%s1227_s3 + $0x10] sm:$0xff]  ;;  %v91_v13 = vmul.f32 %v516_v1, %v20_v8  ;;  %v226_v16 = vld [vmem:[%s1227_s3 + $0x18] sm:$0xff] }
   0x4   :  { %v223_v5 = vld [vmem:[%s1227_s3] sm:$0xff]  ;;  %v22_v18 = vld [vmem:[%s1224_s0 + $0x28] sm:$0xff]  ;;  %v23_v19 = vld [vmem:[%s1224_s0 + $0x30] sm:$0xff] }
   0x5   :  { %v159_v9 = vadd.f32 %v521_v2, %v88_v3  ;;  %v21_v14 = vld [vmem:[%s1224_s0 + $0x20] sm:$0xff]  ;;  %v160_v15 = vadd.f32 %v521_v2, %v89_v6  ;;  %v161_v21 = vadd.f32 %v521_v2, %v90_v11  ;;  %v162_v22 = vadd.f32 %v521_v2, %v91_v13  ;;  %v24_v25 = vld [vmem:[%s1224_s0 + $0x38] sm:$0xff]  ;;  %v228_v28 = vld [vmem:[%s1227_s3 + $0x28] sm:$0xff] }
   0x6   :  { %v92_v17 = vmul.f32 %v516_v1, %v21_v14  ;;  %v227_v23 = vld [vmem:[%s1227_s3 + $0x20] sm:$0xff]  ;;  %v93_v24 = vmul.f32 %v516_v1, %v22_v18  ;;  %v94_v29 = vmul.f32 %v516_v1, %v23_v19  ;;  %v95_v30 = vmul.f32 %v516_v1, %v24_v25  ;;  %v229_v36 = vld [vmem:[%s1227_s3 + $0x30] sm:$0xff]  ;;  %v230_v37 = vld [vmem:[%s1227_s3 + $0x38] sm:$0xff] }
   0x7   :  { %v287_v20 = vadd.f32 %v223_v5, %v159_v9  ;;  %v288_v26 = vadd.f32 %v224_v10, %v160_v15  ;;  %v25_v31 = vld [vmem:[%s1224_s0 + $0x40] sm:$0xff]  ;;  %v289_v33 = vadd.f32 %v225_v12, %v161_v21  ;;  %v290_v34 = vadd.f32 %v226_v16, %v162_v22  ;;  %v26_v38 = vld [vmem:[%s1224_s0 + $0x48] sm:$0xff]  ;;  %v27_v43 = vld [vmem:[%s1224_s0 + $0x50] sm:$0xff] }
   0x8   :  { %v163_v27 = vadd.f32 %v521_v2, %v92_v17  ;;  %v164_v35 = vadd.f32 %v521_v2, %v93_v24  ;;  %v165_v41 = vadd.f32 %v521_v2, %v94_v29  ;;  %v166_v42 = vadd.f32 %v521_v2, %v95_v30  ;;  %v28_v44 = vld [vmem:[%s1224_s0 + $0x58] sm:$0xff]  ;;  %v29_v49 = vld [vmem:[%s1224_s0 + $0x60] sm:$0xff]  ;;  %v30_v55 = vld [vmem:[%s1224_s0 + $0x68] sm:$0xff] }
   0x9   :  { %v351_v32 = vmax.f32 %v287_v20, 0.0  ;;  %v352_v39 = vmax.f32 %v288_v26, 0.0  ;;  %v353_v45 = vmax.f32 %v289_v33, 0.0  ;;  %v354_v46 = vmax.f32 %v290_v34, 0.0  ;;  %v231_v53 = vld [vmem:[%s1227_s3 + $0x40] sm:$0xff]  ;;  %v232_v58 = vld [vmem:[%s1227_s3 + $0x48] sm:$0xff] }
   0xa   :  { %v291_v40 = vadd.f32 %v227_v23, %v163_v27  ;;  %v292_v47 = vadd.f32 %v228_v28, %v164_v35  ;;  %v96_v48 = vmul.f32 %v516_v1, %v25_v31  ;;  %v293_v51 = vadd.f32 %v229_v36, %v165_v41  ;;  %v31_v61 = vld [vmem:[%s1224_s0 + $0x70] sm:$0xff]  ;;  %v32_v62 = vld [vmem:[%s1224_s0 + $0x78] sm:$0xff]  ;;  %v235_v10 = vld [vmem:[%s1227_s3 + $0x60] sm:$0xff] }
   0xb   :  { %415 = vst [vmem:[%s1228_s4] sm:$0xff] %v351_v32  ;;  %416 = vst [vmem:[%s1228_s4 + $0x8] sm:$0xff] %v352_v39  ;;  %v294_v52 = vadd.f32 %v230_v37, %v166_v42  ;;  %v97_v54 = vmul.f32 %v516_v1, %v26_v38  ;;  %v98_v59 = vmul.f32 %v516_v1, %v27_v43  ;;  %v233_v4 = vld [vmem:[%s1227_s3 + $0x50] sm:$0xff]  ;;  %v234_v5 = vld [vmem:[%s1227_s3 + $0x58] sm:$0xff] }
   0xc   :  { %v355_v50 = vmax.f32 %v291_v40, 0.0  ;;  %417 = vst [vmem:[%s1228_s4 + $0x10] sm:$0xff] %v353_v45  ;;  %418 = vst [vmem:[%s1228_s4 + $0x18] sm:$0xff] %v354_v46  ;;  %v356_v56 = vmax.f32 %v292_v47, 0.0  ;;  %v167_v57 = vadd.f32 %v521_v2, %v96_v48  ;;  %v99_v60 = vmul.f32 %v516_v1, %v28_v44  ;;  %v236_v14 = vld [vmem:[%s1227_s3 + $0x68] sm:$0xff]  ;;  %v33_v17 = vld [vmem:[%s1224_s0 + $0x80] sm:$0xff] }
   0xd   :  { %v357_v63 = vmax.f32 %v293_v51, 0.0  ;;  %v358_v0 = vmax.f32 %v294_v52, 0.0  ;;  %v168_v3 = vadd.f32 %v521_v2, %v97_v54  ;;  %v100_v6 = vmul.f32 %v516_v1, %v29_v49  ;;  %v237_v22 = vld [vmem:[%s1227_s3 + $0x70] sm:$0xff]  ;;  %v238_v23 = vld [vmem:[%s1227_s3 + $0x78] sm:$0xff]  ;;  %v34_v24 = vld [vmem:[%s1224_s0 + $0x88] sm:$0xff] }
   0xe   :  { %419 = vst [vmem:[%s1228_s4 + $0x20] sm:$0xff] %v355_v50  ;;  %420 = vst [vmem:[%s1228_s4 + $0x28] sm:$0xff] %v356_v56  ;;  %v295_v7 = vadd.f32 %v231_v53, %v167_v57  ;;  %v169_v8 = vadd.f32 %v521_v2, %v98_v59  ;;  %v170_v9 = vadd.f32 %v521_v2, %v99_v60  ;;  %v35_v29 = vld [vmem:[%s1224_s0 + $0x90] sm:$0xff]  ;;  %v36_v30 = vld [vmem:[%s1224_s0 + $0x98] sm:$0xff] }
   0xf   :  { %v101_v11 = vmul.f32 %v516_v1, %v30_v55  ;;  %421 = vst [vmem:[%s1228_s4 + $0x30] sm:$0xff] %v357_v63  ;;  %422 = vst [vmem:[%s1228_s4 + $0x38] sm:$0xff] %v358_v0  ;;  %v296_v12 = vadd.f32 %v232_v58, %v168_v3  ;;  %v171_v13 = vadd.f32 %v521_v2, %v100_v6  ;;  %v37_v35 = vld [vmem:[%s1224_s0 + $0xa0] sm:$0xff]  ;;  %v38_v41 = vld [vmem:[%s1224_s0 + $0xa8] sm:$0xff] }
  0x10   :  { %v102_v15 = vmul.f32 %v516_v1, %v31_v61  ;;  %v103_v16 = vmul.f32 %v516_v1, %v32_v62  ;;  %v359_v18 = vmax.f32 %v295_v7, 0.0  ;;  %v297_v19 = vadd.f32 %v233_v4, %v169_v8  ;;  %v239_v39 = vld [vmem:[%s1227_s3 + $0x80] sm:$0xff]  ;;  %v240_v44 = vld [vmem:[%s1227_s3 + $0x88] sm:$0xff]  ;;  %v39_v47 = vld [vmem:[%s1224_s0 + $0xb0] sm:$0xff] }
  0x11   :  { %v298_v20 = vadd.f32 %v234_v5, %v170_v9  ;;  %v172_v21 = vadd.f32 %v521_v2, %v101_v11  ;;  %v360_v25 = vmax.f32 %v296_v12, 0.0  ;;  %v299_v26 = vadd.f32 %v235_v10, %v171_v13  ;;  %v40_v48 = vld [vmem:[%s1224_s0 + $0xb8] sm:$0xff]  ;;  %v241_v52 = vld [vmem:[%s1227_s3 + $0x90] sm:$0xff]  ;;  %v243_v58 = vld [vmem:[%s1227_s3 + $0xa0] sm:$0xff] }
  0x12   :  { %v173_v27 = vadd.f32 %v521_v2, %v102_v15  ;;  %v174_v28 = vadd.f32 %v521_v2, %v103_v16  ;;  %423 = vst [vmem:[%s1228_s4 + $0x40] sm:$0xff] %v359_v18  ;;  %v361_v31 = vmax.f32 %v297_v19, 0.0  ;;  %v104_v34 = vmul.f32 %v516_v1, %v33_v17  ;;  %v242_v53 = vld [vmem:[%s1227_s3 + $0x98] sm:$0xff]  ;;  %v244_v62 = vld [vmem:[%s1227_s3 + $0xa8] sm:$0xff]  ;;  %v41_v3 = vld [vmem:[%s1224_s0 + $0xc0] sm:$0xff] }
  0x13   :  { %v362_v32 = vmax.f32 %v298_v20, 0.0  ;;  %v300_v33 = vadd.f32 %v236_v14, %v172_v21  ;;  %424 = vst [vmem:[%s1228_s4 + $0x48] sm:$0xff] %v360_v25  ;;  %v363_v36 = vmax.f32 %v299_v26, 0.0  ;;  %v105_v40 = vmul.f32 %v516_v1, %v34_v24  ;;  %v245_v8 = vld [vmem:[%s1227_s3 + $0xb0] sm:$0xff]  ;;  %v246_v9 = vld [vmem:[%s1227_s3 + $0xb8] sm:$0xff]  ;;  %v42_v10 = vld [vmem:[%s1224_s0 + $0xc8] sm:$0xff] }
  0x14   :  { %v301_v37 = vadd.f32 %v237_v22, %v173_v27  ;;  %v302_v38 = vadd.f32 %v238_v23, %v174_v28  ;;  %425 = vst [vmem:[%s1228_s4 + $0x50] sm:$0xff] %v361_v31  ;;  %v175_v43 = vadd.f32 %v521_v2, %v104_v34  ;;  %v106_v45 = vmul.f32 %v516_v1, %v35_v29  ;;  %v43_v15 = vld [vmem:[%s1224_s0 + $0xd0] sm:$0xff]  ;;  %v44_v16 = vld [vmem:[%s1224_s0 + $0xd8] sm:$0xff]  ;;  %v45_v21 = vld [vmem:[%s1224_s0 + $0xe0] sm:$0xff] }
  0x15   :  { %426 = vst [vmem:[%s1228_s4 + $0x58] sm:$0xff] %v362_v32  ;;  %v364_v42 = vmax.f32 %v300_v33, 0.0  ;;  %v107_v46 = vmul.f32 %v516_v1, %v36_v30  ;;  %427 = vst [vmem:[%s1228_s4 + $0x60] sm:$0xff] %v363_v36  ;;  %v176_v51 = vadd.f32 %v521_v2, %v105_v40  ;;  %v108_v54 = vmul.f32 %v516_v1, %v37_v35  ;;  %v247_v25 = vld [vmem:[%s1227_s3 + $0xc0] sm:$0xff]  ;;  %v46_v27 = vld [vmem:[%s1224_s0 + $0xe8] sm:$0xff] }
  0x16   :  { %v365_v49 = vmax.f32 %v301_v37, 0.0  ;;  %v366_v50 = vmax.f32 %v302_v38, 0.0  ;;  %v303_v55 = vadd.f32 %v239_v39, %v175_v43  ;;  %v177_v56 = vadd.f32 %v521_v2, %v106_v45  ;;  %v248_v30 = vld [vmem:[%s1227_s3 + $0xc8] sm:$0xff]  ;;  %v47_v33 = vld [vmem:[%s1224_s0 + $0xf0] sm:$0xff]  ;;  %v48_v34 = vld [vmem:[%s1224_s0 + $0xf8] sm:$0xff] }
  0x17   :  { %428 = vst [vmem:[%s1228_s4 + $0x68] sm:$0xff] %v364_v42  ;;  %v178_v57 = vadd.f32 %v521_v2, %v107_v46  ;;  %v109_v59 = vmul.f32 %v516_v1, %v38_v41  ;;  %v304_v60 = vadd.f32 %v240_v44, %v176_v51  ;;  %v179_v61 = vadd.f32 %v521_v2, %v108_v54  ;;  %v249_v38 = vld [vmem:[%s1227_s3 + $0xd0] sm:$0xff]  ;;  %v250_v39 = vld [vmem:[%s1227_s3 + $0xd8] sm:$0xff]  ;;  %v251_v44 = vld [vmem:[%s1227_s3 + $0xe0] sm:$0xff] }
  0x18   :  { %429 = vst [vmem:[%s1228_s4 + $0x70] sm:$0xff] %v365_v49  ;;  %430 = vst [vmem:[%s1228_s4 + $0x78] sm:$0xff] %v366_v50  ;;  %v110_v63 = vmul.f32 %v516_v1, %v39_v47  ;;  %v111_v0 = vmul.f32 %v516_v1, %v40_v48  ;;  %v367_v4 = vmax.f32 %v303_v55, 0.0  ;;  %v305_v5 = vadd.f32 %v241_v52, %v177_v56  ;;  %v252_v48 = vld [vmem:[%s1227_s3 + $0xe8] sm:$0xff]  ;;  %v49_v51 = vld [vmem:[%s1224_s0 + $0x100] sm:$0xff] }
  0x19   :  { %v306_v6 = vadd.f32 %v242_v53, %v178_v57  ;;  %v180_v7 = vadd.f32 %v521_v2, %v109_v59  ;;  %v368_v11 = vmax.f32 %v304_v60, 0.0  ;;  %v307_v12 = vadd.f32 %v243_v58, %v179_v61  ;;  %v253_v56 = vld [vmem:[%s1227_s3 + $0xf0] sm:$0xff]  ;;  %v254_v57 = vld [vmem:[%s1227_s3 + $0xf8] sm:$0xff]  ;;  %v50_v58 = vld [vmem:[%s1224_s0 + $0x108] sm:$0xff] }
  0x1a   :  { %v181_v13 = vadd.f32 %v521_v2, %v110_v63  ;;  %v182_v14 = vadd.f32 %v521_v2, %v111_v0  ;;  %431 = vst [vmem:[%s1228_s4 + $0x80] sm:$0xff] %v367_v4  ;;  %v369_v17 = vmax.f32 %v305_v5, 0.0  ;;  %v112_v20 = vmul.f32 %v516_v1, %v41_v3  ;;  %v51_v63 = vld [vmem:[%s1224_s0 + $0x110] sm:$0xff]  ;;  %v52_v0 = vld [vmem:[%s1224_s0 + $0x118] sm:$0xff] }
  0x1b   :  { %v370_v18 = vmax.f32 %v306_v6, 0.0  ;;  %v308_v19 = vadd.f32 %v244_v62, %v180_v7  ;;  %432 = vst [vmem:[%s1228_s4 + $0x88] sm:$0xff] %v368_v11  ;;  %v371_v22 = vmax.f32 %v307_v12, 0.0  ;;  %v113_v26 = vmul.f32 %v516_v1, %v42_v10  ;;  %v53_v7 = vld [vmem:[%s1224_s0 + $0x120] sm:$0xff] }
  0x1c   :  { %v309_v23 = vadd.f32 %v245_v8, %v181_v13  ;;  %v310_v24 = vadd.f32 %v246_v9, %v182_v14  ;;  %433 = vst [vmem:[%s1228_s4 + $0x90] sm:$0xff] %v369_v17  ;;  %v183_v29 = vadd.f32 %v521_v2, %v112_v20  ;;  %v114_v31 = vmul.f32 %v516_v1, %v43_v15  ;;  %v255_v11 = vld [vmem:[%s1227_s3 + $0x100] sm:$0xff]  ;;  %v54_v13 = vld [vmem:[%s1224_s0 + $0x128] sm:$0xff]  ;;  %v56_v20 = vld [vmem:[%s1224_s0 + $0x138] sm:$0xff] }
  0x1d   :  { %434 = vst [vmem:[%s1228_s4 + $0x98] sm:$0xff] %v370_v18  ;;  %v372_v28 = vmax.f32 %v308_v19, 0.0  ;;  %v115_v32 = vmul.f32 %v516_v1, %v44_v16  ;;  %435 = vst [vmem:[%s1228_s4 + $0xa0] sm:$0xff] %v371_v22  ;;  %v184_v37 = vadd.f32 %v521_v2, %v113_v26  ;;  %v116_v40 = vmul.f32 %v516_v1, %v45_v21  ;;  %v256_v16 = vld [vmem:[%s1227_s3 + $0x108] sm:$0xff]  ;;  %v55_v19 = vld [vmem:[%s1224_s0 + $0x130] sm:$0xff] }
  0x1e   :  { %v373_v35 = vmax.f32 %v309_v23, 0.0  ;;  %v374_v36 = vmax.f32 %v310_v24, 0.0  ;;  %v311_v41 = vadd.f32 %v247_v25, %v183_v29  ;;  %v185_v42 = vadd.f32 %v521_v2, %v114_v31  ;;  %v257_v24 = vld [vmem:[%s1227_s3 + $0x110] sm:$0xff]  ;;  %v258_v25 = vld [vmem:[%s1227_s3 + $0x118] sm:$0xff] }
  0x1f   :  { %436 = vst [vmem:[%s1228_s4 + $0xa8] sm:$0xff] %v372_v28  ;;  %v186_v43 = vadd.f32 %v521_v2, %v115_v32  ;;  %v117_v45 = vmul.f32 %v516_v1, %v46_v27  ;;  %v312_v46 = vadd.f32 %v248_v30, %v184_v37  ;;  %v187_v47 = vadd.f32 %v521_v2, %v116_v40  ;;  %v259_v30 = vld [vmem:[%s1227_s3 + $0x120] sm:$0xff] }
  0x20   :  { %437 = vst [vmem:[%s1228_s4 + $0xb0] sm:$0xff] %v373_v35  ;;  %438 = vst [vmem:[%s1228_s4 + $0xb8] sm:$0xff] %v374_v36  ;;  %v118_v49 = vmul.f32 %v516_v1, %v47_v33  ;;  %v119_v50 = vmul.f32 %v516_v1, %v48_v34  ;;  %v375_v52 = vmax.f32 %v311_v41, 0.0  ;;  %v313_v53 = vadd.f32 %v249_v38, %v185_v42  ;;  %v260_v34 = vld [vmem:[%s1227_s3 + $0x128] sm:$0xff]  ;;  %v57_v37 = vld [vmem:[%s1224_s0 + $0x140] sm:$0xff] }
  0x21   :  { %v314_v54 = vadd.f32 %v250_v39, %v186_v43  ;;  %v188_v55 = vadd.f32 %v521_v2, %v117_v45  ;;  %v376_v59 = vmax.f32 %v312_v46, 0.0  ;;  %v315_v60 = vadd.f32 %v251_v44, %v187_v47  ;;  %v261_v42 = vld [vmem:[%s1227_s3 + $0x130] sm:$0xff]  ;;  %v262_v43 = vld [vmem:[%s1227_s3 + $0x138] sm:$0xff]  ;;  %v58_v44 = vld [vmem:[%s1224_s0 + $0x148] sm:$0xff] }
  0x22   :  { %v189_v61 = vadd.f32 %v521_v2, %v118_v49  ;;  %v190_v62 = vadd.f32 %v521_v2, %v119_v50  ;;  %439 = vst [vmem:[%s1228_s4 + $0xc0] sm:$0xff] %v375_v52  ;;  %v377_v3 = vmax.f32 %v313_v53, 0.0  ;;  %v120_v6 = vmul.f32 %v516_v1, %v49_v51  ;;  %v59_v49 = vld [vmem:[%s1224_s0 + $0x150] sm:$0xff]  ;;  %v60_v50 = vld [vmem:[%s1224_s0 + $0x158] sm:$0xff] }
  0x23   :  { %v378_v4 = vmax.f32 %v314_v54, 0.0  ;;  %v316_v5 = vadd.f32 %v252_v48, %v188_v55  ;;  %440 = vst [vmem:[%s1228_s4 + $0xc8] sm:$0xff] %v376_v59  ;;  %v379_v8 = vmax.f32 %v315_v60, 0.0  ;;  %v121_v12 = vmul.f32 %v516_v1, %v50_v58  ;;  %v61_v55 = vld [vmem:[%s1224_s0 + $0x160] sm:$0xff] }
  0x24   :  { %v317_v9 = vadd.f32 %v253_v56, %v189_v61  ;;  %v318_v10 = vadd.f32 %v254_v57, %v190_v62  ;;  %441 = vst [vmem:[%s1228_s4 + $0xd0] sm:$0xff] %v377_v3  ;;  %v191_v15 = vadd.f32 %v521_v2, %v120_v6  ;;  %v122_v17 = vmul.f32 %v516_v1, %v51_v63  ;;  %v263_v59 = vld [vmem:[%s1227_s3 + $0x140] sm:$0xff]  ;;  %v62_v61 = vld [vmem:[%s1224_s0 + $0x168] sm:$0xff]  ;;  %v64_v6 = vld [vmem:[%s1224_s0 + $0x178] sm:$0xff] }
  0x25   :  { %442 = vst [vmem:[%s1228_s4 + $0xd8] sm:$0xff] %v378_v4  ;;  %v380_v14 = vmax.f32 %v316_v5, 0.0  ;;  %v123_v18 = vmul.f32 %v516_v1, %v52_v0  ;;  %443 = vst [vmem:[%s1228_s4 + $0xe0] sm:$0xff] %v379_v8  ;;  %v192_v23 = vadd.f32 %v521_v2, %v121_v12  ;;  %v124_v26 = vmul.f32 %v516_v1, %v53_v7  ;;  %v264_v0 = vld [vmem:[%s1227_s3 + $0x148] sm:$0xff]  ;;  %v63_v5 = vld [vmem:[%s1224_s0 + $0x170] sm:$0xff] }
  0x26   :  { %v381_v21 = vmax.f32 %v317_v9, 0.0  ;;  %v382_v22 = vmax.f32 %v318_v10, 0.0  ;;  %v319_v27 = vadd.f32 %v255_v11, %v191_v15  ;;  %v193_v28 = vadd.f32 %v521_v2, %v122_v17  ;;  %v265_v10 = vld [vmem:[%s1227_s3 + $0x150] sm:$0xff]  ;;  %v266_v11 = vld [vmem:[%s1227_s3 + $0x158] sm:$0xff] }
  0x27   :  { %444 = vst [vmem:[%s1228_s4 + $0xe8] sm:$0xff] %v380_v14  ;;  %v194_v29 = vadd.f32 %v521_v2, %v123_v18  ;;  %v125_v31 = vmul.f32 %v516_v1, %v54_v13  ;;  %v320_v32 = vadd.f32 %v256_v16, %v192_v23  ;;  %v195_v33 = vadd.f32 %v521_v2, %v124_v26  ;;  %v267_v16 = vld [vmem:[%s1227_s3 + $0x160] sm:$0xff] }
  0x28   :  { %445 = vst [vmem:[%s1228_s4 + $0xf0] sm:$0xff] %v381_v21  ;;  %446 = vst [vmem:[%s1228_s4 + $0xf8] sm:$0xff] %v382_v22  ;;  %v126_v35 = vmul.f32 %v516_v1, %v55_v19  ;;  %v127_v36 = vmul.f32 %v516_v1, %v56_v20  ;;  %v383_v38 = vmax.f32 %v319_v27, 0.0  ;;  %v321_v39 = vadd.f32 %v257_v24, %v193_v28  ;;  %v268_v20 = vld [vmem:[%s1227_s3 + $0x168] sm:$0xff]  ;;  %v65_v23 = vld [vmem:[%s1224_s0 + $0x180] sm:$0xff] }
  0x29   :  { %v322_v40 = vadd.f32 %v258_v25, %v194_v29  ;;  %v196_v41 = vadd.f32 %v521_v2, %v125_v31  ;;  %v384_v45 = vmax.f32 %v320_v32, 0.0  ;;  %v323_v46 = vadd.f32 %v259_v30, %v195_v33  ;;  %v269_v28 = vld [vmem:[%s1227_s3 + $0x170] sm:$0xff]  ;;  %v270_v29 = vld [vmem:[%s1227_s3 + $0x178] sm:$0xff]  ;;  %v66_v30 = vld [vmem:[%s1224_s0 + $0x188] sm:$0xff] }
  0x2a   :  { %v197_v47 = vadd.f32 %v521_v2, %v126_v35  ;;  %v198_v48 = vadd.f32 %v521_v2, %v127_v36  ;;  %447 = vst [vmem:[%s1228_s4 + $0x100] sm:$0xff] %v383_v38  ;;  %v385_v51 = vmax.f32 %v321_v39, 0.0  ;;  %v128_v54 = vmul.f32 %v516_v1, %v57_v37  ;;  %v67_v35 = vld [vmem:[%s1224_s0 + $0x190] sm:$0xff]  ;;  %v68_v36 = vld [vmem:[%s1224_s0 + $0x198] sm:$0xff] }
  0x2b   :  { %v386_v52 = vmax.f32 %v322_v40, 0.0  ;;  %v324_v53 = vadd.f32 %v260_v34, %v196_v41  ;;  %448 = vst [vmem:[%s1228_s4 + $0x108] sm:$0xff] %v384_v45  ;;  %v387_v56 = vmax.f32 %v323_v46, 0.0  ;;  %v129_v60 = vmul.f32 %v516_v1, %v58_v44  ;;  %v69_v41 = vld [vmem:[%s1224_s0 + $0x1a0] sm:$0xff] }
  0x2c   :  { %v325_v57 = vadd.f32 %v261_v42, %v197_v47  ;;  %v326_v58 = vadd.f32 %v262_v43, %v198_v48  ;;  %449 = vst [vmem:[%s1228_s4 + $0x110] sm:$0xff] %v385_v51  ;;  %v199_v63 = vadd.f32 %v521_v2, %v128_v54  ;;  %v130_v3 = vmul.f32 %v516_v1, %v59_v49  ;;  %v271_v45 = vld [vmem:[%s1227_s3 + $0x180] sm:$0xff]  ;;  %v70_v47 = vld [vmem:[%s1224_s0 + $0x1a8] sm:$0xff]  ;;  %v72_v54 = vld [vmem:[%s1224_s0 + $0x1b8] sm:$0xff] }
  0x2d   :  { %450 = vst [vmem:[%s1228_s4 + $0x118] sm:$0xff] %v386_v52  ;;  %v388_v62 = vmax.f32 %v324_v53, 0.0  ;;  %v131_v4 = vmul.f32 %v516_v1, %v60_v50  ;;  %451 = vst [vmem:[%s1228_s4 + $0x120] sm:$0xff] %v387_v56  ;;  %v200_v9 = vadd.f32 %v521_v2, %v129_v60  ;;  %v132_v12 = vmul.f32 %v516_v1, %v61_v55  ;;  %v272_v50 = vld [vmem:[%s1227_s3 + $0x188] sm:$0xff]  ;;  %v71_v53 = vld [vmem:[%s1224_s0 + $0x1b0] sm:$0xff] }
  0x2e   :  { %v389_v7 = vmax.f32 %v325_v57, 0.0  ;;  %v390_v8 = vmax.f32 %v326_v58, 0.0  ;;  %v327_v13 = vadd.f32 %v263_v59, %v199_v63  ;;  %v201_v14 = vadd.f32 %v521_v2, %v130_v3  ;;  %v273_v58 = vld [vmem:[%s1227_s3 + $0x190] sm:$0xff]  ;;  %v274_v59 = vld [vmem:[%s1227_s3 + $0x198] sm:$0xff] }
  0x2f   :  { %452 = vst [vmem:[%s1228_s4 + $0x128] sm:$0xff] %v388_v62  ;;  %v202_v15 = vadd.f32 %v521_v2, %v131_v4  ;;  %v133_v17 = vmul.f32 %v516_v1, %v62_v61  ;;  %v328_v18 = vadd.f32 %v264_v0, %v200_v9  ;;  %v203_v19 = vadd.f32 %v521_v2, %v132_v12  ;;  %v275_v0 = vld [vmem:[%s1227_s3 + $0x1a0] sm:$0xff] }
  0x30   :  { %453 = vst [vmem:[%s1228_s4 + $0x130] sm:$0xff] %v389_v7  ;;  %454 = vst [vmem:[%s1228_s4 + $0x138] sm:$0xff] %v390_v8  ;;  %v134_v21 = vmul.f32 %v516_v1, %v63_v5  ;;  %v135_v22 = vmul.f32 %v516_v1, %v64_v6  ;;  %v391_v24 = vmax.f32 %v327_v13, 0.0  ;;  %v329_v25 = vadd.f32 %v265_v10, %v201_v14  ;;  %v276_v6 = vld [vmem:[%s1227_s3 + $0x1a8] sm:$0xff]  ;;  %v73_v9 = vld [vmem:[%s1224_s0 + $0x1c0] sm:$0xff] }
  0x31   :  { %v330_v26 = vadd.f32 %v266_v11, %v202_v15  ;;  %v204_v27 = vadd.f32 %v521_v2, %v133_v17  ;;  %v392_v31 = vmax.f32 %v328_v18, 0.0  ;;  %v331_v32 = vadd.f32 %v267_v16, %v203_v19  ;;  %v277_v14 = vld [vmem:[%s1227_s3 + $0x1b0] sm:$0xff]  ;;  %v278_v15 = vld [vmem:[%s1227_s3 + $0x1b8] sm:$0xff]  ;;  %v74_v16 = vld [vmem:[%s1224_s0 + $0x1c8] sm:$0xff] }
  0x32   :  { %v205_v33 = vadd.f32 %v521_v2, %v134_v21  ;;  %v206_v34 = vadd.f32 %v521_v2, %v135_v22  ;;  %455 = vst [vmem:[%s1228_s4 + $0x140] sm:$0xff] %v391_v24  ;;  %v393_v37 = vmax.f32 %v329_v25, 0.0  ;;  %v136_v40 = vmul.f32 %v516_v1, %v65_v23  ;;  %v75_v21 = vld [vmem:[%s1224_s0 + $0x1d0] sm:$0xff]  ;;  %v76_v22 = vld [vmem:[%s1224_s0 + $0x1d8] sm:$0xff] }
  0x33   :  { %v394_v38 = vmax.f32 %v330_v26, 0.0  ;;  %v332_v39 = vadd.f32 %v268_v20, %v204_v27  ;;  %456 = vst [vmem:[%s1228_s4 + $0x148] sm:$0xff] %v392_v31  ;;  %v395_v42 = vmax.f32 %v331_v32, 0.0  ;;  %v137_v46 = vmul.f32 %v516_v1, %v66_v30  ;;  %v77_v27 = vld [vmem:[%s1224_s0 + $0x1e0] sm:$0xff] }
  0x34   :  { %v333_v43 = vadd.f32 %v269_v28, %v205_v33  ;;  %v334_v44 = vadd.f32 %v270_v29, %v206_v34  ;;  %457 = vst [vmem:[%s1228_s4 + $0x150] sm:$0xff] %v393_v37  ;;  %v207_v49 = vadd.f32 %v521_v2, %v136_v40  ;;  %v138_v51 = vmul.f32 %v516_v1, %v67_v35  ;;  %v279_v31 = vld [vmem:[%s1227_s3 + $0x1c0] sm:$0xff]  ;;  %v78_v33 = vld [vmem:[%s1224_s0 + $0x1e8] sm:$0xff]  ;;  %v80_v40 = vld [vmem:[%s1224_s0 + $0x1f8] sm:$0xff] }
  0x35   :  { %458 = vst [vmem:[%s1228_s4 + $0x158] sm:$0xff] %v394_v38  ;;  %v396_v48 = vmax.f32 %v332_v39, 0.0  ;;  %v139_v52 = vmul.f32 %v516_v1, %v68_v36  ;;  %459 = vst [vmem:[%s1228_s4 + $0x160] sm:$0xff] %v395_v42  ;;  %v208_v57 = vadd.f32 %v521_v2, %v137_v46  ;;  %v140_v60 = vmul.f32 %v516_v1, %v69_v41  ;;  %v280_v36 = vld [vmem:[%s1227_s3 + $0x1c8] sm:$0xff]  ;;  %v79_v39 = vld [vmem:[%s1224_s0 + $0x1f0] sm:$0xff] }
  0x36   :  { %v397_v55 = vmax.f32 %v333_v43, 0.0  ;;  %v398_v56 = vmax.f32 %v334_v44, 0.0  ;;  %v335_v61 = vadd.f32 %v271_v45, %v207_v49  ;;  %v209_v62 = vadd.f32 %v521_v2, %v138_v51  ;;  %v281_v44 = vld [vmem:[%s1227_s3 + $0x1d0] sm:$0xff]  ;;  %v282_v45 = vld [vmem:[%s1227_s3 + $0x1d8] sm:$0xff] }
  0x37   :  { %460 = vst [vmem:[%s1228_s4 + $0x168] sm:$0xff] %v396_v48  ;;  %v210_v63 = vadd.f32 %v521_v2, %v139_v52  ;;  %v141_v3 = vmul.f32 %v516_v1, %v70_v47  ;;  %v336_v4 = vadd.f32 %v272_v50, %v208_v57  ;;  %v211_v5 = vadd.f32 %v521_v2, %v140_v60  ;;  %v283_v50 = vld [vmem:[%s1227_s3 + $0x1e0] sm:$0xff] }
  0x38   :  { %461 = vst [vmem:[%s1228_s4 + $0x170] sm:$0xff] %v397_v55  ;;  %462 = vst [vmem:[%s1228_s4 + $0x178] sm:$0xff] %v398_v56  ;;  %v142_v7 = vmul.f32 %v516_v1, %v71_v53  ;;  %v143_v8 = vmul.f32 %v516_v1, %v72_v54  ;;  %v399_v10 = vmax.f32 %v335_v61, 0.0  ;;  %v337_v11 = vadd.f32 %v273_v58, %v209_v62  ;;  %v284_v54 = vld [vmem:[%s1227_s3 + $0x1e8] sm:$0xff]  ;;  %v285_v61 = vld [vmem:[%s1227_s3 + $0x1f0] sm:$0xff] }
  0x39   :  { %v338_v12 = vadd.f32 %v274_v59, %v210_v63  ;;  %v212_v13 = vadd.f32 %v521_v2, %v141_v3  ;;  %v400_v17 = vmax.f32 %v336_v4, 0.0  ;;  %v339_v18 = vadd.f32 %v275_v0, %v211_v5  ;;  %v286_v62 = vld [vmem:[%s1227_s3 + $0x1f8] sm:$0xff] }
  0x3a   :  { %v213_v19 = vadd.f32 %v521_v2, %v142_v7  ;;  %v214_v20 = vadd.f32 %v521_v2, %v143_v8  ;;  %463 = vst [vmem:[%s1228_s4 + $0x180] sm:$0xff] %v399_v10  ;;  %v401_v23 = vmax.f32 %v337_v11, 0.0  ;;  %v144_v26 = vmul.f32 %v516_v1, %v73_v9 }
  0x3b   :  { %v402_v24 = vmax.f32 %v338_v12, 0.0  ;;  %v340_v25 = vadd.f32 %v276_v6, %v212_v13  ;;  %464 = vst [vmem:[%s1228_s4 + $0x188] sm:$0xff] %v400_v17  ;;  %v403_v28 = vmax.f32 %v339_v18, 0.0  ;;  %v145_v32 = vmul.f32 %v516_v1, %v74_v16 }
  0x3c   :  { %v341_v29 = vadd.f32 %v277_v14, %v213_v19  ;;  %v342_v30 = vadd.f32 %v278_v15, %v214_v20  ;;  %465 = vst [vmem:[%s1228_s4 + $0x190] sm:$0xff] %v401_v23  ;;  %v215_v35 = vadd.f32 %v521_v2, %v144_v26  ;;  %v146_v37 = vmul.f32 %v516_v1, %v75_v21 }
  0x3d   :  { %466 = vst [vmem:[%s1228_s4 + $0x198] sm:$0xff] %v402_v24  ;;  %v404_v34 = vmax.f32 %v340_v25, 0.0  ;;  %v147_v38 = vmul.f32 %v516_v1, %v76_v22  ;;  %467 = vst [vmem:[%s1228_s4 + $0x1a0] sm:$0xff] %v403_v28  ;;  %v216_v43 = vadd.f32 %v521_v2, %v145_v32  ;;  %v148_v46 = vmul.f32 %v516_v1, %v77_v27 }
  0x3e   :  { %v405_v41 = vmax.f32 %v341_v29, 0.0  ;;  %v406_v42 = vmax.f32 %v342_v30, 0.0  ;;  %v343_v47 = vadd.f32 %v279_v31, %v215_v35  ;;  %v217_v48 = vadd.f32 %v521_v2, %v146_v37 }
  0x3f   :  { %468 = vst [vmem:[%s1228_s4 + $0x1a8] sm:$0xff] %v404_v34  ;;  %v218_v49 = vadd.f32 %v521_v2, %v147_v38  ;;  %v149_v51 = vmul.f32 %v516_v1, %v78_v33  ;;  %v344_v52 = vadd.f32 %v280_v36, %v216_v43  ;;  %v219_v53 = vadd.f32 %v521_v2, %v148_v46 }
  0x40   :  { %469 = vst [vmem:[%s1228_s4 + $0x1b0] sm:$0xff] %v405_v41  ;;  %470 = vst [vmem:[%s1228_s4 + $0x1b8] sm:$0xff] %v406_v42  ;;  %v150_v55 = vmul.f32 %v516_v1, %v79_v39  ;;  %v151_v56 = vmul.f32 %v516_v1, %v80_v40  ;;  %v407_v57 = vmax.f32 %v343_v47, 0.0  ;;  %v345_v58 = vadd.f32 %v281_v44, %v217_v48 }
  0x41   :  { %v346_v59 = vadd.f32 %v282_v45, %v218_v49  ;;  %v220_v60 = vadd.f32 %v521_v2, %v149_v51  ;;  %v408_v63 = vmax.f32 %v344_v52, 0.0  ;;  %v347_v0 = vadd.f32 %v283_v50, %v219_v53 }
  0x42   :  { %v221_v3 = vadd.f32 %v521_v2, %v150_v55  ;;  %v222_v4 = vadd.f32 %v521_v2, %v151_v56  ;;  %471 = vst [vmem:[%s1228_s4 + $0x1c0] sm:$0xff] %v407_v57  ;;  %v409_v1 = vmax.f32 %v345_v58, 0.0 }
  0x43   :  { %v410_v5 = vmax.f32 %v346_v59, 0.0  ;;  %v348_v6 = vadd.f32 %v284_v54, %v220_v60  ;;  %472 = vst [vmem:[%s1228_s4 + $0x1c8] sm:$0xff] %v408_v63  ;;  %v411_v7 = vmax.f32 %v347_v0, 0.0 }
  0x44   :  { %v349_v8 = vadd.f32 %v285_v61, %v221_v3  ;;  %v350_v9 = vadd.f32 %v286_v62, %v222_v4  ;;  %473 = vst [vmem:[%s1228_s4 + $0x1d0] sm:$0xff] %v409_v1 }
  0x45   :  { %474 = vst [vmem:[%s1228_s4 + $0x1d8] sm:$0xff] %v410_v5  ;;  %v412_v2 = vmax.f32 %v348_v6, 0.0  ;;  %475 = vst [vmem:[%s1228_s4 + $0x1e0] sm:$0xff] %v411_v7 }
  0x46   :  { %v413_v10 = vmax.f32 %v349_v8, 0.0  ;;  %v414_v11 = vmax.f32 %v350_v9, 0.0 }
  0x47   :  { %476 = vst [vmem:[%s1228_s4 + $0x1e8] sm:$0xff] %v412_v2 }
  0x48   :  { %477 = vst [vmem:[%s1228_s4 + $0x1f0] sm:$0xff] %v413_v10  ;;  %478 = vst [vmem:[%s1228_s4 + $0x1f8] sm:$0xff] %v414_v11 }

// kernel: basic_block_forward.3
= control target key start
LH: loop header
LB: loop body
LE: loop exit
PB: predicated region body
PF: predicated region fallthrough
CT: control target
= control target key end

     0   :  { %s5062_s15 = smov 0   ;;  %s6312_s0 = inlined_call_operand.vmem [shape: f32[2,16,16,128], index: 0, kind: input, shape index: {}]   ;;  %s6313_s1 = inlined_call_operand.vmem [shape: f32[1152,128], index: 1, kind: input, shape index: {}]   ;;  %s6314_s2 = inlined_call_operand.vmem [shape: f32[2,16,16,128], index: 2, kind: output, shape index: {0}]   ;;  %s6315_s3 = inlined_call_operand.vmem [shape: f32[2,1,128], index: 3, kind: output, shape index: {1}]   ;;  %s6316_s4 = inlined_call_operand.vmem [shape: f32[2,1,128], index: 4, kind: output, shape index: {2}]  }
   0x1 LB: > { %s3285_s16 = sadd.s32 4294967295, %s5034_s15   ;;  %p3289_p0 = scmp.ge.s32.totalorder %s5034_s15, 1  ;;  %s5034_s15 = sphi %s5062_s15, %s15_s15  }
   0x2   : > { %p167_p1 = scmp.lt.s32.totalorder %s5034_s15, 3 }
   0x4   : > { %p168_p2 = pnand %p3289_p0, %p167_p1 }
   0x6   : > { %171 = sbr.rel (%p168_p2) target bundleno = 651 (0x28b), region = 28 }
   0xd   : > { %v405_v0 = vld [vmem:[%s6313_s1 + $0x80] sm:$0xff]  ;;  %v406_v1 = vld [vmem:[%s6313_s1 + $0x88] sm:$0xff]  ;;  %p5081_p3 = scmp.lt.s32.totalorder %s3285_s16, 1  ;;  %v407_v5 = vld [vmem:[%s6313_s1 + $0x90] sm:$0xff]  ;;  %v5036_v7 = vmov 0.0  }
   0xe   : > { %v1513_v2 = vld [vmem:[%s6313_s1 + $0x200] sm:$0xff]  ;;  %v4450_v3 = vpack.c.bf16 %v406_v1, %v405_v0  ;;  %v1514_v4 = vld [vmem:[%s6313_s1 + $0x208] sm:$0xff]  ;;  %v408_v6 = vld [vmem:[%s6313_s1 + $0x98] sm:$0xff]  ;;  %247 = vst [vmem:[#allocation2] sm:$0xff] %v5036_v7 }
   0xf   : > { %248 = vst [vmem:[#allocation2 + $0x8] sm:$0xff] %v5036_v7  ;;  %249 = vst [vmem:[#allocation2 + $0x10] sm:$0xff] %v5036_v7  ;;  %v5132_v8 = vpack.c.bf16 %v1514_v4, %v1513_v2  ;;  %v4454_v9 = vpack.c.bf16 %v408_v6, %v407_v5  ;;  %v1515_v10 = vld [vmem:[%s6313_s1 + $0x210] sm:$0xff]  ;;  %v1516_v11 = vld [vmem:[%s6313_s1 + $0x218] sm:$0xff]  ;;  %s6372_s16 = smov (!%p5081_p3, %s3285_s16), 1 }
  0x10   : > { %252 = vst [vmem:[#allocation2 + $0x220] sm:$0xff] %v5036_v7  ;;  %253 = vst [vmem:[#allocation2 + $0x228] sm:$0xff] %v5036_v7  ;;  %v409_v12 = vld [vmem:[%s6313_s1 + $0xa0] sm:$0xff]  ;;  %4451 = vmatprep.subr.bf16.mxu1 %v4450_v3  ;;  %v5153_v13 = vpack.c.bf16 %v1516_v11, %v1515_v10  ;;  %v410_v14 = vld [vmem:[%s6313_s1 + $0xa8] sm:$0xff]  ;;  %s3296_s18 = sshll.u32 %s6372_s16, 8  ;;  %s211_s14 = scalar_lea.vmem %s6315_s3, %s6372_s16 }
  0x11   : > { %254 = vst [vmem:[#allocation2 + $0x230] sm:$0xff] %v5036_v7  ;;  %257 = vst [vmem:[#allocation2 + $0x20] sm:$0x1] %v5036_v7  ;;  %v1517_v15 = vld [vmem:[%s6313_s1 + $0x220] sm:$0xff]  ;;  %v1518_v16 = vld [vmem:[%s6313_s1 + $0x228] sm:$0xff]  ;;  %4579 = vmatprep.subr.bf16.mxu0 %v5132_v8  ;;  %4453 = vmatpush3.bf16.msra.mxu1 %v4450_v3  ;;  %v4458_v17 = vpack.c.bf16 %v410_v14, %v409_v12  ;;  %s5187_s29 = scalar_lea.vmem %s6312_s0, %s3296_s18  ;;  %s6110_s12 = scalar_lea.vmem %s6314_s2, %s3296_s18 }
  0x12   : > { %258 = vst [vmem:[#allocation2 + $0x40] sm:$0x1] %v5036_v7  ;;  %259 = vst [vmem:[#allocation2 + $0x60] sm:$0x1] %v5036_v7  ;;  %4581 = vmatpush3.bf16.msra.mxu0 %v5132_v8  ;;  %4455 = vmatprep.subr.bf16.mxu1 %v4454_v9  ;;  %v5168_v18 = vpack.c.bf16 %v1518_v16, %v1517_v15  ;;  %v411_v19 = vld [vmem:[%s6313_s1 + $0xb0] sm:$0xff]  ;;  %v412_v20 = vld [vmem:[%s6313_s1 + $0xb8] sm:$0xff]  ;;  %s214_s20 = scalar_lea.vmem %s6316_s4, %s6372_s16 }
  0x13   : > { %260 = vst [vmem:[#allocation2 + $0x80] sm:$0x1] %v5036_v7  ;;  %261 = vst [vmem:[#allocation2 + $0xa0] sm:$0x1] %v5036_v7  ;;  %4583 = vmatprep.subr.bf16.mxu0 %v5153_v13  ;;  %v1519_v21 = vld [vmem:[%s6313_s1 + $0x230] sm:$0xff]  ;;  %v1520_v22 = vld [vmem:[%s6313_s1 + $0x238] sm:$0xff]  ;;  %v4462_v23 = vpack.c.bf16 %v412_v20, %v411_v19 }
  0x14   : > { %262 = vst [vmem:[#allocation2 + $0xc0] sm:$0x1] %v5036_v7  ;;  %263 = vst [vmem:[#allocation2 + $0xe0] sm:$0x1] %v5036_v7  ;;  %v5191_v24 = vpack.c.bf16 %v1520_v22, %v1519_v21  ;;  %v413_v25 = vld [vmem:[%s6313_s1 + $0xc0] sm:$0xff]  ;;  %v414_v26 = vld [vmem:[%s6313_s1 + $0xc8] sm:$0xff] }
  0x15   : > { %264 = vst [vmem:[#allocation2 + $0x100] sm:$0x1] %v5036_v7  ;;  %265 = vst [vmem:[#allocation2 + $0x120] sm:$0x1] %v5036_v7  ;;  %4457 = vmatpush3.bf16.msra.mxu1 %v4454_v9  ;;  %v1521_v28 = vld [vmem:[%s6313_s1 + $0x240] sm:$0xff]  ;;  %v1522_v29 = vld [vmem:[%s6313_s1 + $0x248] sm:$0xff]  ;;  %v4466_v32 = vpack.c.bf16 %v414_v26, %v413_v25 }
  0x16   : > { %266 = vst [vmem:[#allocation2 + $0x140] sm:$0x1] %v5036_v7  ;;  %267 = vst [vmem:[#allocation2 + $0x160] sm:$0x1] %v5036_v7  ;;  %4585 = vmatpush3.bf16.msra.mxu0 %v5153_v13  ;;  %4459 = vmatprep.subr.bf16.mxu1 %v4458_v17  ;;  %v373_v27 = vld [vmem:[#allocation2 + $0x1] sm:$0xff]  ;;  %v5216_v33 = vld [vmem:[%s5187_s29 + $0x10] sm:$0xff]  ;;  %v5222_v35 = vpack.c.bf16 %v1522_v29, %v1521_v28 }
  0x17   : > { %268 = vst [vmem:[#allocation2 + $0x180] sm:$0x1] %v5036_v7  ;;  %269 = vst [vmem:[#allocation2 + $0x1a0] sm:$0x1] %v5036_v7  ;;  %4587 = vmatprep.subr.bf16.mxu0 %v5168_v18  ;;  %3762 = vmatprep.mubr.f32.mxu1 %v373_v27  ;;  %v5206_v30 = vld [vmem:[%s5187_s29] sm:$0xff]  ;;  %v5211_v31 = vld [vmem:[%s5187_s29 + $0x8] sm:$0xff] }
  0x18   : > { %270 = vst [vmem:[#allocation2 + $0x1c0] sm:$0x1] %v5036_v7  ;;  %271 = vst [vmem:[#allocation2 + $0x1e0] sm:$0x1] %v5036_v7  ;;  %4082 = vmatprep.mubr.f32.mxu0 %v5206_v30  ;;  %v5219_v34 = vld [vmem:[%s5187_s29 + $0x18] sm:$0xff]  ;;  %v415_v36 = vld [vmem:[%s6313_s1 + $0xd0] sm:$0xff] }
  0x19   : > { %272 = vst [vmem:[#allocation2 + $0x200] sm:$0x1] %v5036_v7  ;;  %275 = vst [vmem:[#allocation2 + $0x31] sm:$0x1] %v5036_v7  ;;  %4461 = vmatpush3.bf16.msra.mxu1 %v4458_v17  ;;  %v416_v37 = vld [vmem:[%s6313_s1 + $0xd8] sm:$0xff]  ;;  %v5233_v38 = vld [vmem:[%s5187_s29 + $0x20] sm:$0xff] }
  0x1a   : > { %276 = vst [vmem:[#allocation2 + $0x51] sm:$0x1] %v5036_v7  ;;  %277 = vst [vmem:[#allocation2 + $0x71] sm:$0x1] %v5036_v7  ;;  %4589 = vmatpush3.bf16.msra.mxu0 %v5168_v18  ;;  %4463 = vmatprep.subr.bf16.mxu1 %v4462_v23  ;;  %v1523_v39 = vld [vmem:[%s6313_s1 + $0x250] sm:$0xff]  ;;  %v1524_v40 = vld [vmem:[%s6313_s1 + $0x258] sm:$0xff]  ;;  %v4470_v43 = vpack.c.bf16 %v416_v37, %v415_v36 }
  0x1b   : > { %278 = vst [vmem:[#allocation2 + $0x91] sm:$0x1] %v5036_v7  ;;  %279 = vst [vmem:[#allocation2 + $0xb1] sm:$0x1] %v5036_v7  ;;  %4591 = vmatprep.subr.bf16.mxu0 %v5191_v24  ;;  %v5243_v41 = vld [vmem:[%s5187_s29 + $0x28] sm:$0xff]  ;;  %v5247_v42 = vld [vmem:[%s5187_s29 + $0x30] sm:$0xff]  ;;  %v5255_v45 = vpack.c.bf16 %v1524_v40, %v1523_v39 }
  0x1c   : > { %280 = vst [vmem:[#allocation2 + $0xd1] sm:$0x1] %v5036_v7  ;;  %281 = vst [vmem:[#allocation2 + $0xf1] sm:$0x1] %v5036_v7  ;;  %v5252_v44 = vld [vmem:[%s5187_s29 + $0x38] sm:$0xff]  ;;  %v417_v46 = vld [vmem:[%s6313_s1 + $0xe0] sm:$0xff] }
  0x1d   : > { %282 = vst [vmem:[#allocation2 + $0x111] sm:$0x1] %v5036_v7  ;;  %283 = vst [vmem:[#allocation2 + $0x131] sm:$0x1] %v5036_v7  ;;  %4465 = vmatpush3.bf16.msra.mxu1 %v4462_v23  ;;  %v418_v47 = vld [vmem:[%s6313_s1 + $0xe8] sm:$0xff]  ;;  %v5265_v48 = vld [vmem:[%s5187_s29 + $0x40] sm:$0xff] }
  0x1e   : > { %284 = vst [vmem:[#allocation2 + $0x151] sm:$0x1] %v5036_v7  ;;  %285 = vst [vmem:[#allocation2 + $0x171] sm:$0x1] %v5036_v7  ;;  %4593 = vmatpush3.bf16.msra.mxu0 %v5191_v24  ;;  %4467 = vmatprep.subr.bf16.mxu1 %v4466_v32  ;;  %v1525_v49 = vld [vmem:[%s6313_s1 + $0x260] sm:$0xff]  ;;  %v1526_v50 = vld [vmem:[%s6313_s1 + $0x268] sm:$0xff]  ;;  %v4474_v54 = vpack.c.bf16 %v418_v47, %v417_v46 }
  0x1f   : > { %286 = vst [vmem:[#allocation2 + $0x191] sm:$0x1] %v5036_v7  ;;  %287 = vst [vmem:[#allocation2 + $0x1b1] sm:$0x1] %v5036_v7  ;;  %4595 = vmatprep.subr.bf16.mxu0 %v5222_v35  ;;  %v5275_v51 = vld [vmem:[%s5187_s29 + $0x48] sm:$0xff]  ;;  %v5279_v52 = vld [vmem:[%s5187_s29 + $0x50] sm:$0xff]  ;;  %v5294_v57 = vpack.c.bf16 %v1526_v50, %v1525_v49 }
  0x20   : > { %288 = vst [vmem:[#allocation2 + $0x1d1] sm:$0x1] %v5036_v7  ;;  %289 = vst [vmem:[#allocation2 + $0x1f1] sm:$0x1] %v5036_v7  ;;  %v5282_v53 = vld [vmem:[%s5187_s29 + $0x58] sm:$0xff]  ;;  %v419_v55 = vld [vmem:[%s6313_s1 + $0xf0] sm:$0xff] }
  0x21   : > { %290 = vst [vmem:[#allocation2 + $0x211] sm:$0x1] %v5036_v7  ;;  %256 = vst [vmem:[#allocation2] sm:$0x1] %v5036_v7  ;;  %4469 = vmatpush3.bf16.msra.mxu1 %v4466_v32  ;;  %v5291_v56 = vld [vmem:[%s5187_s29 + $0x60] sm:$0xff]  ;;  %v420_v58 = vld [vmem:[%s6313_s1 + $0xf8] sm:$0xff] }
  0x22   : > { %273 = vst [vmem:[#allocation2 + $0x220] sm:$0x1] %v5036_v7  ;;  %274 = vst [vmem:[#allocation2 + $0x11] sm:$0x1] %v5036_v7  ;;  %4597 = vmatpush3.bf16.msra.mxu0 %v5222_v35  ;;  %4471 = vmatprep.subr.bf16.mxu1 %v4470_v43  ;;  %v1527_v59 = vld [vmem:[%s6313_s1 + $0x270] sm:$0xff]  ;;  %v5304_v60 = vld [vmem:[%s5187_s29 + $0x68] sm:$0xff]  ;;  %v4478_v0 = vpack.c.bf16 %v420_v58, %v419_v55 }
  0x23   : > { %291 = vst [vmem:[#allocation2 + $0x231] sm:$0x1] %v5036_v7  ;;  %6339 = vst [vmem:[#allocation3_spill] sm:$0xff] %v5191_v24  ;;  %4599 = vmatprep.subr.bf16.mxu0 %v5255_v45  ;;  %v1528_v61 = vld [vmem:[%s6313_s1 + $0x278] sm:$0xff]  ;;  %v5311_v62 = vld [vmem:[%s5187_s29 + $0x70] sm:$0xff] }
  0x24   : > { %293 = vst [vmem:[#allocation2 + $0x21] sm:$0xff] %v5206_v30  ;;  %294 = vst [vmem:[#allocation2 + $0x29] sm:$0xff] %v5211_v31  ;;  %v5314_v63 = vld [vmem:[%s5187_s29 + $0x78] sm:$0xff]  ;;  %v5320_v1 = vpack.c.bf16 %v1528_v61, %v1527_v59  ;;  %v357_v2 = vld [vmem:[%s6313_s1] sm:$0xff] }
  0x25   : > { %6340 = vst [vmem:[#allocation4_spill] sm:$0xff] %v5222_v35  ;;  %295 = vst [vmem:[#allocation2 + $0x41] sm:$0xff] %v5216_v33  ;;  %4473 = vmatpush3.bf16.msra.mxu1 %v4470_v43  ;;  %v358_v3 = vld [vmem:[%s6313_s1 + $0x8] sm:$0xff]  ;;  %v5329_v4 = vld [vmem:[%s5187_s29 + $0x80] sm:$0xff] }
  0x26   : > { %296 = vst [vmem:[#allocation2 + $0x49] sm:$0xff] %v5219_v34  ;;  %297 = vst [vmem:[#allocation2 + $0x61] sm:$0xff] %v5233_v38  ;;  %4601 = vmatpush3.bf16.msra.mxu0 %v5255_v45  ;;  %4475 = vmatprep.subr.bf16.mxu1 %v4474_v54  ;;  %v1818_v5 = vld [vmem:[%s6313_s1 + $0x280] sm:$0xff]  ;;  %v1819_v6 = vld [vmem:[%s6313_s1 + $0x288] sm:$0xff]  ;;  %v4482_v12 = vpack.c.bf16 %v358_v3, %v357_v2 }
  0x27   : > { %298 = vst [vmem:[#allocation2 + $0x69] sm:$0xff] %v5243_v41  ;;  %299 = vst [vmem:[#allocation2 + $0x81] sm:$0xff] %v5247_v42  ;;  %4603 = vmatprep.subr.bf16.mxu0 %v5294_v57  ;;  %v5339_v9 = vld [vmem:[%s5187_s29 + $0x88] sm:$0xff]  ;;  %v5343_v10 = vld [vmem:[%s5187_s29 + $0x90] sm:$0xff]  ;;  %v4610_v15 = vpack.c.bf16 %v1819_v6, %v1818_v5 }
  0x28   : > { %6341 = vst [vmem:[#allocation5_spill] sm:$0xff] %v5255_v45  ;;  %300 = vst [vmem:[#allocation2 + $0x89] sm:$0xff] %v5252_v44  ;;  %v5346_v11 = vld [vmem:[%s5187_s29 + $0x98] sm:$0xff]  ;;  %v374_v14 = vld [vmem:[#allocation2 + $0x9] sm:$0xff] }
  0x29   : > { %301 = vst [vmem:[#allocation2 + $0xa1] sm:$0xff] %v5265_v48  ;;  %302 = vst [vmem:[#allocation2 + $0xa9] sm:$0xff] %v5275_v51  ;;  %4477 = vmatpush3.bf16.msra.mxu1 %v4474_v54  ;;  %v1820_v16 = vld [vmem:[%s6313_s1 + $0x290] sm:$0xff]  ;;  %v5356_v17 = vld [vmem:[%s5187_s29 + $0xa0] sm:$0xff] }
  0x2a   : > { %303 = vst [vmem:[#allocation2 + $0xc1] sm:$0xff] %v5279_v52  ;;  %304 = vst [vmem:[#allocation2 + $0xc9] sm:$0xff] %v5282_v53  ;;  %4605 = vmatpush3.bf16.msra.mxu0 %v5294_v57  ;;  %4479 = vmatprep.subr.bf16.mxu1 %v4478_v0  ;;  %v1821_v19 = vld [vmem:[%s6313_s1 + $0x298] sm:$0xff]  ;;  %v359_v20 = vld [vmem:[%s6313_s1 + $0x10] sm:$0xff] }
  0x2b   : > { %6342 = vst [vmem:[#allocation6_spill] sm:$0xff] %v5294_v57  ;;  %305 = vst [vmem:[#allocation2 + $0xe1] sm:$0xff] %v5291_v56  ;;  %4607 = vmatprep.subr.bf16.mxu0 %v5320_v1  ;;  %v5366_v21 = vld [vmem:[%s5187_s29 + $0xa8] sm:$0xff]  ;;  %v360_v22 = vld [vmem:[%s6313_s1 + $0x18] sm:$0xff]  ;;  %v4614_v26 = vpack.c.bf16 %v1821_v19, %v1820_v16 }
  0x2c   : > { %306 = vst [vmem:[#allocation2 + $0xe9] sm:$0xff] %v5304_v60  ;;  %307 = vst [vmem:[#allocation2 + $0x101] sm:$0xff] %v5311_v62  ;;  %v5373_v23 = vld [vmem:[%s5187_s29 + $0xb0] sm:$0xff]  ;;  %v5376_v25 = vld [vmem:[%s5187_s29 + $0xb8] sm:$0xff]  ;;  %v4486_v29 = vpack.c.bf16 %v360_v22, %v359_v20 }
  0x2d   : > { %308 = vst [vmem:[#allocation2 + $0x109] sm:$0xff] %v5314_v63  ;;  %6343 = vst [vmem:[#allocation7_spill] sm:$0xff] %v5320_v1  ;;  %4481 = vmatpush3.bf16.msra.mxu1 %v4478_v0  ;;  %v1822_v27 = vld [vmem:[%s6313_s1 + $0x2a0] sm:$0xff]  ;;  %v1823_v32 = vld [vmem:[%s6313_s1 + $0x2a8] sm:$0xff] }
  0x2e   : > { %309 = vst [vmem:[#allocation2 + $0x121] sm:$0xff] %v5329_v4  ;;  %310 = vst [vmem:[#allocation2 + $0x129] sm:$0xff] %v5339_v9  ;;  %4609 = vmatpush3.bf16.msra.mxu0 %v5320_v1  ;;  %4483 = vmatprep.subr.bf16.mxu1 %v4482_v12  ;;  %v5385_v28 = vld [vmem:[%s5187_s29 + $0xc0] sm:$0xff]  ;;  %v5395_v37 = vld [vmem:[%s5187_s29 + $0xc8] sm:$0xff]  ;;  %v4618_v46 = vpack.c.bf16 %v1823_v32, %v1822_v27 }
  0x2f   : > { %311 = vst [vmem:[#allocation2 + $0x141] sm:$0xff] %v5343_v10  ;;  %312 = vst [vmem:[#allocation2 + $0x149] sm:$0xff] %v5346_v11  ;;  %4611 = vmatprep.subr.bf16.mxu0 %v4610_v15  ;;  %v361_v36 = vld [vmem:[%s6313_s1 + $0x20] sm:$0xff]  ;;  %v362_v39 = vld [vmem:[%s6313_s1 + $0x28] sm:$0xff] }
  0x30   : > { %313 = vst [vmem:[#allocation2 + $0x161] sm:$0xff] %v5356_v17  ;;  %314 = vst [vmem:[#allocation2 + $0x169] sm:$0xff] %v5366_v21  ;;  %3763 = vmatmul.mubr.f32.vlgmr.msra.gmra.mrb[0].mxu1 %v374_v14  ;;  %v5403_v40 = vld [vmem:[%s5187_s29 + $0xd0] sm:$0xff]  ;;  %v5406_v43 = vld [vmem:[%s5187_s29 + $0xd8] sm:$0xff]  ;;  %v4490_v50 = vpack.c.bf16 %v362_v39, %v361_v36 }
  0x31   : > { %315 = vst [vmem:[#allocation2 + $0x181] sm:$0xff] %v5373_v23  ;;  %316 = vst [vmem:[#allocation2 + $0x189] sm:$0xff] %v5376_v25  ;;  %4083 = vmatmul.mubr.f32.vlgmr.msra.gmra.mrb[0].mxu0 %v5211_v31  ;;  %4485 = vmatpush3.bf16.msra.mxu1 %v4482_v12  ;;  %v5413_v47 = vld [vmem:[%s5187_s29 + $0xe0] sm:$0xff]  ;;  %v1824_v49 = vld [vmem:[%s6313_s1 + $0x2b0] sm:$0xff] }
  0x32   : > { %317 = vst [vmem:[#allocation2 + $0x1a1] sm:$0xff] %v5385_v28  ;;  %318 = vst [vmem:[#allocation2 + $0x1a9] sm:$0xff] %v5395_v37  ;;  %4613 = vmatpush3.bf16.msra.mxu0 %v4610_v15  ;;  %3765 = vmatprep.mubr.f32.mxu1 %v5206_v30  ;;  %v1825_v30 = vld [vmem:[%s6313_s1 + $0x2b8] sm:$0xff]  ;;  %v5424_v54 = vld [vmem:[%s5187_s29 + $0xe8] sm:$0xff] }
  0x33   : > { %319 = vst [vmem:[#allocation2 + $0x1c1] sm:$0xff] %v5403_v40  ;;  %320 = vst [vmem:[#allocation2 + $0x1c9] sm:$0xff] %v5406_v43  ;;  %4085 = vmatprep.mubr.f32.mxu0 %v5216_v33  ;;  %4615 = vmatprep.subr.bf16.mxu0 %v4614_v26  ;;  %v364_v55 = vld [vmem:[%s6313_s1 + $0x38] sm:$0xff]  ;;  %v4622_v58 = vpack.c.bf16 %v1825_v30, %v1824_v49  ;;  %v1827_v59 = vld [vmem:[%s6313_s1 + $0x2c8] sm:$0xff] }
  0x34   : > { %3766 = vmatmul.mubr.f32.gmra.mrb[2].mxu1 %v5211_v31  ;;  %4487 = vmatprep.subr.bf16.mxu1 %v4486_v29  ;;  %321 = vst [vmem:[#allocation2 + $0x1e1] sm:$0xff] %v5413_v47  ;;  %v363_v31 = vld [vmem:[%s6313_s1 + $0x30] sm:$0xff]  ;;  %322 = vst [vmem:[#allocation2 + $0x1e9] sm:$0xff] %v5424_v54  ;;  %v365_v0 = vld [vmem:[%s6313_s1 + $0x40] sm:$0xff] }
  0x35   : > { %4086 = vmatmul.mubr.f32.gmra.mrb[2].mxu0 %v5219_v34  ;;  %3768 = vmatprep.mubr.f32.mxu1 %v5216_v33  ;;  %v1826_v33 = vld [vmem:[%s6313_s1 + $0x2c0] sm:$0xff]  ;;  %v4494_v61 = vpack.c.bf16 %v364_v55, %v363_v31  ;;  %v1829_v3 = vld [vmem:[%s6313_s1 + $0x2d8] sm:$0xff]  ;;  %v367_v6 = vld [vmem:[%s6313_s1 + $0x50] sm:$0xff] }
  0x36   : > { %4617 = vmatpush3.bf16.msra.mxu0 %v4614_v26  ;;  %4088 = vmatprep.mubr.f32.mxu0 %v5233_v38  ;;  %v4626_v2 = vpack.c.bf16 %v1827_v59, %v1826_v33  ;;  %v1831_v14 = vld [vmem:[%s6313_s1 + $0x2e8] sm:$0xff]  ;;  %v369_v16 = vld [vmem:[%s6313_s1 + $0x60] sm:$0xff]  ;;  %v5485_v20 = vld [vmem:[%s5187_s29 + $0xf0] sm:$0xff] }
  0x37   : > { %4619 = vmatprep.subr.bf16.mxu0 %v4618_v46  ;;  %4489 = vmatpush3.bf16.msra.mxu1 %v4486_v29  ;;  %6344 = vst [vmem:[#allocation8_spill] sm:$0xff] %v5485_v20  ;;  %v1833_v22 = vld [vmem:[%s6313_s1 + $0x2f8] sm:$0xff]  ;;  %323 = vst [vmem:[#allocation2 + $0x201] sm:$0xff] %v5485_v20  ;;  %v2125_v36 = vld [vmem:[%s6313_s1 + $0x308] sm:$0xff] }
  0x38   : > { %3769 = vmatmul.mubr.f32.gmra.mrb[4].mxu1 %v5219_v34  ;;  %4491 = vmatprep.subr.bf16.mxu1 %v4490_v50  ;;  %v366_v34 = vld [vmem:[%s6313_s1 + $0x48] sm:$0xff]  ;;  %v5495_v27 = vld [vmem:[%s5187_s29 + $0xf8] sm:$0xff]  ;;  %v2128_v33 = vld [vmem:[%s6313_s1 + $0x320] sm:$0xff] }
  0x39   : > { %4089 = vmatmul.mubr.f32.gmra.mrb[4].mxu0 %v5243_v41  ;;  %3771 = vmatprep.mubr.f32.mxu1 %v5233_v38  ;;  %v1828_v38 = vld [vmem:[%s6313_s1 + $0x2d0] sm:$0xff]  ;;  %v4498_v5 = vpack.c.bf16 %v366_v34, %v365_v0  ;;  %6345 = vst [vmem:[#allocation9_spill] sm:$0xff] %v5495_v27  ;;  %v372_v29 = vld [vmem:[%s6313_s1 + $0x78] sm:$0xff]  ;;  %324 = vst [vmem:[#allocation2 + $0x209] sm:$0xff] %v5495_v27 }
  0x3a   : > { %4621 = vmatpush3.bf16.msra.mxu0 %v4618_v46  ;;  %4091 = vmatprep.mubr.f32.mxu0 %v5247_v42  ;;  %v4630_v12 = vpack.c.bf16 %v1829_v3, %v1828_v38  ;;  %v903_v46 = vld [vmem:[%s6313_s1 + $0x100] sm:$0xff]  ;;  %v5538_v55 = vld [vmem:[#allocation2 + $0x2a] sm:$0xff]  ;;  %v2131_v34 = vld [vmem:[%s6313_s1 + $0x338] sm:$0xff] }
  0x3b   : > { %4623 = vmatprep.subr.bf16.mxu0 %v4622_v58  ;;  %4493 = vmatpush3.bf16.msra.mxu1 %v4490_v50  ;;  %v5524_v49 = vld [vmem:[#allocation2 + $0x22] sm:$0xff]  ;;  %v2127_v50 = vld [vmem:[%s6313_s1 + $0x318] sm:$0xff]  ;;  %v5553_v59 = vld [vmem:[#allocation2 + $0x4a] sm:$0xff] }
  0x3c   : > { %3772 = vmatmul.mubr.f32.gmra.mrb[6].mxu1 %v5243_v41  ;;  %4495 = vmatprep.subr.bf16.mxu1 %v4494_v61  ;;  %v368_v41 = vld [vmem:[%s6313_s1 + $0x58] sm:$0xff]  ;;  %v2130_v0 = vld [vmem:[%s6313_s1 + $0x330] sm:$0xff]  ;;  %v2132_v38 = vld [vmem:[%s6313_s1 + $0x340] sm:$0xff] }
  0x3d   : > { %4092 = vmatmul.mubr.f32.gmra.mrb[6].mxu0 %v5252_v44  ;;  %3774 = vmatprep.mubr.f32.mxu1 %v5247_v42  ;;  %v1830_v42 = vld [vmem:[%s6313_s1 + $0x2e0] sm:$0xff]  ;;  %v4502_v15 = vpack.c.bf16 %v368_v41, %v367_v6  ;;  %v2133_v3 = vld [vmem:[%s6313_s1 + $0x348] sm:$0xff]  ;;  %v2134_v6 = vld [vmem:[%s6313_s1 + $0x350] sm:$0xff] }
  0x3e   : > { %4625 = vmatpush3.bf16.msra.mxu0 %v4622_v58  ;;  %4094 = vmatprep.mubr.f32.mxu0 %v5265_v48  ;;  %v4634_v19 = vpack.c.bf16 %v1831_v14, %v1830_v42  ;;  %v2135_v41 = vld [vmem:[%s6313_s1 + $0x358] sm:$0xff]  ;;  %v2136_v42 = vld [vmem:[%s6313_s1 + $0x360] sm:$0xff]  ;;  %v2137_v14 = vld [vmem:[%s6313_s1 + $0x368] sm:$0xff] }
  0x3f   : > { %4627 = vmatprep.subr.bf16.mxu0 %v4626_v2  ;;  %4497 = vmatpush3.bf16.msra.mxu1 %v4494_v61  ;;  %v2432_v1 = vld [vmem:[%s6313_s1 + $0x398] sm:$0xff]  ;;  %v5804_v27 = vld [vmem:[#allocation2 + $0x128] sm:$0xff]  ;;  %v2437_v20 = vld [vmem:[%s6313_s1 + $0x3c0] sm:$0xff] }
  0x40   : > { %3775 = vmatmul.mubr.f32.gmra.mrb[8].mxu1 %v5252_v44  ;;  %4499 = vmatprep.subr.bf16.mxu1 %v4498_v5  ;;  %v370_v44 = vld [vmem:[%s6313_s1 + $0x68] sm:$0xff]  ;;  %v2436_v57 = vld [vmem:[%s6313_s1 + $0x3b8] sm:$0xff] }
  0x41   : > { %4095 = vmatmul.mubr.f32.gmra.mrb[8].mxu0 %v5275_v51  ;;  %3777 = vmatprep.mubr.f32.mxu1 %v5265_v48  ;;  %v1832_v48 = vld [vmem:[%s6313_s1 + $0x2f0] sm:$0xff]  ;;  %v4506_v26 = vpack.c.bf16 %v370_v44, %v369_v16  ;;  %v2139_v44 = vld [vmem:[%s6313_s1 + $0x378] sm:$0xff]  ;;  %v2438_v45 = vld [vmem:[%s6313_s1 + $0x3c8] sm:$0xff] }
  0x42   : > { %4629 = vmatpush3.bf16.msra.mxu0 %v4626_v2  ;;  %4097 = vmatprep.mubr.f32.mxu0 %v5279_v52  ;;  %v4638_v32 = vpack.c.bf16 %v1833_v22, %v1832_v48  ;;  %v5569_v2 = vld [vmem:[#allocation2 + $0x82] sm:$0xff]  ;;  %v2138_v16 = vld [vmem:[%s6313_s1 + $0x370] sm:$0xff] }
  0x43   : > { %4631 = vmatprep.subr.bf16.mxu0 %v4630_v12  ;;  %4501 = vmatpush3.bf16.msra.mxu1 %v4498_v5  ;;  %v5583_v5 = vld [vmem:[#allocation2 + $0xa2] sm:$0xff]  ;;  %v872_v24 = vld [vmem:[#allocation2 + $0xa] sm:$0xff] }
  0x44   : > { %3778 = vmatmul.mubr.f32.gmra.mrb[10].mxu1 %v5275_v51  ;;  %4503 = vmatprep.subr.bf16.mxu1 %v4502_v15  ;;  %v371_v51 = vld [vmem:[%s6313_s1 + $0x70] sm:$0xff]  ;;  %v2429_v48 = vld [vmem:[%s6313_s1 + $0x380] sm:$0xff]  ;;  %v2430_v22 = vld [vmem:[%s6313_s1 + $0x388] sm:$0xff] }
  0x45   : > { %4098 = vmatmul.mubr.f32.gmra.mrb[10].mxu0 %v5282_v53  ;;  %3780 = vmatprep.mubr.f32.mxu1 %v5279_v52  ;;  %v2124_v52 = vld [vmem:[%s6313_s1 + $0x300] sm:$0xff]  ;;  %v4510_v39 = vpack.c.bf16 %v372_v29, %v371_v51  ;;  %v905_v29 = vld [vmem:[%s6313_s1 + $0x110] sm:$0xff]  ;;  %v5833_v35 = vld [vmem:[#allocation2 + $0x168] sm:$0xff] }
  0x46   : > { %4633 = vmatpush3.bf16.msra.mxu0 %v4630_v12  ;;  %4100 = vmatprep.mubr.f32.mxu0 %v5291_v56  ;;  %v4642_v30 = vpack.c.bf16 %v2125_v36, %v2124_v52  ;;  %v5597_v12 = vld [vmem:[#allocation2 + $0xc2] sm:$0xff] }
  0x47   : > { %4635 = vmatprep.subr.bf16.mxu0 %v4634_v19  ;;  %4505 = vmatpush3.bf16.msra.mxu1 %v4502_v15  ;;  %v5611_v15 = vld [vmem:[#allocation2 + $0xe2] sm:$0xff] }
  0x48   : > { %3781 = vmatmul.mubr.f32.gmra.mrb[12].mxu1 %v5282_v53  ;;  %4507 = vmatprep.subr.bf16.mxu1 %v4506_v26  ;;  %v904_v53 = vld [vmem:[%s6313_s1 + $0x108] sm:$0xff]  ;;  %v5654_v52 = vld [vmem:[#allocation2 + $0x20] sm:$0xff] }
  0x49   : > { %4101 = vmatmul.mubr.f32.gmra.mrb[12].mxu0 %v5304_v60  ;;  %3783 = vmatprep.mubr.f32.mxu1 %v5291_v56  ;;  %v2126_v56 = vld [vmem:[%s6313_s1 + $0x310] sm:$0xff]  ;;  %v5533_v31 = vpack.c.bf16 %v904_v53, %v903_v46  ;;  %v5639_v51 = vld [vmem:[#allocation2 + $0x122] sm:$0xff] }
  0x4a   : > { %4637 = vmatpush3.bf16.msra.mxu0 %v4634_v19  ;;  %4103 = vmatprep.mubr.f32.mxu0 %v5311_v62  ;;  %v4646_v58 = vpack.c.bf16 %v2127_v50, %v2126_v56  ;;  %v5625_v19 = vld [vmem:[#allocation2 + $0x102] sm:$0xff] }
  0x4b   : > { %4639 = vmatprep.subr.bf16.mxu0 %v4638_v32  ;;  %4509 = vmatpush3.bf16.msra.mxu1 %v4506_v26  ;;  %v325_v26 = vld [vmem:[#allocation2] sm:$0xff]  ;;  %v908_v46 = vld [vmem:[%s6313_s1 + $0x128] sm:$0xff] }
  0x4c   : > { %3784 = vmatmul.mubr.f32.gmra.mrb[14].mxu1 %v5304_v60  ;;  %4511 = vmatprep.subr.bf16.mxu1 %v4510_v39  ;;  %v5540_v60 = vld [vmem:[#allocation2 + $0x42] sm:$0xff] }
  0x4d   : > { %4104 = vmatmul.mubr.f32.gmra.mrb[14].mxu0 %v5314_v63  ;;  %3786 = vmatprep.mubr.f32.mxu1 %v5311_v62  ;;  %v2129_v62 = vld [vmem:[%s6313_s1 + $0x328] sm:$0xff] }
  0x4e   : > { %4641 = vmatpush3.bf16.msra.mxu0 %v4638_v32  ;;  %4162 = vmatprep.mubr.f32.mxu0 %v5524_v49  ;;  %v4650_v61 = vpack.c.bf16 %v2129_v62, %v2128_v33  ;;  %v5652_v32 = vld [vmem:[#allocation2 + $0x12a] sm:$0xff]  ;;  %v5656_v36 = vld [vmem:[#allocation2 + $0x142] sm:$0xff] }
  0x4f   : > { %4643 = vmatprep.subr.bf16.mxu0 %v4642_v30  ;;  %4513 = vmatpush3.bf16.msra.mxu1 %v4510_v39  ;;  %v907_v39 = vld [vmem:[%s6313_s1 + $0x120] sm:$0xff]  ;;  %v5668_v53 = vld [vmem:[#allocation2 + $0x28] sm:$0xff] }
  0x50   : > { %3787 = vmatmul.mubr.f32.gmra.mrb[16].mxu1 %v5314_v63  ;;  %4515 = vmatprep.subr.bf16.mxu1 %v5533_v31  ;;  %v5555_v63 = vld [vmem:[#allocation2 + $0x62] sm:$0xff]  ;;  %v4522_v50 = vpack.c.bf16 %v908_v46, %v907_v39  ;;  %v5690_v62 = vld [vmem:[#allocation2 + $0x16a] sm:$0xff] }
  0x51   : > { %4163 = vmatmul.mubr.f32.vlgmr.msra.gmra.mrb[0].mxu0 %v5538_v55  ;;  %3789 = vmatprep.mubr.f32.mxu1 %v5329_v4  ;;  %v5567_v4 = vld [vmem:[#allocation2 + $0x6a] sm:$0xff]  ;;  %v5676_v56 = vld [vmem:[#allocation2 + $0x162] sm:$0xff] }
  0x52   : > { %4645 = vmatpush3.bf16.msra.mxu0 %v4642_v30  ;;  %4165 = vmatprep.mubr.f32.mxu0 %v5540_v60  ;;  %v5672_v30 = vld [vmem:[#allocation2 + $0x14a] sm:$0xff]  ;;  %v5748_v39 = vld [vmem:[#allocation2 + $0x1e2] sm:$0xff] }
  0x53   : > { %4647 = vmatprep.subr.bf16.mxu0 %v4646_v58  ;;  %v5687_v33 = vld [vmem:[#allocation2 + $0x48] sm:$0xff] }
  0x54   : > { %3790 = vmatmul.mubr.f32.gmra.mrb[18].mxu1 %v5339_v9  ;;  %v4654_v9 = vpack.c.bf16 %v2131_v34, %v2130_v0  ;;  %v5694_v0 = vld [vmem:[#allocation2 + $0x182] sm:$0xff] }
  0x55   : > { %4166 = vmatmul.mubr.f32.gmra.mrb[2].mxu0 %v5553_v59  ;;  %3792 = vmatprep.mubr.f32.mxu1 %v5343_v10  ;;  %v5581_v10 = vld [vmem:[#allocation2 + $0x8a] sm:$0xff] }
  0x56   : > { %4168 = vmatprep.mubr.f32.mxu0 %v5555_v63  ;;  %4649 = vmatpush3.bf16.msra.mxu0 %v4646_v58  ;;  %v910_v58 = vld [vmem:[%s6313_s1 + $0x138] sm:$0xff] }
  0x57   : > { %4651 = vmatprep.subr.bf16.mxu0 %v4650_v61 }
  0x58   : > { %3793 = vmatmul.mubr.f32.gmra.mrb[20].mxu1 %v5346_v11  ;;  %v4658_v11 = vpack.c.bf16 %v2133_v3, %v2132_v38  ;;  %v912_v38 = vld [vmem:[%s6313_s1 + $0x148] sm:$0xff] }
  0x59   : > { %4169 = vmatmul.mubr.f32.gmra.mrb[4].mxu0 %v5567_v4  ;;  %3795 = vmatprep.mubr.f32.mxu1 %v5356_v17  ;;  %v5595_v17 = vld [vmem:[#allocation2 + $0xaa] sm:$0xff] }
  0x5a   : > { %4171 = vmatprep.mubr.f32.mxu0 %v5569_v2  ;;  %4653 = vmatpush3.bf16.msra.mxu0 %v4650_v61  ;;  %v5692_v61 = vld [vmem:[#allocation2 + $0x60] sm:$0xff]  ;;  %v5705_v3 = vld [vmem:[#allocation2 + $0x68] sm:$0xff] }
  0x5b   : > { %4655 = vmatprep.subr.bf16.mxu0 %v4654_v9 }
  0x5c   : > { %3796 = vmatmul.mubr.f32.gmra.mrb[22].mxu1 %v5366_v21  ;;  %v4662_v21 = vpack.c.bf16 %v2135_v41, %v2134_v6  ;;  %v5710_v6 = vld [vmem:[#allocation2 + $0x80] sm:$0xff] }
  0x5d   : > { %4172 = vmatmul.mubr.f32.gmra.mrb[6].mxu0 %v5581_v10  ;;  %3798 = vmatprep.mubr.f32.mxu1 %v5373_v23  ;;  %v5609_v23 = vld [vmem:[#allocation2 + $0xca] sm:$0xff]  ;;  %v5712_v41 = vld [vmem:[#allocation2 + $0x1a2] sm:$0xff] }
  0x5e   : > { %4174 = vmatprep.mubr.f32.mxu0 %v5583_v5  ;;  %4657 = vmatpush3.bf16.msra.mxu0 %v4654_v9  ;;  %v911_v9 = vld [vmem:[%s6313_s1 + $0x140] sm:$0xff] }
  0x5f   : > { %4659 = vmatprep.subr.bf16.mxu0 %v4658_v11 }
  0x60   : > { %3799 = vmatmul.mubr.f32.gmra.mrb[24].mxu1 %v5376_v25  ;;  %v4666_v25 = vpack.c.bf16 %v2137_v14, %v2136_v42  ;;  %v913_v42 = vld [vmem:[%s6313_s1 + $0x150] sm:$0xff]  ;;  %v914_v14 = vld [vmem:[%s6313_s1 + $0x158] sm:$0xff] }
  0x61   : > { %4175 = vmatmul.mubr.f32.gmra.mrb[8].mxu0 %v5595_v17  ;;  %3801 = vmatprep.mubr.f32.mxu1 %v5385_v28  ;;  %v5623_v28 = vld [vmem:[#allocation2 + $0xea] sm:$0xff] }
  0x62   : > { %4177 = vmatprep.mubr.f32.mxu0 %v5597_v12  ;;  %4661 = vmatpush3.bf16.msra.mxu0 %v4658_v11  ;;  %v5708_v11 = vld [vmem:[#allocation2 + $0x18a] sm:$0xff] }
  0x63   : > { %4663 = vmatprep.subr.bf16.mxu0 %v4662_v21 }
  0x64   : > { %3802 = vmatmul.mubr.f32.gmra.mrb[26].mxu1 %v5395_v37  ;;  %v4670_v37 = vpack.c.bf16 %v2139_v44, %v2138_v16  ;;  %v5726_v16 = vld [vmem:[#allocation2 + $0x1aa] sm:$0xff]  ;;  %v5728_v44 = vld [vmem:[#allocation2 + $0xa0] sm:$0xff] }
  0x65   : > { %4178 = vmatmul.mubr.f32.gmra.mrb[10].mxu0 %v5609_v23  ;;  %3804 = vmatprep.mubr.f32.mxu1 %v5403_v40  ;;  %v5637_v40 = vld [vmem:[#allocation2 + $0x10a] sm:$0xff]  ;;  %6347 = vst [vmem:[#allocation11_spill] sm:$0xff] %v5728_v44 }
  0x66   : > { %4180 = vmatprep.mubr.f32.mxu0 %v5611_v15  ;;  %4665 = vmatpush3.bf16.msra.mxu0 %v4662_v21  ;;  %v4530_v21 = vpack.c.bf16 %v912_v38, %v911_v9  ;;  %v5764_v9 = vld [vmem:[#allocation2 + $0xe0] sm:$0xff] }
  0x67   : > { %4667 = vmatprep.subr.bf16.mxu0 %v4666_v25  ;;  %6351 = vst [vmem:[#allocation15_spill] sm:$0xff] %v5764_v9  ;;  %v1816_v38 = vld [vmem:[#allocation2 + $0x202] sm:$0xff] }
  0x68   : > { %3805 = vmatmul.mubr.f32.gmra.mrb[28].mxu1 %v5406_v43  ;;  %v5641_v43 = vpack.c.bf16 %v2430_v22, %v2429_v48  ;;  %v4534_v48 = vpack.c.bf16 %v914_v14, %v913_v42  ;;  %v915_v22 = vld [vmem:[%s6313_s1 + $0x160] sm:$0xff]  ;;  %v1209_v14 = vld [vmem:[%s6313_s1 + $0x188] sm:$0xff] }
  0x69   : > { %4181 = vmatmul.mubr.f32.gmra.mrb[12].mxu0 %v5623_v28  ;;  %3807 = vmatprep.mubr.f32.mxu1 %v5413_v47  ;;  %v906_v47 = vld [vmem:[%s6313_s1 + $0x118] sm:$0xff]  ;;  %v1208_v42 = vld [vmem:[%s6313_s1 + $0x180] sm:$0xff] }
  0x6a   : > { %4183 = vmatprep.mubr.f32.mxu0 %v5625_v19  ;;  %4669 = vmatpush3.bf16.msra.mxu0 %v4666_v25  ;;  %v5723_v25 = vld [vmem:[#allocation2 + $0x88] sm:$0xff] }
  0x6b   : > { %4671 = vmatprep.subr.bf16.mxu0 %v4670_v37  ;;  %6346 = vst [vmem:[#allocation10_spill] sm:$0xff] %v5723_v25 }
  0x6c   : > { %3808 = vmatmul.mubr.f32.gmra.mrb[30].mxu1 %v5424_v54  ;;  %v4518_v54 = vpack.c.bf16 %v906_v47, %v905_v29  ;;  %v5741_v29 = vld [vmem:[#allocation2 + $0xa8] sm:$0xff] }
  0x6d   : > { %4184 = vmatmul.mubr.f32.gmra.mrb[14].mxu0 %v5637_v40  ;;  %3842 = vmatprep.mubr.f32.mxu1 %v325_v26  ;;  %v916_v26 = vld [vmem:[%s6313_s1 + $0x168] sm:$0xff]  ;;  %6348 = vst [vmem:[#allocation12_spill] sm:$0xff] %v5741_v29 }
  0x6e   : > { %4186 = vmatprep.mubr.f32.mxu0 %v5639_v51  ;;  %4673 = vmatpush3.bf16.msra.mxu0 %v4670_v37  ;;  %v5730_v37 = vld [vmem:[#allocation2 + $0x1c2] sm:$0xff]  ;;  %v5744_v47 = vld [vmem:[#allocation2 + $0x1ca] sm:$0xff]  ;;  %v4538_v46 = vpack.c.bf16 %v916_v26, %v915_v22 }
  0x6f   : > { %4675 = vmatprep.subr.bf16.mxu0 %v5641_v43  ;;  %v5775_v22 = vld [vmem:[#allocation2 + $0xe8] sm:$0xff]  ;;  %v5777_v26 = vld [vmem:[#allocation2 + $0x100] sm:$0xff] }
  0x70   : > { %3843 = vmatmul.mubr.f32.vlgmr.msra.gmra.mrb[0].mxu1 %v5036_v7  ;;  %v5674_v7 = vld [vmem:[#allocation2 + $0x40] sm:$0xff]  ;;  %6352 = vst [vmem:[#allocation16_spill] sm:$0xff] %v5775_v22  ;;  %6353 = vst [vmem:[#allocation17_spill] sm:$0xff] %v5777_v26 }
  0x71   : > { %4187 = vmatmul.mubr.f32.gmra.mrb[16].mxu0 %v5652_v32  ;;  %4517 = vmatpush3.bf16.msra.mxu1 %v5533_v31  ;;  %v909_v31 = vld [vmem:[%s6313_s1 + $0x130] sm:$0xff] }
  0x72   : > { %3845 = vmatprep.mubr.f32.mxu1 %v5654_v52  ;;  %4189 = vmatprep.mubr.f32.mxu0 %v5656_v36  ;;  %v4526_v34 = vpack.c.bf16 %v910_v58, %v909_v31  ;;  %v918_v31 = vld [vmem:[%s6313_s1 + $0x178] sm:$0xff]  ;;  %v5759_v58 = vld [vmem:[#allocation2 + $0xc8] sm:$0xff] }
  0x73   : > { %4519 = vmatprep.subr.bf16.mxu1 %v4518_v54  ;;  %6350 = vst [vmem:[#allocation14_spill] sm:$0xff] %v5759_v58 }
  0x74   : > { %3846 = vmatmul.mubr.f32.gmra.mrb[2].mxu1 %v5668_v53 }
  0x75   : > { %4190 = vmatmul.mubr.f32.gmra.mrb[18].mxu0 %v5672_v30  ;;  %3848 = vmatprep.mubr.f32.mxu1 %v5674_v7 }
  0x76   : > { %4192 = vmatprep.mubr.f32.mxu0 %v5676_v56  ;;  %4521 = vmatpush3.bf16.msra.mxu1 %v4518_v54  ;;  %v5746_v54 = vld [vmem:[#allocation2 + $0xc0] sm:$0xff] }
  0x77   : > { %4523 = vmatprep.subr.bf16.mxu1 %v4522_v50  ;;  %6349 = vst [vmem:[#allocation13_spill] sm:$0xff] %v5746_v54 }
  0x78   : > { %3849 = vmatmul.mubr.f32.gmra.mrb[4].mxu1 %v5687_v33 }
  0x79   : > { %4193 = vmatmul.mubr.f32.gmra.mrb[20].mxu0 %v5690_v62  ;;  %3851 = vmatprep.mubr.f32.mxu1 %v5692_v61 }
  0x7a   : > { %4195 = vmatprep.mubr.f32.mxu0 %v5694_v0  ;;  %4525 = vmatpush3.bf16.msra.mxu1 %v4522_v50  ;;  %v917_v50 = vld [vmem:[%s6313_s1 + $0x170] sm:$0xff] }
  0x7b   : > { %4527 = vmatprep.subr.bf16.mxu1 %v4526_v34 }
  0x7c   : > { %3852 = vmatmul.mubr.f32.gmra.mrb[6].mxu1 %v5705_v3 }
  0x7d   : > { %4196 = vmatmul.mubr.f32.gmra.mrb[22].mxu0 %v5708_v11  ;;  %3854 = vmatprep.mubr.f32.mxu1 %v5710_v6 }
  0x7e   : > { %4198 = vmatprep.mubr.f32.mxu0 %v5712_v41  ;;  %4529 = vmatpush3.bf16.msra.mxu1 %v4526_v34  ;;  %v5762_v34 = vld [vmem:[#allocation2 + $0x1ea] sm:$0xff] }
  0x7f   : > { %4531 = vmatprep.subr.bf16.mxu1 %v4530_v21 }
  0x80   : > { %3855 = vmatmul.mubr.f32.gmra.mrb[8].mxu1 %v5723_v25 }
  0x81   : > { %4199 = vmatmul.mubr.f32.gmra.mrb[24].mxu0 %v5726_v16  ;;  %3857 = vmatprep.mubr.f32.mxu1 %v5728_v44 }
  0x82   : > { %4201 = vmatprep.mubr.f32.mxu0 %v5730_v37  ;;  %4533 = vmatpush3.bf16.msra.mxu1 %v4530_v21  ;;  %v4542_v21 = vpack.c.bf16 %v918_v31, %v917_v50  ;;  %v5779_v50 = vpack.c.bf16 %v1209_v14, %v1208_v42  ;;  %v2431_v31 = vld [vmem:[%s6313_s1 + $0x390] sm:$0xff]  ;;  %v2433_v14 = vld [vmem:[%s6313_s1 + $0x3a0] sm:$0xff] }
  0x83   : > { %4535 = vmatprep.subr.bf16.mxu1 %v4534_v48  ;;  %v4678_v42 = vpack.c.bf16 %v2432_v1, %v2431_v31  ;;  %v5808_v1 = vld [vmem:[#allocation2 + $0x140] sm:$0xff]  ;;  %v2435_v31 = vld [vmem:[%s6313_s1 + $0x3b0] sm:$0xff] }
  0x84   : > { %3858 = vmatmul.mubr.f32.gmra.mrb[10].mxu1 %v5741_v29 }
  0x85   : > { %4202 = vmatmul.mubr.f32.gmra.mrb[26].mxu0 %v5744_v47  ;;  %3860 = vmatprep.mubr.f32.mxu1 %v5746_v54 }
  0x86   : > { %4204 = vmatprep.mubr.f32.mxu0 %v5748_v39  ;;  %4537 = vmatpush3.bf16.msra.mxu1 %v4534_v48  ;;  %v1817_v48 = vld [vmem:[#allocation2 + $0x20a] sm:$0xff] }
  0x87   : > { %4539 = vmatprep.subr.bf16.mxu1 %v4538_v46 }
  0x88   : > { %3861 = vmatmul.mubr.f32.gmra.mrb[12].mxu1 %v5759_v58 }
  0x89   : > { %4205 = vmatmul.mubr.f32.gmra.mrb[28].mxu0 %v5762_v34  ;;  %3863 = vmatprep.mubr.f32.mxu1 %v5764_v9 }
  0x8a   : > { %4207 = vmatprep.mubr.f32.mxu0 %v1816_v38  ;;  %4541 = vmatpush3.bf16.msra.mxu1 %v4538_v46  ;;  %v5789_v38 = vld [vmem:[#allocation2 + $0x108] sm:$0xff]  ;;  %v5792_v46 = vld [vmem:[#allocation2 + $0x120] sm:$0xff] }
  0x8b   : > { %4543 = vmatprep.subr.bf16.mxu1 %v4542_v21  ;;  %6354 = vst [vmem:[#allocation18_spill] sm:$0xff] %v5789_v38 }
  0x8c   : > { %3864 = vmatmul.mubr.f32.gmra.mrb[14].mxu1 %v5775_v22 }
  0x8d   : > { %4208 = vmatmul.mubr.f32.gmra.mrb[30].mxu0 %v1817_v48  ;;  %3866 = vmatprep.mubr.f32.mxu1 %v5777_v26  ;;  %v2434_v48 = vld [vmem:[%s6313_s1 + $0x3a8] sm:$0xff] }
  0x8e   : > { %4242 = vmatprep.mubr.f32.mxu0 %v5674_v7  ;;  %4545 = vmatpush3.bf16.msra.mxu1 %v4542_v21  ;;  %v4682_v21 = vpack.c.bf16 %v2434_v48, %v2433_v14  ;;  %v5822_v14 = vld [vmem:[#allocation2 + $0x160] sm:$0xff]  ;;  %v4686_v48 = vpack.c.bf16 %v2436_v57, %v2435_v31  ;;  %v4690_v57 = vpack.c.bf16 %v2438_v45, %v2437_v20  ;;  %v2439_v31 = vld [vmem:[%s6313_s1 + $0x3d0] sm:$0xff] }
  0x8f   : > { %4547 = vmatprep.subr.bf16.mxu1 %v5779_v50  ;;  %v2441_v20 = vld [vmem:[%s6313_s1 + $0x3e0] sm:$0xff] }
  0x90   : > { %3867 = vmatmul.mubr.f32.gmra.mrb[16].mxu1 %v5789_v38 }
  0x91   : > { %4243 = vmatmul.mubr.f32.vlgmr.msra.gmra.mrb[0].mxu0 %v5687_v33  ;;  %3869 = vmatprep.mubr.f32.mxu1 %v5792_v46 }
  0x92   : > { %4677 = vmatpush3.bf16.msra.mxu0 %v5641_v43  ;;  %4245 = vmatprep.mubr.f32.mxu0 %v5692_v61  ;;  %v5819_v43 = vld [vmem:[#allocation2 + $0x148] sm:$0xff] }
  0x93   : > { %4679 = vmatprep.subr.bf16.mxu0 %v4678_v42 }
  0x94   : > { %3870 = vmatmul.mubr.f32.gmra.mrb[18].mxu1 %v5804_v27 }
  0x95   : > { %4246 = vmatmul.mubr.f32.gmra.mrb[2].mxu0 %v5705_v3  ;;  %3872 = vmatprep.mubr.f32.mxu1 %v5808_v1 }
  0x96   : > { %4248 = vmatprep.mubr.f32.mxu0 %v5710_v6  ;;  %4681 = vmatpush3.bf16.msra.mxu0 %v4678_v42  ;;  %v5836_v42 = vld [vmem:[#allocation2 + $0x180] sm:$0xff] }
  0x97   : > { %4683 = vmatprep.subr.bf16.mxu0 %v4682_v21 }
  0x98   : > { %3873 = vmatmul.mubr.f32.gmra.mrb[20].mxu1 %v5819_v43 }
  0x99   : > { %4249 = vmatmul.mubr.f32.gmra.mrb[4].mxu0 %v5723_v25  ;;  %3875 = vmatprep.mubr.f32.mxu1 %v5822_v14  ;;  %v2440_v25 = vld [vmem:[%s6313_s1 + $0x3d8] sm:$0xff] }
  0x9a   : > { %4251 = vmatprep.mubr.f32.mxu0 %v5728_v44  ;;  %4685 = vmatpush3.bf16.msra.mxu0 %v4682_v21  ;;  %v5847_v44 = vld [vmem:[#allocation2 + $0x188] sm:$0xff]  ;;  %v5850_v21 = vld [vmem:[#allocation2 + $0x1a0] sm:$0xff]  ;;  %v4694_v45 = vpack.c.bf16 %v2440_v25, %v2439_v31  ;;  %v2443_v31 = vld [vmem:[%s6313_s1 + $0x3f0] sm:$0xff] }
  0x9b   : > { %4687 = vmatprep.subr.bf16.mxu0 %v4686_v48 }
  0x9c   : > { %3876 = vmatmul.mubr.f32.gmra.mrb[22].mxu1 %v5833_v35 }
  0x9d   : > { %4252 = vmatmul.mubr.f32.gmra.mrb[6].mxu0 %v5741_v29  ;;  %3878 = vmatprep.mubr.f32.mxu1 %v5836_v42  ;;  %v2442_v29 = vld [vmem:[%s6313_s1 + $0x3e8] sm:$0xff] }
  0x9e   : > { %4254 = vmatprep.mubr.f32.mxu0 %v5746_v54  ;;  %4689 = vmatpush3.bf16.msra.mxu0 %v4686_v48  ;;  %v5861_v54 = vld [vmem:[#allocation2 + $0x1a8] sm:$0xff]  ;;  %v5864_v48 = vld [vmem:[#allocation2 + $0x1c0] sm:$0xff]  ;;  %v4698_v25 = vpack.c.bf16 %v2442_v29, %v2441_v20 }
  0x9f   : > { %4691 = vmatprep.subr.bf16.mxu0 %v4690_v57  ;;  %v2734_v20 = vld [vmem:[%s6313_s1 + $0x400] sm:$0xff] }
  0xa0   : > { %3879 = vmatmul.mubr.f32.gmra.mrb[24].mxu1 %v5847_v44 }
  0xa1   : > { %4255 = vmatmul.mubr.f32.gmra.mrb[8].mxu0 %v5759_v58  ;;  %3881 = vmatprep.mubr.f32.mxu1 %v5850_v21  ;;  %v2444_v58 = vld [vmem:[%s6313_s1 + $0x3f8] sm:$0xff] }
  0xa2   : > { %4257 = vmatprep.mubr.f32.mxu0 %v5764_v9  ;;  %4693 = vmatpush3.bf16.msra.mxu0 %v4690_v57  ;;  %v5875_v9 = vld [vmem:[#allocation2 + $0x1c8] sm:$0xff]  ;;  %v5878_v57 = vld [vmem:[#allocation2 + $0x1e0] sm:$0xff]  ;;  %v4702_v29 = vpack.c.bf16 %v2444_v58, %v2443_v31  ;;  %v1210_v31 = vld [vmem:[%s6313_s1 + $0x190] sm:$0xff] }
  0xa3   : > { %4695 = vmatprep.subr.bf16.mxu0 %v4694_v45 }
  0xa4   : > { %3882 = vmatmul.mubr.f32.gmra.mrb[26].mxu1 %v5861_v54 }
  0xa5   : > { %4258 = vmatmul.mubr.f32.gmra.mrb[10].mxu0 %v5775_v22  ;;  %3884 = vmatprep.mubr.f32.mxu1 %v5864_v48  ;;  %v2735_v22 = vld [vmem:[%s6313_s1 + $0x408] sm:$0xff] }
  0xa6   : > { %4260 = vmatprep.mubr.f32.mxu0 %v5777_v26  ;;  %4697 = vmatpush3.bf16.msra.mxu0 %v4694_v45  ;;  %v5889_v26 = vld [vmem:[#allocation2 + $0x1e8] sm:$0xff]  ;;  %v5892_v58 = vpack.c.bf16 %v2735_v22, %v2734_v20  ;;  %v1212_v22 = vld [vmem:[%s6313_s1 + $0x1a0] sm:$0xff] }
  0xa7   : > { %4699 = vmatprep.subr.bf16.mxu0 %v4698_v25  ;;  %v871_v45 = vld [vmem:[#allocation2 + $0x2] sm:$0xff] }
  0xa8   : > { %3885 = vmatmul.mubr.f32.gmra.mrb[28].mxu1 %v5875_v9  ;;  %v1213_v20 = vld [vmem:[%s6313_s1 + $0x1a8] sm:$0xff] }
  0xa9   : > { %4261 = vmatmul.mubr.f32.gmra.mrb[12].mxu0 %v5789_v38  ;;  %3887 = vmatprep.mubr.f32.mxu1 %v5878_v57  ;;  %v1211_v38 = vld [vmem:[%s6313_s1 + $0x198] sm:$0xff] }
  0xaa   : > { %4263 = vmatprep.mubr.f32.mxu0 %v5792_v46  ;;  %4701 = vmatpush3.bf16.msra.mxu0 %v4698_v25  ;;  %v4550_v25 = vpack.c.bf16 %v1211_v38, %v1210_v31  ;;  %v4554_v38 = vpack.c.bf16 %v1213_v20, %v1212_v22  ;;  %v1221_v31 = vld [vmem:[%s6313_s1 + $0x1e8] sm:$0xff]  ;;  %v1223_v22 = vld [vmem:[%s6313_s1 + $0x1f8] sm:$0xff]  ;;  %v2122_v20 = vld [vmem:[#allocation2 + $0x220] sm:$0xff] }
  0xab   : > { %4703 = vmatprep.subr.bf16.mxu0 %v4702_v29 }
  0xac   : > { %3888 = vmatmul.mubr.f32.gmra.mrb[30].mxu1 %v5889_v26 }
  0xad   : > { %4264 = vmatmul.mubr.f32.gmra.mrb[14].mxu0 %v5804_v27  ;;  %3922 = vmatprep.mubr.f32.mxu1 %v871_v45  ;;  %v1219_v45 = vld [vmem:[%s6313_s1 + $0x1d8] sm:$0xff] }
  0xae   : > { %4266 = vmatprep.mubr.f32.mxu0 %v5808_v1  ;;  %4705 = vmatpush3.bf16.msra.mxu0 %v4702_v29  ;;  %v1215_v29 = vld [vmem:[%s6313_s1 + $0x1b8] sm:$0xff] }
  0xaf   : > { %4707 = vmatprep.subr.bf16.mxu0 %v5892_v58 }
  0xb0   : > { %3923 = vmatmul.mubr.f32.vlgmr.msra.gmra.mrb[0].mxu1 %v872_v24  ;;  %v1214_v24 = vld [vmem:[%s6313_s1 + $0x1b0] sm:$0xff] }
  0xb1   : > { %4267 = vmatmul.mubr.f32.gmra.mrb[16].mxu0 %v5819_v43  ;;  %4549 = vmatpush3.bf16.msra.mxu1 %v5779_v50  ;;  %v1217_v50 = vld [vmem:[%s6313_s1 + $0x1c8] sm:$0xff] }
  0xb2   : > { %3925 = vmatprep.mubr.f32.mxu1 %v5524_v49  ;;  %4269 = vmatprep.mubr.f32.mxu0 %v5822_v14  ;;  %v4558_v49 = vpack.c.bf16 %v1215_v29, %v1214_v24  ;;  %v2737_v24 = vld [vmem:[%s6313_s1 + $0x418] sm:$0xff]  ;;  %v5019_v29 = vld [vmem:[#allocation2 + $0x8] sm:$0xff] }
  0xb3   : > { %4551 = vmatprep.subr.bf16.mxu1 %v4550_v25 }
  0xb4   : > { %3926 = vmatmul.mubr.f32.gmra.mrb[2].mxu1 %v5538_v55  ;;  %v1216_v55 = vld [vmem:[%s6313_s1 + $0x1c0] sm:$0xff] }
  0xb5   : > { %4270 = vmatmul.mubr.f32.gmra.mrb[18].mxu0 %v5833_v35  ;;  %3928 = vmatprep.mubr.f32.mxu1 %v5540_v60  ;;  %v4562_v60 = vpack.c.bf16 %v1217_v50, %v1216_v55  ;;  %v2739_v55 = vld [vmem:[%s6313_s1 + $0x428] sm:$0xff] }
  0xb6   : > { %4272 = vmatprep.mubr.f32.mxu0 %v5836_v42  ;;  %4553 = vmatpush3.bf16.msra.mxu1 %v4550_v25  ;;  %v2401_v50 = vld [vmem:[#allocation2 + $0x81] sm:$0xff] }
  0xb7   : > { %4555 = vmatprep.subr.bf16.mxu1 %v4554_v38 }
  0xb8   : > { %3929 = vmatmul.mubr.f32.gmra.mrb[4].mxu1 %v5553_v59  ;;  %v1218_v59 = vld [vmem:[%s6313_s1 + $0x1d0] sm:$0xff] }
  0xb9   : > { %4273 = vmatmul.mubr.f32.gmra.mrb[20].mxu0 %v5847_v44  ;;  %3931 = vmatprep.mubr.f32.mxu1 %v5555_v63  ;;  %v4566_v63 = vpack.c.bf16 %v1219_v45, %v1218_v59  ;;  %v2741_v59 = vld [vmem:[%s6313_s1 + $0x438] sm:$0xff] }
  0xba   : > { %4275 = vmatprep.mubr.f32.mxu0 %v5850_v21  ;;  %4557 = vmatpush3.bf16.msra.mxu1 %v4554_v38  ;;  %v2397_v38 = vld [vmem:[#allocation2 + $0x41] sm:$0xff] }
  0xbb   : > { %4559 = vmatprep.subr.bf16.mxu1 %v4558_v49 }
  0xbc   : > { %3932 = vmatmul.mubr.f32.gmra.mrb[6].mxu1 %v5567_v4  ;;  %v1220_v4 = vld [vmem:[%s6313_s1 + $0x1e0] sm:$0xff] }
  0xbd   : > { %4276 = vmatmul.mubr.f32.gmra.mrb[22].mxu0 %v5861_v54  ;;  %3934 = vmatprep.mubr.f32.mxu1 %v5569_v2  ;;  %v5954_v2 = vld [vmem:[#allocation2 + $0x200] sm:$0xff]  ;;  %v4570_v25 = vpack.c.bf16 %v1221_v31, %v1220_v4 }
  0xbe   : > { %4278 = vmatprep.mubr.f32.mxu0 %v5864_v48  ;;  %4561 = vmatpush3.bf16.msra.mxu1 %v4558_v49  ;;  %v2405_v4 = vld [vmem:[#allocation2 + $0xc1] sm:$0xff] }
  0xbf   : > { %4563 = vmatprep.subr.bf16.mxu1 %v4562_v60 }
  0xc0   : > { %3935 = vmatmul.mubr.f32.gmra.mrb[8].mxu1 %v5581_v10  ;;  %v1222_v10 = vld [vmem:[%s6313_s1 + $0x1f0] sm:$0xff] }
  0xc1   : > { %4279 = vmatmul.mubr.f32.gmra.mrb[24].mxu0 %v5875_v9  ;;  %3937 = vmatprep.mubr.f32.mxu1 %v5583_v5  ;;  %v5966_v5 = vld [vmem:[#allocation2 + $0x208] sm:$0xff] }
  0xc2   : > { %4281 = vmatprep.mubr.f32.mxu0 %v5878_v57  ;;  %4565 = vmatpush3.bf16.msra.mxu1 %v4562_v60 }
  0xc3   : > { %4567 = vmatprep.subr.bf16.mxu1 %v4566_v63 }
  0xc4   : > { %3938 = vmatmul.mubr.f32.gmra.mrb[10].mxu1 %v5595_v17  ;;  %v4574_v17 = vpack.c.bf16 %v1223_v22, %v1222_v10  ;;  %v2407_v10 = vld [vmem:[#allocation2 + $0xe1] sm:$0xff] }
  0xc5   : > { %4282 = vmatmul.mubr.f32.gmra.mrb[26].mxu0 %v5889_v26  ;;  %3940 = vmatprep.mubr.f32.mxu1 %v5597_v12  ;;  %v2736_v12 = vld [vmem:[%s6313_s1 + $0x410] sm:$0xff] }
  0xc6   : > { %4284 = vmatprep.mubr.f32.mxu0 %v5954_v2  ;;  %4569 = vmatpush3.bf16.msra.mxu1 %v4566_v63  ;;  %v4710_v49 = vpack.c.bf16 %v2737_v24, %v2736_v12  ;;  %v2743_v63 = vld [vmem:[%s6313_s1 + $0x448] sm:$0xff]  ;;  %v2749_v12 = vld [vmem:[%s6313_s1 + $0x478] sm:$0xff] }
  0xc7   : > { %4571 = vmatprep.subr.bf16.mxu1 %v4570_v25  ;;  %v6029_v24 = vld [vmem:[#allocation2 + $0x121] sm:$0xff] }
  0xc8   : > { %3941 = vmatmul.mubr.f32.gmra.mrb[12].mxu1 %v5609_v23  ;;  %v2398_v23 = vld [vmem:[#allocation2 + $0x49] sm:$0xff] }
  0xc9   : > { %4285 = vmatmul.mubr.f32.gmra.mrb[28].mxu0 %v5966_v5  ;;  %3943 = vmatprep.mubr.f32.mxu1 %v5611_v15  ;;  %v2399_v15 = vld [vmem:[#allocation2 + $0x61] sm:$0xff] }
  0xca   : > { %4287 = vmatprep.mubr.f32.mxu0 %v2122_v20  ;;  %4573 = vmatpush3.bf16.msra.mxu1 %v4570_v25  ;;  %v2745_v25 = vld [vmem:[%s6313_s1 + $0x458] sm:$0xff]  ;;  %v2747_v20 = vld [vmem:[%s6313_s1 + $0x468] sm:$0xff] }
  0xcb   : > { %4575 = vmatprep.subr.bf16.mxu1 %v4574_v17 }
  0xcc   : > { %3944 = vmatmul.mubr.f32.gmra.mrb[14].mxu1 %v5623_v28  ;;  %v2738_v28 = vld [vmem:[%s6313_s1 + $0x420] sm:$0xff] }
  0xcd   : > { %4288 = vmatmul.mubr.f32.gmra.mrb[30].mxu0 %v5019_v29  ;;  %3946 = vmatprep.mubr.f32.mxu1 %v5625_v19  ;;  %v2400_v19 = vld [vmem:[#allocation2 + $0x69] sm:$0xff]  ;;  %v4714_v60 = vpack.c.bf16 %v2739_v55, %v2738_v28  ;;  %v6362_v55 = vld [vmem:[#allocation14_spill] sm:$0xff] }
  0xce   : > { %4322 = vmatprep.mubr.f32.mxu0 %v2397_v38  ;;  %4577 = vmatpush3.bf16.msra.mxu1 %v4574_v17  ;;  %v2409_v17 = vld [vmem:[#allocation2 + $0x101] sm:$0xff]  ;;  %v6361_v28 = vld [vmem:[#allocation5_spill] sm:$0xff] }
  0xcf   : > { %4738 = vmatprep.subr.bf16.mxu1 %v5132_v8 }
  0xd0   : > { %3947 = vmatmul.mubr.f32.gmra.mrb[16].mxu1 %v5637_v40  ;;  %v2740_v40 = vld [vmem:[%s6313_s1 + $0x430] sm:$0xff] }
  0xd1   : > { %4323 = vmatmul.mubr.f32.vlgmr.msra.gmra.mrb[0].mxu0 %v2398_v23  ;;  %3949 = vmatprep.mubr.f32.mxu1 %v5639_v51  ;;  %v2402_v51 = vld [vmem:[#allocation2 + $0x89] sm:$0xff]  ;;  %v4718_v45 = vpack.c.bf16 %v2741_v59, %v2740_v40  ;;  %v6036_v23 = vld [vmem:[#allocation2 + $0x141] sm:$0xff]  ;;  %v6365_v59 = vld [vmem:[#allocation6_spill] sm:$0xff] }
  0xd2   : > { %4709 = vmatpush3.bf16.msra.mxu0 %v5892_v58  ;;  %4325 = vmatprep.mubr.f32.mxu0 %v2399_v15  ;;  %v2403_v58 = vld [vmem:[#allocation2 + $0xa1] sm:$0xff] }
  0xd3   : > { %4711 = vmatprep.subr.bf16.mxu0 %v4710_v49  ;;  %v6359_v15 = vld [vmem:[#allocation12_spill] sm:$0xff] }
  0xd4   : > { %3950 = vmatmul.mubr.f32.gmra.mrb[18].mxu1 %v5652_v32  ;;  %v2742_v32 = vld [vmem:[%s6313_s1 + $0x440] sm:$0xff] }
  0xd5   : > { %4326 = vmatmul.mubr.f32.gmra.mrb[2].mxu0 %v2400_v19  ;;  %3952 = vmatprep.mubr.f32.mxu1 %v5656_v36  ;;  %v2404_v36 = vld [vmem:[#allocation2 + $0xa9] sm:$0xff]  ;;  %v4722_v31 = vpack.c.bf16 %v2743_v63, %v2742_v32  ;;  %v2427_v40 = vld [vmem:[#allocation2 + $0x221] sm:$0xff] }
  0xd6   : > { %4328 = vmatprep.mubr.f32.mxu0 %v2401_v50  ;;  %4713 = vmatpush3.bf16.msra.mxu0 %v4710_v49  ;;  %v6360_v49 = vld [vmem:[#allocation13_spill] sm:$0xff]  ;;  %v6363_v50 = vld [vmem:[#allocation15_spill] sm:$0xff] }
  0xd7   : > { %4715 = vmatprep.subr.bf16.mxu0 %v4714_v60  ;;  %v5027_v19 = vld [vmem:[#allocation2 + $0x1e9] sm:$0xff] }
  0xd8   : > { %3953 = vmatmul.mubr.f32.gmra.mrb[20].mxu1 %v5672_v30  ;;  %v2744_v30 = vld [vmem:[%s6313_s1 + $0x450] sm:$0xff]  ;;  %v2702_v63 = vld [vmem:[#allocation2 + $0x42] sm:$0xff] }
  0xd9   : > { %4329 = vmatmul.mubr.f32.gmra.mrb[4].mxu0 %v2402_v51  ;;  %3955 = vmatprep.mubr.f32.mxu1 %v5676_v56  ;;  %v2406_v56 = vld [vmem:[#allocation2 + $0xc9] sm:$0xff]  ;;  %v4726_v22 = vpack.c.bf16 %v2745_v25, %v2744_v30 }
  0xda   : > { %4331 = vmatprep.mubr.f32.mxu0 %v2403_v58  ;;  %4717 = vmatpush3.bf16.msra.mxu0 %v4714_v60  ;;  %v6364_v60 = vld [vmem:[#allocation8_spill] sm:$0xff]  ;;  %v6367_v58 = vld [vmem:[#allocation9_spill] sm:$0xff] }
  0xdb   : > { %4719 = vmatprep.subr.bf16.mxu0 %v4718_v45  ;;  %v6366_v51 = vld [vmem:[#allocation16_spill] sm:$0xff] }
  0xdc   : > { %3956 = vmatmul.mubr.f32.gmra.mrb[22].mxu1 %v5690_v62  ;;  %v2746_v62 = vld [vmem:[%s6313_s1 + $0x460] sm:$0xff]  ;;  %v2428_v32 = vld [vmem:[#allocation2 + $0x229] sm:$0xff] }
  0xdd   : > { %4332 = vmatmul.mubr.f32.gmra.mrb[6].mxu0 %v2404_v36  ;;  %3958 = vmatprep.mubr.f32.mxu1 %v5694_v0  ;;  %v2408_v0 = vld [vmem:[#allocation2 + $0xe9] sm:$0xff]  ;;  %v4730_v38 = vpack.c.bf16 %v2747_v20, %v2746_v62  ;;  %v6369_v36 = vld [vmem:[#allocation7_spill] sm:$0xff] }
  0xde   : > { %4334 = vmatprep.mubr.f32.mxu0 %v2405_v4  ;;  %4721 = vmatpush3.bf16.msra.mxu0 %v4718_v45  ;;  %v6368_v45 = vld [vmem:[#allocation17_spill] sm:$0xff]  ;;  %v6370_v4 = vld [vmem:[#allocation18_spill] sm:$0xff]  ;;  %v2704_v30 = vld [vmem:[#allocation2 + $0x62] sm:$0xff] }
  0xdf   : > { %4723 = vmatprep.subr.bf16.mxu0 %v4722_v31  ;;  %v2705_v25 = vld [vmem:[#allocation2 + $0x6a] sm:$0xff]  ;;  %v2724_v62 = vld [vmem:[#allocation2 + $0x1a2] sm:$0xff] }
  0xe0   : > { %3959 = vmatmul.mubr.f32.gmra.mrb[24].mxu1 %v5708_v11  ;;  %v2748_v11 = vld [vmem:[%s6313_s1 + $0x470] sm:$0xff] }
  0xe1   : > { %4335 = vmatmul.mubr.f32.gmra.mrb[8].mxu0 %v2406_v56  ;;  %3961 = vmatprep.mubr.f32.mxu1 %v5712_v41  ;;  %v2410_v41 = vld [vmem:[#allocation2 + $0x109] sm:$0xff]  ;;  %v4734_v29 = vpack.c.bf16 %v2749_v12, %v2748_v11 }
  0xe2   : > { %4337 = vmatprep.mubr.f32.mxu0 %v2407_v10  ;;  %4725 = vmatpush3.bf16.msra.mxu0 %v4722_v31  ;;  %v2703_v31 = vld [vmem:[#allocation2 + $0x4a] sm:$0xff]  ;;  %v2706_v56 = vld [vmem:[#allocation2 + $0x82] sm:$0xff] }
  0xe3   : > { %4727 = vmatprep.subr.bf16.mxu0 %v4726_v22  ;;  %v2708_v10 = vld [vmem:[#allocation2 + $0xa2] sm:$0xff]  ;;  %v2727_v12 = vld [vmem:[#allocation2 + $0x1ca] sm:$0xff] }
  0xe4   : > { %3962 = vmatmul.mubr.f32.gmra.mrb[26].mxu1 %v5726_v16  ;;  %v6034_v16 = vld [vmem:[#allocation2 + $0x129] sm:$0xff] }
  0xe5   : > { %4338 = vmatmul.mubr.f32.gmra.mrb[10].mxu0 %v2408_v0  ;;  %3964 = vmatprep.mubr.f32.mxu1 %v5730_v37  ;;  %v6042_v37 = vld [vmem:[#allocation2 + $0x149] sm:$0xff] }
  0xe6   : > { %4340 = vmatprep.mubr.f32.mxu0 %v2409_v17  ;;  %4729 = vmatpush3.bf16.msra.mxu0 %v4726_v22  ;;  %v2710_v22 = vld [vmem:[#allocation2 + $0xc2] sm:$0xff]  ;;  %v2725_v0 = vld [vmem:[#allocation2 + $0x1aa] sm:$0xff] }
  0xe7   : > { %4731 = vmatprep.subr.bf16.mxu0 %v4730_v38  ;;  %v1504_v20 = vld [vmem:[#allocation2 + $0x189] sm:$0xff]  ;;  %v1505_v17 = vld [vmem:[#allocation2 + $0x1a1] sm:$0xff] }
  0xe8   : > { %3965 = vmatmul.mubr.f32.gmra.mrb[28].mxu1 %v5744_v47  ;;  %v6044_v47 = vld [vmem:[#allocation2 + $0x161] sm:$0xff]  ;;  %v1506_v11 = vld [vmem:[#allocation2 + $0x1a9] sm:$0xff] }
  0xe9   : > { %4341 = vmatmul.mubr.f32.gmra.mrb[12].mxu0 %v2410_v41  ;;  %3967 = vmatprep.mubr.f32.mxu1 %v5748_v39  ;;  %v6051_v39 = vld [vmem:[#allocation2 + $0x169] sm:$0xff]  ;;  %v1507_v41 = vld [vmem:[#allocation2 + $0x1c1] sm:$0xff] }
  0xea   : > { %4343 = vmatprep.mubr.f32.mxu0 %v6029_v24  ;;  %4733 = vmatpush3.bf16.msra.mxu0 %v4730_v38  ;;  %v2726_v38 = vld [vmem:[#allocation2 + $0x1c2] sm:$0xff] }
  0xeb   : > { %4735 = vmatprep.subr.bf16.mxu0 %v4734_v29 }
  0xec   : > { %3968 = vmatmul.mubr.f32.gmra.mrb[30].mxu1 %v5762_v34  ;;  %v6357_v34 = vld [vmem:[#allocation11_spill] sm:$0xff] }
  0xed   : > { %4344 = vmatmul.mubr.f32.gmra.mrb[14].mxu0 %v6034_v16  ;;  %4002 = vmatprep.mubr.f32.mxu1 %v5654_v52  ;;  %v5020_v52 = vld [vmem:[#allocation2 + $0x181] sm:$0xff] }
  0xee   : > { %4346 = vmatprep.mubr.f32.mxu0 %v6036_v23  ;;  %4737 = vmatpush3.bf16.msra.mxu0 %v4734_v29  ;;  %v1508_v29 = vld [vmem:[#allocation2 + $0x1c9] sm:$0xff] }
  0xf0   : > { %4003 = vmatmul.mubr.f32.vlgmr.msra.gmra.mrb[0].mxu1 %v5668_v53  ;;  %v5022_v53 = vld [vmem:[#allocation2 + $0x1a1] sm:$0xff] }
  0xf1   : > { %4347 = vmatmul.mubr.f32.gmra.mrb[16].mxu0 %v6042_v37  ;;  %4746 = vmatpush3.bf16.msra.mxu1 %v5132_v8  ;;  %v5021_v8 = vld [vmem:[#allocation2 + $0x189] sm:$0xff] }
  0xf2   : > { %4005 = vmatprep.mubr.f32.mxu1 %v5674_v7  ;;  %4349 = vmatprep.mubr.f32.mxu0 %v6044_v47  ;;  %v6355_v7 = vld [vmem:[#allocation3_spill] sm:$0xff] }
  0xf3   : > { %4739 = vmatprep.subr.bf16.mxu1 %v5153_v13 }
  0xf4   : > { %4006 = vmatmul.mubr.f32.gmra.mrb[2].mxu1 %v5687_v33  ;;  %v6356_v33 = vld [vmem:[#allocation10_spill] sm:$0xff] }
  0xf5   : > { %4350 = vmatmul.mubr.f32.gmra.mrb[18].mxu0 %v6051_v39  ;;  %4008 = vmatprep.mubr.f32.mxu1 %v5692_v61  ;;  %v5023_v61 = vld [vmem:[#allocation2 + $0x1a9] sm:$0xff] }
  0xf6   : > { %4352 = vmatprep.mubr.f32.mxu0 %v5020_v52  ;;  %4747 = vmatpush3.bf16.msra.mxu1 %v5153_v13  ;;  %v5024_v13 = vld [vmem:[#allocation2 + $0x1c1] sm:$0xff] }
  0xf7   : > { %4740 = vmatprep.subr.bf16.mxu1 %v5168_v18  ;;  %v1511_v52 = vld [vmem:[#allocation2 + $0x201] sm:$0xff] }
  0xf8   : > { %4009 = vmatmul.mubr.f32.gmra.mrb[4].mxu1 %v5705_v3  ;;  %v6358_v3 = vld [vmem:[#allocation4_spill] sm:$0xff] }
  0xf9   : > { %4353 = vmatmul.mubr.f32.gmra.mrb[20].mxu0 %v5021_v8  ;;  %4011 = vmatprep.mubr.f32.mxu1 %v5710_v6  ;;  %v5025_v6 = vld [vmem:[#allocation2 + $0x1c9] sm:$0xff] }
  0xfa   : > { %4355 = vmatprep.mubr.f32.mxu0 %v5022_v53  ;;  %4748 = vmatpush3.bf16.msra.mxu1 %v5168_v18  ;;  %v5026_v18 = vld [vmem:[#allocation2 + $0x1e1] sm:$0xff]  ;;  %v1512_v53 = vld [vmem:[#allocation2 + $0x209] sm:$0xff] }
  0xfb   : > { %4741 = vmatprep.subr.bf16.mxu1 %v6355_v7  ;;  %v2732_v8 = vld [vmem:[#allocation2 + $0x222] sm:$0xff] }
  0xfc   : > { %4012 = vmatmul.mubr.f32.gmra.mrb[6].mxu1 %v6356_v33 }
  0xfd   : > { %4356 = vmatmul.mubr.f32.gmra.mrb[22].mxu0 %v5023_v61  ;;  %4014 = vmatprep.mubr.f32.mxu1 %v6357_v34 }
  0xfe   : > { %4358 = vmatprep.mubr.f32.mxu0 %v5024_v13  ;;  %4749 = vmatpush3.bf16.msra.mxu1 %v6355_v7  ;;  %v2733_v7 = vld [vmem:[#allocation2 + $0x22a] sm:$0xff] }
  0xff   : > { %4742 = vmatprep.subr.bf16.mxu1 %v6358_v3 }
 0x100   : > { %4015 = vmatmul.mubr.f32.gmra.mrb[8].mxu1 %v6359_v15 }
 0x101   : > { %4359 = vmatmul.mubr.f32.gmra.mrb[24].mxu0 %v5025_v6  ;;  %4017 = vmatprep.mubr.f32.mxu1 %v6360_v49 }
 0x102   : > { %4361 = vmatprep.mubr.f32.mxu0 %v5026_v18  ;;  %4750 = vmatpush3.bf16.msra.mxu1 %v6358_v3 }
 0x103   : > { %4743 = vmatprep.subr.bf16.mxu1 %v6361_v28 }
 0x104   : > { %4018 = vmatmul.mubr.f32.gmra.mrb[10].mxu1 %v6362_v55 }
 0x105   : > { %4362 = vmatmul.mubr.f32.gmra.mrb[26].mxu0 %v5027_v19  ;;  %4020 = vmatprep.mubr.f32.mxu1 %v6363_v50 }
 0x106   : > { %4364 = vmatprep.mubr.f32.mxu0 %v6364_v60  ;;  %4751 = vmatpush3.bf16.msra.mxu1 %v6361_v28 }
 0x107   : > { %4744 = vmatprep.subr.bf16.mxu1 %v6365_v59 }
 0x108   : > { %4021 = vmatmul.mubr.f32.gmra.mrb[12].mxu1 %v6366_v51 }
 0x109   : > { %4365 = vmatmul.mubr.f32.gmra.mrb[28].mxu0 %v6367_v58  ;;  %4023 = vmatprep.mubr.f32.mxu1 %v6368_v45 }
 0x10a   : > { %4367 = vmatprep.mubr.f32.mxu0 %v2427_v40  ;;  %4752 = vmatpush3.bf16.msra.mxu1 %v6365_v59 }
 0x10b   : > { %4745 = vmatprep.subr.bf16.mxu1 %v6369_v36 }
 0x10c   : > { %4024 = vmatmul.mubr.f32.gmra.mrb[14].mxu1 %v6370_v4 }
 0x10d   : > { %4368 = vmatmul.mubr.f32.gmra.mrb[30].mxu0 %v2428_v32  ;;  %4026 = vmatprep.mubr.f32.mxu1 %v5792_v46  ;;  %v2707_v46 = vld [vmem:[#allocation2 + $0x8a] sm:$0xff] }
 0x10e   : > { %4402 = vmatprep.mubr.f32.mxu0 %v2702_v63  ;;  %4753 = vmatpush3.bf16.msra.mxu1 %v6369_v36 }
 0x110   : > { %4027 = vmatmul.mubr.f32.gmra.mrb[16].mxu1 %v5804_v27  ;;  %v2709_v27 = vld [vmem:[#allocation2 + $0xaa] sm:$0xff] }
 0x111   : > { %4403 = vmatmul.mubr.f32.vlgmr.msra.gmra.mrb[0].mxu0 %v2703_v31  ;;  %4029 = vmatprep.mubr.f32.mxu1 %v5808_v1  ;;  %v2711_v1 = vld [vmem:[#allocation2 + $0xca] sm:$0xff] }
 0x112   : > { %4405 = vmatprep.mubr.f32.mxu0 %v2704_v30 }
 0x114   : > { %4030 = vmatmul.mubr.f32.gmra.mrb[18].mxu1 %v5819_v43  ;;  %v2712_v43 = vld [vmem:[#allocation2 + $0xe2] sm:$0xff] }
 0x115   : > { %4406 = vmatmul.mubr.f32.gmra.mrb[2].mxu0 %v2705_v25  ;;  %4032 = vmatprep.mubr.f32.mxu1 %v5822_v14  ;;  %v2714_v14 = vld [vmem:[#allocation2 + $0x102] sm:$0xff] }
 0x116   : > { %4408 = vmatprep.mubr.f32.mxu0 %v2706_v56 }
 0x118   : > { %4033 = vmatmul.mubr.f32.gmra.mrb[20].mxu1 %v5833_v35  ;;  %v2713_v35 = vld [vmem:[#allocation2 + $0xea] sm:$0xff] }
 0x119   : > { %4409 = vmatmul.mubr.f32.gmra.mrb[4].mxu0 %v2707_v46  ;;  %4035 = vmatprep.mubr.f32.mxu1 %v5836_v42  ;;  %v2716_v42 = vld [vmem:[#allocation2 + $0x122] sm:$0xff] }
 0x11a   : > { %4411 = vmatprep.mubr.f32.mxu0 %v2708_v10 }
 0x11c   : > { %4036 = vmatmul.mubr.f32.gmra.mrb[22].mxu1 %v5847_v44  ;;  %v2715_v44 = vld [vmem:[#allocation2 + $0x10a] sm:$0xff] }
 0x11d   : > { %4412 = vmatmul.mubr.f32.gmra.mrb[6].mxu0 %v2709_v27  ;;  %4038 = vmatprep.mubr.f32.mxu1 %v5850_v21  ;;  %v2718_v21 = vld [vmem:[#allocation2 + $0x142] sm:$0xff] }
 0x11e   : > { %4414 = vmatprep.mubr.f32.mxu0 %v2710_v22 }
 0x120   : > { %4039 = vmatmul.mubr.f32.gmra.mrb[24].mxu1 %v5861_v54  ;;  %v2717_v54 = vld [vmem:[#allocation2 + $0x12a] sm:$0xff] }
 0x121   : > { %4415 = vmatmul.mubr.f32.gmra.mrb[8].mxu0 %v2711_v1  ;;  %4041 = vmatprep.mubr.f32.mxu1 %v5864_v48  ;;  %v2720_v48 = vld [vmem:[#allocation2 + $0x162] sm:$0xff] }
 0x122   : > { %4417 = vmatprep.mubr.f32.mxu0 %v2712_v43 }
 0x124   : > { %4042 = vmatmul.mubr.f32.gmra.mrb[26].mxu1 %v5875_v9  ;;  %v2719_v9 = vld [vmem:[#allocation2 + $0x14a] sm:$0xff] }
 0x125   : > { %4418 = vmatmul.mubr.f32.gmra.mrb[10].mxu0 %v2713_v35  ;;  %4044 = vmatprep.mubr.f32.mxu1 %v5878_v57  ;;  %v2722_v57 = vld [vmem:[#allocation2 + $0x182] sm:$0xff] }
 0x126   : > { %4420 = vmatprep.mubr.f32.mxu0 %v2714_v14 }
 0x128   : > { %4045 = vmatmul.mubr.f32.gmra.mrb[28].mxu1 %v5889_v26  ;;  %v2721_v26 = vld [vmem:[#allocation2 + $0x16a] sm:$0xff] }
 0x129   : > { %4421 = vmatmul.mubr.f32.gmra.mrb[12].mxu0 %v2715_v44  ;;  %4047 = vmatprep.mubr.f32.mxu1 %v5954_v2  ;;  %v2723_v2 = vld [vmem:[#allocation2 + $0x18a] sm:$0xff] }
 0x12a   : > { %4423 = vmatprep.mubr.f32.mxu0 %v2716_v42 }
 0x12c   : > { %4048 = vmatmul.mubr.f32.gmra.mrb[30].mxu1 %v5966_v5  ;;  %v1503_v5 = vld [vmem:[#allocation2 + $0x181] sm:$0xff] }
 0x12d   : > { %4424 = vmatmul.mubr.f32.gmra.mrb[14].mxu0 %v2717_v54  ;;  %4106 = vmatprep.mubr.f32.mxu1 %v6029_v24  ;;  %v2728_v24 = vld [vmem:[#allocation2 + $0x1e2] sm:$0xff] }
 0x12e   : > { %4426 = vmatprep.mubr.f32.mxu0 %v2718_v21 }
 0x130   : > { %4107 = vmatmul.mubr.f32.vlgmr.msra.gmra.mrb[16].mxu1 %v6034_v16  ;;  %v2729_v16 = vld [vmem:[#allocation2 + $0x1ea] sm:$0xff] }
 0x131   : > { %4427 = vmatmul.mubr.f32.gmra.mrb[16].mxu0 %v2719_v9  ;;  %4109 = vmatprep.mubr.f32.mxu1 %v6036_v23  ;;  %v1509_v23 = vld [vmem:[#allocation2 + $0x1e1] sm:$0xff] }
 0x132   : > { %4429 = vmatprep.mubr.f32.mxu0 %v2720_v48 }
 0x134   : > { %4110 = vmatmul.mubr.f32.gmra.mrb[18].mxu1 %v6042_v37  ;;  %v2730_v37 = vld [vmem:[#allocation2 + $0x202] sm:$0xff] }
 0x135   : > { %4430 = vmatmul.mubr.f32.gmra.mrb[18].mxu0 %v2721_v26  ;;  %4112 = vmatprep.mubr.f32.mxu1 %v6044_v47  ;;  %v1510_v47 = vld [vmem:[#allocation2 + $0x1e9] sm:$0xff] }
 0x136   : > { %4432 = vmatprep.mubr.f32.mxu0 %v2722_v57 }
 0x138   : > { %4113 = vmatmul.mubr.f32.gmra.mrb[20].mxu1 %v6051_v39  ;;  %v2731_v39 = vld [vmem:[#allocation2 + $0x20a] sm:$0xff] }
 0x139   : > { %4433 = vmatmul.mubr.f32.gmra.mrb[20].mxu0 %v2723_v2  ;;  %4115 = vmatprep.mubr.f32.mxu1 %v1503_v5 }
 0x13a   : > { %4435 = vmatprep.mubr.f32.mxu0 %v2724_v62 }
 0x13c   : > { %4116 = vmatmul.mubr.f32.gmra.mrb[22].mxu1 %v1504_v20 }
 0x13d   : > { %4436 = vmatmul.mubr.f32.gmra.mrb[22].mxu0 %v2725_v0  ;;  %4118 = vmatprep.mubr.f32.mxu1 %v1505_v17 }
 0x13e   : > { %4438 = vmatprep.mubr.f32.mxu0 %v2726_v38 }
 0x140   : > { %4119 = vmatmul.mubr.f32.gmra.mrb[24].mxu1 %v1506_v11 }
 0x141   : > { %4439 = vmatmul.mubr.f32.gmra.mrb[24].mxu0 %v2727_v12  ;;  %4121 = vmatprep.mubr.f32.mxu1 %v1507_v41 }
 0x142   : > { %4441 = vmatprep.mubr.f32.mxu0 %v2728_v24 }
 0x144   : > { %4122 = vmatmul.mubr.f32.gmra.mrb[26].mxu1 %v1508_v29 }
 0x145   : > { %4442 = vmatmul.mubr.f32.gmra.mrb[26].mxu0 %v2729_v16  ;;  %4124 = vmatprep.mubr.f32.mxu1 %v1509_v23 }
 0x146   : > { %4444 = vmatprep.mubr.f32.mxu0 %v2730_v37 }
 0x148   : > { %4125 = vmatmul.mubr.f32.gmra.mrb[28].mxu1 %v1510_v47 }
 0x149   : > { %4445 = vmatmul.mubr.f32.gmra.mrb[28].mxu0 %v2731_v39  ;;  %4127 = vmatprep.mubr.f32.mxu1 %v1511_v52 }
 0x14a   : > { %4447 = vmatprep.mubr.f32.mxu0 %v2732_v8 }
 0x14c   : > { %4128 = vmatmul.mubr.f32.gmra.mrb[30].mxu1 %v1512_v53 }
 0x14d   : > { %4448 = vmatmul.mubr.f32.gmra.mrb[30].mxu0 %v2733_v7 }
 0x1c3   : > { %v4004_v33 = vpop.f32.mrb[0].mxu1 }
 0x1c4   : > { %v1290_v61 = vpop.f32.mrb[1].mxu1 }
 0x1c7   : > { %v4007_v34 = vpop.f32.mrb[2].mxu1 }
 0x1c8   : > { %v1300_v13 = vpop.f32.mrb[3].mxu1 }
 0x1cb   : > { %v4010_v3 = vpop.f32.mrb[4].mxu1 }
 0x1cc   : > { %v1310_v15 = vpop.f32.mrb[5].mxu1 }
 0x1cf   : > { %v4013_v6 = vpop.f32.mrb[6].mxu1 }
 0x1d0   : > { %v1320_v49 = vpop.f32.mrb[7].mxu1 }
 0x1d3   : > { %v4016_v18 = vpop.f32.mrb[8].mxu1 }
 0x1d4   : > { %v1330_v28 = vpop.f32.mrb[9].mxu1 }
 0x1d7   : > { %v4019_v55 = vpop.f32.mrb[10].mxu1 }
 0x1d8   : > { %v1340_v19 = vpop.f32.mrb[11].mxu1 }
 0x1db   : > { %v4022_v50 = vpop.f32.mrb[12].mxu1 }
 0x1dc   : > { %v1350_v60 = vpop.f32.mrb[13].mxu1 }
 0x1df   : > { %v4025_v40 = vpop.f32.mrb[14].mxu1 }
 0x1e0   : > { %v1360_v59 = vpop.f32.mrb[15].mxu1 }
 0x1e4   : > { %v4404_v51 = vpop.f32.mrb[0].mxu0 }
 0x1e5   : > { %v6112_v58 = vadd.f32 %v4404_v51, %v4004_v33  ;;  %v2816_v45 = vpop.f32.mrb[1].mxu0 }
 0x1e6   : > { %v6114_v32 = vadd.f32 %v2816_v45, %v1290_v61 }
 0x1e7   : > { %3008 = vst [vmem:[%s6110_s12 + $0x8] sm:$0xff] %v6112_v58 }
 0x1e8   : > { %3007 = vst [vmem:[%s6110_s12] sm:$0xff] %v6114_v32  ;;  %v4407_v63 = vpop.f32.mrb[2].mxu0  ;;  %v3039_v31 = vadd.f32 %v6114_v32, %v6112_v58 }
 0x1e9   : > { %v6120_v36 = vadd.f32 %v4407_v63, %v4007_v34  ;;  %v2826_v4 = vpop.f32.mrb[3].mxu0 }
 0x1ea   : > { %v6124_v30 = vadd.f32 %v2826_v4, %v1300_v13 }
 0x1eb   : > { %3010 = vst [vmem:[%s6110_s12 + $0x18] sm:$0xff] %v6120_v36 }
 0x1ec   : > { %3009 = vst [vmem:[%s6110_s12 + $0x10] sm:$0xff] %v6124_v30  ;;  %v3040_v25 = vadd.f32 %v6124_v30, %v3039_v31  ;;  %v4410_v56 = vpop.f32.mrb[4].mxu0 }
 0x1ed   : > { %v6131_v46 = vadd.f32 %v4410_v56, %v4010_v3  ;;  %v2836_v10 = vpop.f32.mrb[5].mxu0 }
 0x1ee   : > { %v6133_v27 = vadd.f32 %v2836_v10, %v1310_v15  ;;  %v3041_v22 = vadd.f32 %v6120_v36, %v3040_v25 }
 0x1ef   : > { %3012 = vst [vmem:[%s6110_s12 + $0x28] sm:$0xff] %v6131_v46 }
 0x1f0   : > { %3011 = vst [vmem:[%s6110_s12 + $0x20] sm:$0xff] %v6133_v27  ;;  %v3042_v1 = vadd.f32 %v6133_v27, %v3041_v22  ;;  %v4413_v43 = vpop.f32.mrb[6].mxu0 }
 0x1f1   : > { %v6141_v35 = vadd.f32 %v4413_v43, %v4013_v6  ;;  %v2846_v14 = vpop.f32.mrb[7].mxu0 }
 0x1f2   : > { %v6143_v44 = vadd.f32 %v2846_v14, %v1320_v49  ;;  %v3043_v42 = vadd.f32 %v6131_v46, %v3042_v1 }
 0x1f3   : > { %3014 = vst [vmem:[%s6110_s12 + $0x38] sm:$0xff] %v6141_v35 }
 0x1f4   : > { %3013 = vst [vmem:[%s6110_s12 + $0x30] sm:$0xff] %v6143_v44  ;;  %v3044_v54 = vadd.f32 %v6143_v44, %v3043_v42  ;;  %v4416_v21 = vpop.f32.mrb[8].mxu0 }
 0x1f5   : > { %v6151_v9 = vadd.f32 %v4416_v21, %v4016_v18  ;;  %v2856_v48 = vpop.f32.mrb[9].mxu0 }
 0x1f6   : > { %v6153_v26 = vadd.f32 %v2856_v48, %v1330_v28  ;;  %v3045_v57 = vadd.f32 %v6141_v35, %v3044_v54 }
 0x1f7   : > { %3016 = vst [vmem:[%s6110_s12 + $0x48] sm:$0xff] %v6151_v9 }
 0x1f8   : > { %3015 = vst [vmem:[%s6110_s12 + $0x40] sm:$0xff] %v6153_v26  ;;  %v3046_v2 = vadd.f32 %v6153_v26, %v3045_v57  ;;  %v4419_v5 = vpop.f32.mrb[10].mxu0 }
 0x1f9   : > { %v6161_v62 = vadd.f32 %v4419_v5, %v4019_v55  ;;  %v2866_v20 = vpop.f32.mrb[11].mxu0 }
 0x1fa   : > { %v6163_v0 = vadd.f32 %v2866_v20, %v1340_v19  ;;  %v3047_v17 = vadd.f32 %v6151_v9, %v3046_v2 }
 0x1fb   : > { %3018 = vst [vmem:[%s6110_s12 + $0x58] sm:$0xff] %v6161_v62 }
 0x1fc   : > { %3017 = vst [vmem:[%s6110_s12 + $0x50] sm:$0xff] %v6163_v0  ;;  %v3048_v38 = vadd.f32 %v6163_v0, %v3047_v17  ;;  %v4422_v11 = vpop.f32.mrb[12].mxu0 }
 0x1fd   : > { %v6171_v12 = vadd.f32 %v4422_v11, %v4022_v50  ;;  %v2876_v41 = vpop.f32.mrb[13].mxu0 }
 0x1fe   : > { %v6173_v24 = vadd.f32 %v2876_v41, %v1350_v60  ;;  %v3049_v29 = vadd.f32 %v6161_v62, %v3048_v38 }
 0x1ff   : > { %3020 = vst [vmem:[%s6110_s12 + $0x68] sm:$0xff] %v6171_v12 }
 0x200   : > { %3019 = vst [vmem:[%s6110_s12 + $0x60] sm:$0xff] %v6173_v24  ;;  %v3050_v16 = vadd.f32 %v6173_v24, %v3049_v29  ;;  %v4425_v23 = vpop.f32.mrb[14].mxu0 }
 0x201   : > { %v6181_v37 = vadd.f32 %v4425_v23, %v4025_v40  ;;  %v2886_v47 = vpop.f32.mrb[15].mxu0 }
 0x202   : > { %v6183_v39 = vadd.f32 %v2886_v47, %v1360_v59  ;;  %v3051_v52 = vadd.f32 %v6171_v12, %v3050_v16 }
 0x203   : > { %3022 = vst [vmem:[%s6110_s12 + $0x78] sm:$0xff] %v6181_v37  ;;  %v4108_v8 = vpop.f32.mrb[16].mxu1 }
 0x204   : > { %3021 = vst [vmem:[%s6110_s12 + $0x70] sm:$0xff] %v6183_v39  ;;  %v3052_v53 = vadd.f32 %v6183_v39, %v3051_v52  ;;  %v4428_v7 = vpop.f32.mrb[16].mxu0  ;;  %v1675_v33 = vpop.f32.mrb[17].mxu1 }
 0x205   : > { %v6191_v61 = vadd.f32 %v4428_v7, %v4108_v8  ;;  %v2896_v34 = vpop.f32.mrb[17].mxu0 }
 0x206   : > { %v6193_v13 = vadd.f32 %v2896_v34, %v1675_v33  ;;  %v3053_v3 = vadd.f32 %v6181_v37, %v3052_v53 }
 0x207   : > { %3024 = vst [vmem:[%s6110_s12 + $0x88] sm:$0xff] %v6191_v61  ;;  %v4111_v15 = vpop.f32.mrb[18].mxu1 }
 0x208   : > { %3023 = vst [vmem:[%s6110_s12 + $0x80] sm:$0xff] %v6193_v13  ;;  %v3054_v6 = vadd.f32 %v6193_v13, %v3053_v3  ;;  %v4431_v49 = vpop.f32.mrb[18].mxu0  ;;  %v1685_v18 = vpop.f32.mrb[19].mxu1 }
 0x209   : > { %v6201_v28 = vadd.f32 %v4431_v49, %v4111_v15  ;;  %v2906_v55 = vpop.f32.mrb[19].mxu0 }
 0x20a   : > { %v6203_v19 = vadd.f32 %v2906_v55, %v1685_v18  ;;  %v3055_v50 = vadd.f32 %v6191_v61, %v3054_v6 }
 0x20b   : > { %3026 = vst [vmem:[%s6110_s12 + $0x98] sm:$0xff] %v6201_v28  ;;  %v4114_v60 = vpop.f32.mrb[20].mxu1 }
 0x20c   : > { %3025 = vst [vmem:[%s6110_s12 + $0x90] sm:$0xff] %v6203_v19  ;;  %v3056_v40 = vadd.f32 %v6203_v19, %v3055_v50  ;;  %v4434_v59 = vpop.f32.mrb[20].mxu0  ;;  %v1695_v51 = vpop.f32.mrb[21].mxu1 }
 0x20d   : > { %v6211_v45 = vadd.f32 %v4434_v59, %v4114_v60  ;;  %v2916_v63 = vpop.f32.mrb[21].mxu0 }
 0x20e   : > { %v6213_v4 = vadd.f32 %v2916_v63, %v1695_v51  ;;  %v3057_v31 = vadd.f32 %v6201_v28, %v3056_v40 }
 0x20f   : > { %3028 = vst [vmem:[%s6110_s12 + $0xa8] sm:$0xff] %v6211_v45  ;;  %v4117_v25 = vpop.f32.mrb[22].mxu1 }
 0x210   : > { %3027 = vst [vmem:[%s6110_s12 + $0xa0] sm:$0xff] %v6213_v4  ;;  %v3058_v56 = vadd.f32 %v6213_v4, %v3057_v31  ;;  %v4437_v10 = vpop.f32.mrb[22].mxu0  ;;  %v1705_v22 = vpop.f32.mrb[23].mxu1 }
 0x211   : > { %v6221_v1 = vadd.f32 %v4437_v10, %v4117_v25  ;;  %v2926_v43 = vpop.f32.mrb[23].mxu0 }
 0x212   : > { %v6223_v14 = vadd.f32 %v2926_v43, %v1705_v22  ;;  %v3059_v42 = vadd.f32 %v6211_v45, %v3058_v56 }
 0x213   : > { %3030 = vst [vmem:[%s6110_s12 + $0xb8] sm:$0xff] %v6221_v1  ;;  %v4120_v54 = vpop.f32.mrb[24].mxu1 }
 0x214   : > { %3029 = vst [vmem:[%s6110_s12 + $0xb0] sm:$0xff] %v6223_v14  ;;  %v3060_v21 = vadd.f32 %v6223_v14, %v3059_v42  ;;  %v4440_v48 = vpop.f32.mrb[24].mxu0  ;;  %v1715_v57 = vpop.f32.mrb[25].mxu1 }
 0x215   : > { %v6231_v2 = vadd.f32 %v4440_v48, %v4120_v54  ;;  %v2936_v5 = vpop.f32.mrb[25].mxu0 }
 0x216   : > { %v4779_v20 = vadd.f32 %v2936_v5, %v1715_v57  ;;  %v3061_v17 = vadd.f32 %v6221_v1, %v3060_v21 }
 0x217   : > { %3032 = vst [vmem:[%s6110_s12 + $0xc8] sm:$0xff] %v6231_v2  ;;  %v4123_v38 = vpop.f32.mrb[26].mxu1 }
 0x218   : > { %3031 = vst [vmem:[%s6110_s12 + $0xc0] sm:$0xff] %v4779_v20  ;;  %v3062_v11 = vadd.f32 %v4779_v20, %v3061_v17  ;;  %v4443_v41 = vpop.f32.mrb[26].mxu0  ;;  %v1725_v29 = vpop.f32.mrb[27].mxu1 }
 0x219   : > { %v4780_v16 = vadd.f32 %v4443_v41, %v4123_v38  ;;  %v2946_v23 = vpop.f32.mrb[27].mxu0 }
 0x21a   : > { %v4781_v47 = vadd.f32 %v2946_v23, %v1725_v29  ;;  %v3063_v52 = vadd.f32 %v6231_v2, %v3062_v11 }
 0x21b   : > { %3034 = vst [vmem:[%s6110_s12 + $0xd8] sm:$0xff] %v4780_v16  ;;  %v4126_v8 = vpop.f32.mrb[28].mxu1 }
 0x21c   : > { %3033 = vst [vmem:[%s6110_s12 + $0xd0] sm:$0xff] %v4781_v47  ;;  %v3064_v53 = vadd.f32 %v4781_v47, %v3063_v52  ;;  %v4446_v7 = vpop.f32.mrb[28].mxu0  ;;  %v1735_v33 = vpop.f32.mrb[29].mxu1 }
 0x21d   : > { %v4782_v34 = vadd.f32 %v4446_v7, %v4126_v8  ;;  %v2956_v3 = vpop.f32.mrb[29].mxu0 }
 0x21e   : > { %v4783_v15 = vadd.f32 %v2956_v3, %v1735_v33  ;;  %v3065_v6 = vadd.f32 %v4780_v16, %v3064_v53 }
 0x21f   : > { %3036 = vst [vmem:[%s6110_s12 + $0xe8] sm:$0xff] %v4782_v34  ;;  %v4129_v49 = vpop.f32.mrb[30].mxu1 }
 0x220   : > { %3035 = vst [vmem:[%s6110_s12 + $0xe0] sm:$0xff] %v4783_v15  ;;  %v3066_v18 = vadd.f32 %v4783_v15, %v3065_v6  ;;  %v4449_v55 = vpop.f32.mrb[30].mxu0  ;;  %v1745_v50 = vpop.f32.mrb[31].mxu1 }
 0x221   : > { %v4784_v60 = vadd.f32 %v4449_v55, %v4129_v49  ;;  %v2966_v40 = vpop.f32.mrb[31].mxu0 }
 0x222   : > { %v4785_v59 = vadd.f32 %v2966_v40, %v1745_v50  ;;  %v3067_v51 = vadd.f32 %v4782_v34, %v3066_v18 }
 0x223   : > { %3038 = vst [vmem:[%s6110_s12 + $0xf8] sm:$0xff] %v4784_v60 }
 0x224   : > { %3037 = vst [vmem:[%s6110_s12 + $0xf0] sm:$0xff] %v4785_v59  ;;  %v3068_v63 = vadd.f32 %v4785_v59, %v3067_v51 }
 0x226   : > { %v3069_v31 = vadd.f32 %v4784_v60, %v3068_v63 }
 0x228   : > { %v3070_v25 = vrot.slane %v3069_v31, 4 }
 0x22a   : > { %v3071_v56 = vadd.f32 %v3070_v25, %v3069_v31 }
 0x22c   : > { %v3072_v10 = vrot.slane %v3071_v56, 2 }
 0x22e   : > { %v3073_v22 = vadd.f32 %v3072_v10, %v3071_v56 }
 0x230   : > { %v3074_v43 = vrot.slane %v3073_v22, 1 }
 0x232   : > { %v3075_v42 = vadd.f32 %v3074_v43, %v3073_v22 }
 0x234   : > { %v3076_v54 = vmul.f32 0.00390625, %v3075_v42 }
 0x236   : > { %3178 = vst [vmem:[%s211_s14] sm:$0x1] %v3076_v54  ;;  %v3085_v21 = vsub.f32 %v6153_v26, %v3076_v54  ;;  %v3087_v48 = vsub.f32 %v6163_v0, %v3076_v54  ;;  %v3088_v57 = vsub.f32 %v6161_v62, %v3076_v54  ;;  %v3089_v5 = vsub.f32 %v6173_v24, %v3076_v54 }
 0x237   : > { %v3090_v17 = vsub.f32 %v6171_v12, %v3076_v54  ;;  %v3091_v38 = vsub.f32 %v6183_v39, %v3076_v54  ;;  %v3092_v11 = vsub.f32 %v6181_v37, %v3076_v54  ;;  %v3093_v41 = vsub.f32 %v6193_v13, %v3076_v54 }
 0x238   : > { %v3094_v29 = vsub.f32 %v6191_v61, %v3076_v54  ;;  %v3095_v23 = vsub.f32 %v6203_v19, %v3076_v54  ;;  %v3096_v26 = vsub.f32 %v6201_v28, %v3076_v54  ;;  %v3097_v0 = vsub.f32 %v6213_v4, %v3076_v54 }
 0x239   : > { %v3098_v62 = vsub.f32 %v6211_v45, %v3076_v54  ;;  %v3099_v24 = vsub.f32 %v6223_v14, %v3076_v54  ;;  %v3100_v12 = vsub.f32 %v6221_v1, %v3076_v54  ;;  %v6263_v52 = vsub.f32 %v4779_v20, %v3076_v54 }
 0x23a   : > { %v6266_v37 = vsub.f32 %v6231_v2, %v3076_v54  ;;  %v6268_v39 = vsub.f32 %v4781_v47, %v3076_v54  ;;  %v6270_v61 = vsub.f32 %v4780_v16, %v3076_v54  ;;  %v6272_v13 = vsub.f32 %v4783_v15, %v3076_v54 }
 0x23b   : > { %v6274_v28 = vsub.f32 %v4782_v34, %v3076_v54  ;;  %v6276_v19 = vsub.f32 %v4785_v59, %v3076_v54  ;;  %v6278_v45 = vsub.f32 %v4784_v60, %v3076_v54  ;;  %v3077_v4 = vsub.f32 %v6114_v32, %v3076_v54 }
 0x23c   : > { %v3078_v1 = vsub.f32 %v6112_v58, %v3076_v54  ;;  %v3079_v14 = vsub.f32 %v6124_v30, %v3076_v54  ;;  %v3080_v47 = vsub.f32 %v6120_v36, %v3076_v54  ;;  %v3081_v16 = vsub.f32 %v6133_v27, %v3076_v54 }
 0x23d   : > { %v3109_v2 = vmul.f32 %v3077_v4, %v3077_v4  ;;  %v3082_v7 = vsub.f32 %v6131_v46, %v3076_v54  ;;  %v3083_v3 = vsub.f32 %v6143_v44, %v3076_v54  ;;  %v3084_v58 = vsub.f32 %v6141_v35, %v3076_v54 }
 0x23e   : > { %v3110_v20 = vmul.f32 %v3078_v1, %v3078_v1  ;;  %v3111_v8 = vmul.f32 %v3079_v14, %v3079_v14  ;;  %v3112_v33 = vmul.f32 %v3080_v47, %v3080_v47  ;;  %v3113_v15 = vmul.f32 %v3081_v16, %v3081_v16 }
 0x23f   : > { %v3114_v6 = vmul.f32 %v3082_v7, %v3082_v7  ;;  %v3115_v49 = vmul.f32 %v3083_v3, %v3083_v3  ;;  %v3086_v36 = vsub.f32 %v6151_v9, %v3076_v54  ;;  %v3116_v55 = vmul.f32 %v3084_v58, %v3084_v58 }
 0x240   : > { %v3141_v53 = vadd.f32 %v3110_v20, %v3109_v2  ;;  %v3117_v50 = vmul.f32 %v3085_v21, %v3085_v21  ;;  %v3119_v59 = vmul.f32 %v3087_v48, %v3087_v48  ;;  %v3120_v63 = vmul.f32 %v3088_v57, %v3088_v57 }
 0x241   : > { %v3118_v40 = vmul.f32 %v3086_v36, %v3086_v36  ;;  %v3121_v31 = vmul.f32 %v3089_v5, %v3089_v5  ;;  %v3122_v56 = vmul.f32 %v3090_v17, %v3090_v17  ;;  %v3123_v10 = vmul.f32 %v3091_v38, %v3091_v38 }
 0x242   : > { %v3142_v34 = vadd.f32 %v3141_v53, %v3111_v8  ;;  %v3124_v43 = vmul.f32 %v3092_v11, %v3092_v11  ;;  %v3125_v4 = vmul.f32 %v3093_v41, %v3093_v41  ;;  %v3126_v54 = vmul.f32 %v3094_v29, %v3094_v29 }
 0x243   : > { %v3127_v21 = vmul.f32 %v3095_v23, %v3095_v23  ;;  %v3128_v2 = vmul.f32 %v3096_v26, %v3096_v26  ;;  %v3129_v48 = vmul.f32 %v3097_v0, %v3097_v0  ;;  %v3130_v57 = vmul.f32 %v3098_v62, %v3098_v62 }
 0x244   : > { %v3143_v32 = vadd.f32 %v3142_v34, %v3112_v33  ;;  %v3131_v5 = vmul.f32 %v3099_v24, %v3099_v24  ;;  %v3132_v17 = vmul.f32 %v3100_v12, %v3100_v12  ;;  %v3133_v38 = vmul.f32 %v6263_v52, %v6263_v52 }
 0x245   : > { %v3134_v41 = vmul.f32 %v6266_v37, %v6266_v37  ;;  %v3135_v23 = vmul.f32 %v6268_v39, %v6268_v39  ;;  %v3136_v0 = vmul.f32 %v6270_v61, %v6270_v61  ;;  %v3137_v24 = vmul.f32 %v6272_v13, %v6272_v13 }
 0x246   : > { %v3144_v30 = vadd.f32 %v3143_v32, %v3113_v15  ;;  %v3138_v52 = vmul.f32 %v6274_v28, %v6274_v28  ;;  %v3139_v37 = vmul.f32 %v6276_v19, %v6276_v19  ;;  %v3140_v39 = vmul.f32 %v6278_v45, %v6278_v45 }
 0x248   : > { %v3145_v18 = vadd.f32 %v3144_v30, %v3114_v6 }
 0x24a   : > { %v3146_v27 = vadd.f32 %v3145_v18, %v3115_v49 }
 0x24c   : > { %v3147_v60 = vadd.f32 %v3146_v27, %v3116_v55 }
 0x24e   : > { %v3148_v46 = vadd.f32 %v3147_v60, %v3117_v50 }
 0x250   : > { %v3149_v51 = vadd.f32 %v3148_v46, %v3118_v40 }
 0x252   : > { %v3150_v44 = vadd.f32 %v3149_v51, %v3119_v59 }
 0x254   : > { %v3151_v25 = vadd.f32 %v3150_v44, %v3120_v63 }
 0x256   : > { %v3152_v35 = vadd.f32 %v3151_v25, %v3121_v31 }
 0x258   : > { %v3153_v22 = vadd.f32 %v3152_v35, %v3122_v56 }
 0x25a   : > { %v3154_v42 = vadd.f32 %v3153_v22, %v3123_v10 }
 0x25c   : > { %v3155_v9 = vadd.f32 %v3154_v42, %v3124_v43 }
 0x25e   : > { %v3156_v1 = vadd.f32 %v3155_v9, %v3125_v4 }
 0x260   : > { %v3157_v14 = vadd.f32 %v3156_v1, %v3126_v54 }
 0x262   : > { %v3158_v20 = vadd.f32 %v3157_v14, %v3127_v21 }
 0x264   : > { %v3159_v47 = vadd.f32 %v3158_v20, %v3128_v2 }
 0x266   : > { %v3160_v16 = vadd.f32 %v3159_v47, %v3129_v48 }
 0x268   : > { %v3161_v8 = vadd.f32 %v3160_v16, %v3130_v57 }
 0x26a   : > { %v3162_v53 = vadd.f32 %v3161_v8, %v3131_v5 }
 0x26c   : > { %v3163_v11 = vadd.f32 %v3162_v53, %v3132_v17 }
 0x26e   : > { %v3164_v29 = vadd.f32 %v3163_v11, %v3133_v38 }
 0x270   : > { %v3165_v26 = vadd.f32 %v3164_v29, %v3134_v41 }
 0x272   : > { %v3166_v62 = vadd.f32 %v3165_v26, %v3135_v23 }
 0x274   : > { %v3167_v12 = vadd.f32 %v3166_v62, %v3136_v0 }
 0x276   : > { %v3168_v7 = vadd.f32 %v3167_v12, %v3137_v24 }
 0x278   : > { %v3169_v33 = vadd.f32 %v3168_v7, %v3138_v52 }
 0x27a   : > { %v3170_v34 = vadd.f32 %v3169_v33, %v3139_v37 }
 0x27c   : > { %v3171_v3 = vadd.f32 %v3170_v34, %v3140_v39 }
 0x27e   : > { %v3172_v61 = vrot.slane %v3171_v3, 4 }
 0x280   : > { %v3173_v15 = vadd.f32 %v3172_v61, %v3171_v3 }
 0x282   : > { %v3174_v32 = vrot.slane %v3173_v15, 2 }
 0x284   : > { %v3175_v58 = vadd.f32 %v3174_v32, %v3173_v15 }
 0x286   : > { %v3176_v6 = vrot.slane %v3175_v58, 1 }
 0x288   : > { %v3177_v13 = vadd.f32 %v3176_v6, %v3175_v58 }
 0x28a   : > { %3179 = vst [vmem:[%s214_s20] sm:$0x1] %v3177_v13 }
 0x28b PF: > { %s15_s15 = sadd.s32 1, %s5034_s15  }
 0x28c   : > { %p12_p4 = scmp.ge.s32.totalorder %s15_s15, 4  }
 0x28e   :  { %14 = sbr.rel (!%p12_p4) target bundleno = 1 (0x1), region = 85 }

// kernel: basic_block_forward.4
= control target key start
LH: loop header
LB: loop body
LE: loop exit
PB: predicated region body
PF: predicated region fallthrough
CT: control target
= control target key end

     0   :  { %s5233_s21 = smov 0   ;;  %s6637_s0 = inlined_call_operand.vmem [shape: f32[2,16,16,128], index: 0, kind: input, shape index: {}]   ;;  %s6638_s1 = inlined_call_operand.vmem [shape: f32[1,128], index: 1, kind: input, shape index: {}]   ;;  %s6639_s2 = inlined_call_operand.vmem [shape: f32[1,128], index: 2, kind: input, shape index: {}]   ;;  %s6640_s3 = inlined_call_operand.vmem [shape: f32[1152,128], index: 3, kind: input, shape index: {}]   ;;  %s6641_s4 = inlined_call_operand.vmem [shape: f32[2,16,16,128], index: 4, kind: output, shape index: {0}]   ;;  %s6642_s5 = inlined_call_operand.vmem [shape: f32[2,1,128], index: 5, kind: output, shape index: {1}]   ;;  %s6643_s6 = inlined_call_operand.vmem [shape: f32[2,1,128], index: 6, kind: output, shape index: {2}]  }
   0x1 LB: > { %s3449_s22 = sadd.s32 4294967295, %s5195_s21   ;;  %p3453_p0 = scmp.ge.s32.totalorder %s5195_s21, 1  ;;  %s5195_s21 = sphi %s5233_s21, %s17_s21  }
   0x2   : > { %p217_p1 = scmp.lt.s32.totalorder %s5195_s21, 3 }
   0x4   : > { %p218_p2 = pnand %p3453_p0, %p217_p1 }
   0x6   : > { %221 = sbr.rel (%p218_p2) target bundleno = 652 (0x28c), region = 36 }
   0xd   : > { %v569_v0 = vld [vmem:[%s6640_s3 + $0x80] sm:$0xff]  ;;  %v570_v1 = vld [vmem:[%s6640_s3 + $0x88] sm:$0xff]  ;;  %p5252_p3 = scmp.lt.s32.totalorder %s3449_s22, 1  ;;  %v571_v5 = vld [vmem:[%s6640_s3 + $0x90] sm:$0xff]  ;;  %v5197_v7 = vmov 0.0  }
   0xe   : > { %v1677_v2 = vld [vmem:[%s6640_s3 + $0x200] sm:$0xff]  ;;  %v4616_v3 = vpack.c.bf16 %v570_v1, %v569_v0  ;;  %v1678_v4 = vld [vmem:[%s6640_s3 + $0x208] sm:$0xff]  ;;  %v572_v6 = vld [vmem:[%s6640_s3 + $0x98] sm:$0xff]  ;;  %411 = vst [vmem:[#allocation2] sm:$0xff] %v5197_v7 }
   0xf   : > { %412 = vst [vmem:[#allocation2 + $0x8] sm:$0xff] %v5197_v7  ;;  %413 = vst [vmem:[#allocation2 + $0x10] sm:$0xff] %v5197_v7  ;;  %v5303_v8 = vpack.c.bf16 %v1678_v4, %v1677_v2  ;;  %v4620_v9 = vpack.c.bf16 %v572_v6, %v571_v5  ;;  %v1679_v10 = vld [vmem:[%s6640_s3 + $0x210] sm:$0xff]  ;;  %v1680_v11 = vld [vmem:[%s6640_s3 + $0x218] sm:$0xff]  ;;  %s6703_s22 = smov (!%p5252_p3, %s3449_s22), 1 }
  0x10   : > { %416 = vst [vmem:[#allocation2 + $0x220] sm:$0xff] %v5197_v7  ;;  %417 = vst [vmem:[#allocation2 + $0x228] sm:$0xff] %v5197_v7  ;;  %v573_v12 = vld [vmem:[%s6640_s3 + $0xa0] sm:$0xff]  ;;  %4617 = vmatprep.subr.bf16.mxu1 %v4616_v3  ;;  %v5324_v13 = vpack.c.bf16 %v1680_v11, %v1679_v10  ;;  %v574_v14 = vld [vmem:[%s6640_s3 + $0xa8] sm:$0xff]  ;;  %s3462_s26 = sshll.u32 %s6703_s22, 8  ;;  %s265_s9 = scalar_lea.vmem %s6642_s5, %s6703_s22 }
  0x11   : > { %418 = vst [vmem:[#allocation2 + $0x230] sm:$0xff] %v5197_v7  ;;  %421 = vst [vmem:[#allocation2 + $0x20] sm:$0x1] %v5197_v7  ;;  %v1681_v15 = vld [vmem:[%s6640_s3 + $0x220] sm:$0xff]  ;;  %v1682_v16 = vld [vmem:[%s6640_s3 + $0x228] sm:$0xff]  ;;  %4745 = vmatprep.subr.bf16.mxu0 %v5303_v8  ;;  %4619 = vmatpush3.bf16.msra.mxu1 %v4616_v3  ;;  %v4624_v17 = vpack.c.bf16 %v574_v14, %v573_v12  ;;  %s5358_s13 = scalar_lea.vmem %s6637_s0, %s3462_s26  ;;  %s6435_s7 = scalar_lea.vmem %s6641_s4, %s3462_s26 }
  0x12   : > { %422 = vst [vmem:[#allocation2 + $0x40] sm:$0x1] %v5197_v7  ;;  %423 = vst [vmem:[#allocation2 + $0x60] sm:$0x1] %v5197_v7  ;;  %4747 = vmatpush3.bf16.msra.mxu0 %v5303_v8  ;;  %4621 = vmatprep.subr.bf16.mxu1 %v4620_v9  ;;  %v5339_v18 = vpack.c.bf16 %v1682_v16, %v1681_v15  ;;  %v575_v19 = vld [vmem:[%s6640_s3 + $0xb0] sm:$0xff]  ;;  %v576_v20 = vld [vmem:[%s6640_s3 + $0xb8] sm:$0xff]  ;;  %s268_s12 = scalar_lea.vmem %s6643_s6, %s6703_s22 }
  0x13   : > { %424 = vst [vmem:[#allocation2 + $0x80] sm:$0x1] %v5197_v7  ;;  %425 = vst [vmem:[#allocation2 + $0xa0] sm:$0x1] %v5197_v7  ;;  %4749 = vmatprep.subr.bf16.mxu0 %v5324_v13  ;;  %v1683_v21 = vld [vmem:[%s6640_s3 + $0x230] sm:$0xff]  ;;  %v1684_v22 = vld [vmem:[%s6640_s3 + $0x238] sm:$0xff]  ;;  %v4628_v23 = vpack.c.bf16 %v576_v20, %v575_v19 }
  0x14   : > { %426 = vst [vmem:[#allocation2 + $0xc0] sm:$0x1] %v5197_v7  ;;  %427 = vst [vmem:[#allocation2 + $0xe0] sm:$0x1] %v5197_v7  ;;  %v577_v24 = vld [vmem:[%s6640_s3 + $0xc0] sm:$0xff]  ;;  %v578_v25 = vld [vmem:[%s6640_s3 + $0xc8] sm:$0xff]  ;;  %v5368_v26 = vpack.c.bf16 %v1684_v22, %v1683_v21 }
  0x15   : > { %428 = vst [vmem:[#allocation2 + $0x100] sm:$0x1] %v5197_v7  ;;  %429 = vst [vmem:[#allocation2 + $0x120] sm:$0x1] %v5197_v7  ;;  %4623 = vmatpush3.bf16.msra.mxu1 %v4620_v9  ;;  %v1685_v27 = vld [vmem:[%s6640_s3 + $0x240] sm:$0xff]  ;;  %v1686_v28 = vld [vmem:[%s6640_s3 + $0x248] sm:$0xff]  ;;  %v4632_v34 = vpack.c.bf16 %v578_v25, %v577_v24 }
  0x16   : > { %430 = vst [vmem:[#allocation2 + $0x140] sm:$0x1] %v5197_v7  ;;  %431 = vst [vmem:[#allocation2 + $0x160] sm:$0x1] %v5197_v7  ;;  %4751 = vmatpush3.bf16.msra.mxu0 %v5324_v13  ;;  %4625 = vmatprep.subr.bf16.mxu1 %v4624_v17  ;;  %v537_v29 = vld [vmem:[#allocation2 + $0x1] sm:$0xff]  ;;  %v579_v35 = vld [vmem:[%s6640_s3 + $0xd0] sm:$0xff]  ;;  %v5394_v37 = vpack.c.bf16 %v1686_v28, %v1685_v27 }
  0x17   : > { %432 = vst [vmem:[#allocation2 + $0x180] sm:$0x1] %v5197_v7  ;;  %433 = vst [vmem:[#allocation2 + $0x1a0] sm:$0x1] %v5197_v7  ;;  %4753 = vmatprep.subr.bf16.mxu0 %v5339_v18  ;;  %3928 = vmatprep.mubr.f32.mxu1 %v537_v29  ;;  %v269_v30 = vld [vmem:[%s5358_s13] sm:$0xff]  ;;  %v270_v36 = vld [vmem:[%s5358_s13 + $0x8] sm:$0xff] }
  0x18   : > { %434 = vst [vmem:[#allocation2 + $0x1c0] sm:$0x1] %v5197_v7  ;;  %435 = vst [vmem:[#allocation2 + $0x1e0] sm:$0x1] %v5197_v7  ;;  %v5380_v31 = vld [vmem:[%s6638_s1] ss:$0 sm:$0xff] }
  0x19   : > { %436 = vst [vmem:[#allocation2 + $0x200] sm:$0x1] %v5197_v7  ;;  %439 = vst [vmem:[#allocation2 + $0x31] sm:$0x1] %v5197_v7  ;;  %v5385_v32 = vld [vmem:[%s6639_s2] ss:$0 sm:$0xff]  ;;  %4627 = vmatpush3.bf16.msra.mxu1 %v4624_v17  ;;  %v308_v33 = vmul.f32 %v5380_v31, %v269_v30  ;;  %v309_v40 = vmul.f32 %v5380_v31, %v270_v36 }
  0x1a   : > { %440 = vst [vmem:[#allocation2 + $0x51] sm:$0x1] %v5197_v7  ;;  %441 = vst [vmem:[#allocation2 + $0x71] sm:$0x1] %v5197_v7  ;;  %4755 = vmatpush3.bf16.msra.mxu0 %v5339_v18  ;;  %4629 = vmatprep.subr.bf16.mxu1 %v4628_v23  ;;  %v580_v38 = vld [vmem:[%s6640_s3 + $0xd8] sm:$0xff]  ;;  %v271_v41 = vld [vmem:[%s5358_s13 + $0x10] sm:$0xff] }
  0x1b   : > { %442 = vst [vmem:[#allocation2 + $0x91] sm:$0x1] %v5197_v7  ;;  %443 = vst [vmem:[#allocation2 + $0xb1] sm:$0x1] %v5197_v7  ;;  %4757 = vmatprep.subr.bf16.mxu0 %v5368_v26  ;;  %v347_v39 = vadd.f32 %v5385_v32, %v308_v33  ;;  %v272_v42 = vld [vmem:[%s5358_s13 + $0x18] sm:$0xff]  ;;  %v1687_v43 = vld [vmem:[%s6640_s3 + $0x250] sm:$0xff]  ;;  %v310_v45 = vmul.f32 %v5380_v31, %v271_v41  ;;  %v348_v49 = vadd.f32 %v5385_v32, %v309_v40 }
  0x1c   : > { %444 = vst [vmem:[#allocation2 + $0xd1] sm:$0x1] %v5197_v7  ;;  %445 = vst [vmem:[#allocation2 + $0xf1] sm:$0x1] %v5197_v7  ;;  %v1688_v44 = vld [vmem:[%s6640_s3 + $0x258] sm:$0xff]  ;;  %v311_v46 = vmul.f32 %v5380_v31, %v272_v42  ;;  %v273_v47 = vld [vmem:[%s5358_s13 + $0x20] sm:$0xff]  ;;  %v4636_v52 = vpack.c.bf16 %v580_v38, %v579_v35 }
  0x1d   : > { %446 = vst [vmem:[#allocation2 + $0x111] sm:$0x1] %v5197_v7  ;;  %447 = vst [vmem:[#allocation2 + $0x131] sm:$0x1] %v5197_v7  ;;  %4631 = vmatpush3.bf16.msra.mxu1 %v4628_v23  ;;  %v5412_v48 = vmax.f32 %v347_v39, 0.0  ;;  %v312_v50 = vmul.f32 %v5380_v31, %v273_v47  ;;  %v274_v51 = vld [vmem:[%s5358_s13 + $0x28] sm:$0xff]  ;;  %v349_v53 = vadd.f32 %v5385_v32, %v310_v45 }
  0x1e   : > { %448 = vst [vmem:[#allocation2 + $0x151] sm:$0x1] %v5197_v7  ;;  %449 = vst [vmem:[#allocation2 + $0x171] sm:$0x1] %v5197_v7  ;;  %4759 = vmatpush3.bf16.msra.mxu0 %v5368_v26  ;;  %4633 = vmatprep.subr.bf16.mxu1 %v4632_v34  ;;  %v350_v54 = vadd.f32 %v5385_v32, %v311_v46  ;;  %v275_v55 = vld [vmem:[%s5358_s13 + $0x30] sm:$0xff]  ;;  %v276_v56 = vld [vmem:[%s5358_s13 + $0x38] sm:$0xff]  ;;  %v5423_v57 = vpack.c.bf16 %v1688_v44, %v1687_v43 }
  0x1f   : > { %450 = vst [vmem:[#allocation2 + $0x191] sm:$0x1] %v5197_v7  ;;  %451 = vst [vmem:[#allocation2 + $0x1b1] sm:$0x1] %v5197_v7  ;;  %4761 = vmatprep.subr.bf16.mxu0 %v5394_v37  ;;  %v581_v58 = vld [vmem:[%s6640_s3 + $0xe0] sm:$0xff]  ;;  %v582_v59 = vld [vmem:[%s6640_s3 + $0xe8] sm:$0xff]  ;;  %4248 = vmatprep.mubr.f32.mxu0 %v5412_v48  ;;  %v351_v61 = vadd.f32 %v5385_v32, %v312_v50  ;;  %v313_v62 = vmul.f32 %v5380_v31, %v274_v51 }
  0x20   : > { %452 = vst [vmem:[#allocation2 + $0x1d1] sm:$0x1] %v5197_v7  ;;  %453 = vst [vmem:[#allocation2 + $0x1f1] sm:$0x1] %v5197_v7  ;;  %v5433_v60 = vmax.f32 %v348_v49, 0.0  ;;  %v277_v63 = vld [vmem:[%s5358_s13 + $0x40] sm:$0xff]  ;;  %v314_v4 = vmul.f32 %v5380_v31, %v275_v55  ;;  %v315_v5 = vmul.f32 %v5380_v31, %v276_v56  ;;  %v4640_v14 = vpack.c.bf16 %v582_v59, %v581_v58 }
  0x21   : > { %454 = vst [vmem:[#allocation2 + $0x211] sm:$0x1] %v5197_v7  ;;  %420 = vst [vmem:[#allocation2] sm:$0x1] %v5197_v7  ;;  %v1689_v0 = vld [vmem:[%s6640_s3 + $0x260] sm:$0xff]  ;;  %v1690_v1 = vld [vmem:[%s6640_s3 + $0x268] sm:$0xff]  ;;  %4635 = vmatpush3.bf16.msra.mxu1 %v4632_v34  ;;  %v352_v10 = vadd.f32 %v5385_v32, %v313_v62  ;;  %v316_v11 = vmul.f32 %v5380_v31, %v277_v63 }
  0x22   : > { %437 = vst [vmem:[#allocation2 + $0x220] sm:$0x1] %v5197_v7  ;;  %438 = vst [vmem:[#allocation2 + $0x11] sm:$0x1] %v5197_v7  ;;  %v5444_v2 = vmax.f32 %v349_v53, 0.0  ;;  %v5446_v3 = vmax.f32 %v350_v54, 0.0  ;;  %4763 = vmatpush3.bf16.msra.mxu0 %v5394_v37  ;;  %4637 = vmatprep.subr.bf16.mxu1 %v4636_v52  ;;  %v353_v15 = vadd.f32 %v5385_v32, %v314_v4 }
  0x23   : > { %455 = vst [vmem:[#allocation2 + $0x231] sm:$0x1] %v5197_v7  ;;  %6668 = vst [vmem:[#allocation3_spill] sm:$0xff] %v5368_v26  ;;  %v278_v6 = vld [vmem:[%s5358_s13 + $0x48] sm:$0xff]  ;;  %v5452_v9 = vmax.f32 %v351_v61, 0.0  ;;  %v279_v12 = vld [vmem:[%s5358_s13 + $0x50] sm:$0xff]  ;;  %v354_v16 = vadd.f32 %v5385_v32, %v315_v5  ;;  %4765 = vmatprep.subr.bf16.mxu0 %v5423_v57  ;;  %v5464_v19 = vpack.c.bf16 %v1690_v1, %v1689_v0 }
  0x24   : > { %6669 = vst [vmem:[#allocation4_spill] sm:$0xff] %v5394_v37  ;;  %6670 = vst [vmem:[#allocation5_spill] sm:$0xff] %v5423_v57  ;;  %v280_v17 = vld [vmem:[%s5358_s13 + $0x58] sm:$0xff]  ;;  %v583_v20 = vld [vmem:[%s6640_s3 + $0xf0] sm:$0xff]  ;;  %v5473_v22 = vmax.f32 %v352_v10, 0.0  ;;  %v355_v23 = vadd.f32 %v5385_v32, %v316_v11  ;;  %v317_v24 = vmul.f32 %v5380_v31, %v278_v6  ;;  %v5484_v29 = vmax.f32 %v353_v15, 0.0 }
  0x25   : > { %457 = vst [vmem:[#allocation2 + $0x21] sm:$0xff] %v5412_v48  ;;  %458 = vst [vmem:[#allocation2 + $0x29] sm:$0xff] %v5433_v60  ;;  %v584_v21 = vld [vmem:[%s6640_s3 + $0xf8] sm:$0xff]  ;;  %v281_v25 = vld [vmem:[%s5358_s13 + $0x60] sm:$0xff]  ;;  %v5486_v30 = vmax.f32 %v354_v16, 0.0  ;;  %v318_v33 = vmul.f32 %v5380_v31, %v279_v12  ;;  %v319_v34 = vmul.f32 %v5380_v31, %v280_v17  ;;  %4639 = vmatpush3.bf16.msra.mxu1 %v4636_v52 }
  0x26   : > { %459 = vst [vmem:[#allocation2 + $0x41] sm:$0xff] %v5444_v2  ;;  %460 = vst [vmem:[#allocation2 + $0x49] sm:$0xff] %v5446_v3  ;;  %v1691_v27 = vld [vmem:[%s6640_s3 + $0x270] sm:$0xff]  ;;  %v1692_v28 = vld [vmem:[%s6640_s3 + $0x278] sm:$0xff]  ;;  %v5492_v36 = vmax.f32 %v355_v23, 0.0  ;;  %v356_v38 = vadd.f32 %v5385_v32, %v317_v24  ;;  %v320_v39 = vmul.f32 %v5380_v31, %v281_v25  ;;  %4767 = vmatpush3.bf16.msra.mxu0 %v5423_v57  ;;  %4641 = vmatprep.subr.bf16.mxu1 %v4640_v14 }
  0x27   : > { %6671 = vst [vmem:[#allocation6_spill] sm:$0xff] %v5464_v19  ;;  %461 = vst [vmem:[#allocation2 + $0x61] sm:$0xff] %v5452_v9  ;;  %v282_v35 = vld [vmem:[%s5358_s13 + $0x68] sm:$0xff]  ;;  %v283_v40 = vld [vmem:[%s5358_s13 + $0x70] sm:$0xff]  ;;  %v4644_v42 = vpack.c.bf16 %v584_v21, %v583_v20  ;;  %v357_v45 = vadd.f32 %v5385_v32, %v318_v33  ;;  %v358_v46 = vadd.f32 %v5385_v32, %v319_v34  ;;  %4769 = vmatprep.subr.bf16.mxu0 %v5464_v19 }
  0x28   : > { %462 = vst [vmem:[#allocation2 + $0x69] sm:$0xff] %v5473_v22  ;;  %v284_v41 = vld [vmem:[%s5358_s13 + $0x78] sm:$0xff]  ;;  %v521_v43 = vld [vmem:[%s6640_s3] sm:$0xff]  ;;  %v522_v44 = vld [vmem:[%s6640_s3 + $0x8] sm:$0xff]  ;;  %v5510_v47 = vpack.c.bf16 %v1692_v28, %v1691_v27  ;;  %v5519_v51 = vmax.f32 %v356_v38, 0.0  ;;  %v359_v52 = vadd.f32 %v5385_v32, %v320_v39  ;;  %v321_v53 = vmul.f32 %v5380_v31, %v282_v35 }
  0x29   : > { %463 = vst [vmem:[#allocation2 + $0x81] sm:$0xff] %v5484_v29  ;;  %464 = vst [vmem:[#allocation2 + $0x89] sm:$0xff] %v5486_v30  ;;  %v1982_v49 = vld [vmem:[%s6640_s3 + $0x280] sm:$0xff]  ;;  %v1983_v50 = vld [vmem:[%s6640_s3 + $0x288] sm:$0xff]  ;;  %v5523_v54 = vmax.f32 %v357_v45, 0.0  ;;  %v5525_v55 = vmax.f32 %v358_v46, 0.0  ;;  %v322_v56 = vmul.f32 %v5380_v31, %v283_v40  ;;  %v323_v58 = vmul.f32 %v5380_v31, %v284_v41  ;;  %4643 = vmatpush3.bf16.msra.mxu1 %v4640_v14 }
  0x2a   : > { %6672 = vst [vmem:[#allocation7_spill] sm:$0xff] %v5510_v47  ;;  %465 = vst [vmem:[#allocation2 + $0xa1] sm:$0xff] %v5492_v36  ;;  %v285_v59 = vld [vmem:[%s5358_s13 + $0x80] sm:$0xff]  ;;  %v286_v61 = vld [vmem:[%s5358_s13 + $0x88] sm:$0xff]  ;;  %v4648_v62 = vpack.c.bf16 %v522_v44, %v521_v43  ;;  %v5538_v1 = vmax.f32 %v359_v52, 0.0  ;;  %v360_v4 = vadd.f32 %v5385_v32, %v321_v53  ;;  %4771 = vmatpush3.bf16.msra.mxu0 %v5464_v19  ;;  %4645 = vmatprep.subr.bf16.mxu1 %v4644_v42 }
  0x2b   : > { %v1984_v63 = vld [vmem:[%s6640_s3 + $0x290] sm:$0xff]  ;;  %v1985_v0 = vld [vmem:[%s6640_s3 + $0x298] sm:$0xff]  ;;  %466 = vst [vmem:[#allocation2 + $0xa9] sm:$0xff] %v5519_v51  ;;  %v4776_v6 = vpack.c.bf16 %v1983_v50, %v1982_v49  ;;  %467 = vst [vmem:[#allocation2 + $0xc1] sm:$0xff] %v5523_v54  ;;  %v361_v12 = vadd.f32 %v5385_v32, %v322_v56  ;;  %v362_v14 = vadd.f32 %v5385_v32, %v323_v58  ;;  %4773 = vmatprep.subr.bf16.mxu0 %v5510_v47 }
  0x2c   : > { %v287_v5 = vld [vmem:[%s5358_s13 + $0x90] sm:$0xff]  ;;  %v524_v11 = vld [vmem:[%s6640_s3 + $0x18] sm:$0xff]  ;;  %468 = vst [vmem:[#allocation2 + $0xc9] sm:$0xff] %v5525_v55  ;;  %469 = vst [vmem:[#allocation2 + $0xe1] sm:$0xff] %v5538_v1  ;;  %v5556_v16 = vmax.f32 %v360_v4, 0.0  ;;  %v324_v17 = vmul.f32 %v5380_v31, %v285_v59  ;;  %v325_v20 = vmul.f32 %v5380_v31, %v286_v61  ;;  %v5562_v24 = vpack.c.bf16 %v1985_v0, %v1984_v63 }
  0x2d   : > { %v523_v10 = vld [vmem:[%s6640_s3 + $0x10] sm:$0xff]  ;;  %v288_v15 = vld [vmem:[%s5358_s13 + $0x98] sm:$0xff]  ;;  %v326_v21 = vmul.f32 %v5380_v31, %v287_v5  ;;  %v289_v23 = vld [vmem:[%s5358_s13 + $0xa0] sm:$0xff]  ;;  %v5564_v25 = vmax.f32 %v361_v12, 0.0  ;;  %v5566_v27 = vmax.f32 %v362_v14, 0.0  ;;  %4647 = vmatpush3.bf16.msra.mxu1 %v4644_v42 }
  0x2e   : > { %v327_v28 = vmul.f32 %v5380_v31, %v288_v15  ;;  %v290_v33 = vld [vmem:[%s5358_s13 + $0xa8] sm:$0xff]  ;;  %v5570_v35 = vpack.c.bf16 %v524_v11, %v523_v10  ;;  %470 = vst [vmem:[#allocation2 + $0xe9] sm:$0xff] %v5556_v16  ;;  %v5574_v38 = vadd.f32 %v5385_v32, %v324_v17  ;;  %v5577_v39 = vadd.f32 %v5385_v32, %v325_v20  ;;  %v291_v41 = vld [vmem:[%s5358_s13 + $0xb0] sm:$0xff]  ;;  %v1986_v42 = vld [vmem:[%s6640_s3 + $0x2a0] sm:$0xff] }
  0x2f   : > { %v538_v34 = vld [vmem:[#allocation2 + $0x9] sm:$0xff]  ;;  %v5580_v40 = vadd.f32 %v5385_v32, %v326_v21  ;;  %4775 = vmatpush3.bf16.msra.mxu0 %v5510_v47  ;;  %4649 = vmatprep.subr.bf16.mxu1 %v4648_v62  ;;  %471 = vst [vmem:[#allocation2 + $0x101] sm:$0xff] %v5564_v25  ;;  %472 = vst [vmem:[#allocation2 + $0x109] sm:$0xff] %v5566_v27  ;;  %v328_v45 = vmul.f32 %v5380_v31, %v289_v23  ;;  %v292_v49 = vld [vmem:[%s5358_s13 + $0xb8] sm:$0xff] }
  0x30   : > { %v1987_v43 = vld [vmem:[%s6640_s3 + $0x2a8] sm:$0xff]  ;;  %v5593_v44 = vadd.f32 %v5385_v32, %v327_v28  ;;  %v329_v46 = vmul.f32 %v5380_v31, %v290_v33  ;;  %4777 = vmatprep.subr.bf16.mxu0 %v4776_v6  ;;  %v395_v50 = vmax.f32 %v5574_v38, 0.0  ;;  %v396_v52 = vmax.f32 %v5577_v39, 0.0  ;;  %v293_v58 = vld [vmem:[%s5358_s13 + $0xc0] sm:$0xff]  ;;  %3929 = vmatmul.mubr.f32.vlgmr.msra.gmra.mrb[0].mxu1 %v538_v34  ;;  %v295_v12 = vld [vmem:[%s5358_s13 + $0xd0] sm:$0xff] }
  0x31   : > { %v397_v53 = vmax.f32 %v5580_v40, 0.0  ;;  %v330_v56 = vmul.f32 %v5380_v31, %v291_v41  ;;  %v5605_v61 = vadd.f32 %v5385_v32, %v328_v45  ;;  %v331_v0 = vmul.f32 %v5380_v31, %v292_v49  ;;  %v294_v4 = vld [vmem:[%s5358_s13 + $0xc8] sm:$0xff]  ;;  %4651 = vmatpush3.bf16.msra.mxu1 %v4648_v62  ;;  %v525_v10 = vld [vmem:[%s6640_s3 + $0x20] sm:$0xff]  ;;  %3931 = vmatprep.mubr.f32.mxu1 %v5412_v48  ;;  %v296_v21 = vld [vmem:[%s5358_s13 + $0xd8] sm:$0xff] }
  0x32   : > { %v398_v59 = vmax.f32 %v5593_v44, 0.0  ;;  %v5608_v63 = vadd.f32 %v5385_v32, %v329_v46  ;;  %4249 = vmatmul.mubr.f32.vlgmr.msra.gmra.mrb[0].mxu0 %v5433_v60  ;;  %v5613_v5 = vpack.c.bf16 %v1987_v43, %v1986_v42  ;;  %v526_v11 = vld [vmem:[%s6640_s3 + $0x28] sm:$0xff]  ;;  %473 = vst [vmem:[#allocation2 + $0x121] sm:$0xff] %v395_v50  ;;  %474 = vst [vmem:[#allocation2 + $0x129] sm:$0xff] %v396_v52  ;;  %v297_v33 = vld [vmem:[%s5358_s13 + $0xe0] sm:$0xff]  ;;  %4653 = vmatprep.subr.bf16.mxu1 %v5570_v35 }
  0x33   : > { %475 = vst [vmem:[#allocation2 + $0x141] sm:$0xff] %v397_v53  ;;  %v5628_v62 = vadd.f32 %v5385_v32, %v330_v56  ;;  %4779 = vmatpush3.bf16.msra.mxu0 %v4776_v6  ;;  %v399_v14 = vmax.f32 %v5605_v61, 0.0  ;;  %v5637_v17 = vadd.f32 %v5385_v32, %v331_v0  ;;  %v332_v20 = vmul.f32 %v5380_v31, %v293_v58  ;;  %v1988_v34 = vld [vmem:[%s6640_s3 + $0x2b0] sm:$0xff]  ;;  %v1989_v41 = vld [vmem:[%s6640_s3 + $0x2b8] sm:$0xff]  ;;  %v298_v45 = vld [vmem:[%s5358_s13 + $0xe8] sm:$0xff] }
  0x34   : > { %476 = vst [vmem:[#allocation2 + $0x149] sm:$0xff] %v398_v59  ;;  %v400_v15 = vmax.f32 %v5608_v63, 0.0  ;;  %4251 = vmatprep.mubr.f32.mxu0 %v5444_v2  ;;  %4781 = vmatprep.subr.bf16.mxu0 %v5562_v24  ;;  %v333_v6 = vmul.f32 %v5380_v31, %v294_v4  ;;  %v334_v23 = vmul.f32 %v5380_v31, %v295_v12  ;;  %v527_v46 = vld [vmem:[%s6640_s3 + $0x30] sm:$0xff]  ;;  %v528_v49 = vld [vmem:[%s6640_s3 + $0x38] sm:$0xff]  ;;  %v5861_v39 = vld [vmem:[#allocation2 + $0x82] sm:$0xff] }
  0x35   : > { %v401_v48 = vmax.f32 %v5628_v62, 0.0  ;;  %v335_v28 = vmul.f32 %v5380_v31, %v296_v21  ;;  %3932 = vmatmul.mubr.f32.gmra.mrb[2].mxu1 %v5433_v60  ;;  %v4656_v42 = vpack.c.bf16 %v526_v11, %v525_v10  ;;  %477 = vst [vmem:[#allocation2 + $0x161] sm:$0xff] %v399_v14  ;;  %v402_v43 = vmax.f32 %v5637_v17, 0.0  ;;  %v1990_v21 = vld [vmem:[%s6640_s3 + $0x2c0] sm:$0xff]  ;;  %v2295_v38 = vld [vmem:[%s6640_s3 + $0x338] sm:$0xff]  ;;  %v2297_v40 = vld [vmem:[%s6640_s3 + $0x348] sm:$0xff] }
  0x36   : > { %478 = vst [vmem:[#allocation2 + $0x169] sm:$0xff] %v400_v15  ;;  %v5662_v60 = vadd.f32 %v5385_v32, %v332_v20  ;;  %4252 = vmatmul.mubr.f32.gmra.mrb[2].mxu0 %v5446_v3  ;;  %3934 = vmatprep.mubr.f32.mxu1 %v5444_v2  ;;  %v5676_v56 = vadd.f32 %v5385_v32, %v333_v6  ;;  %v1991_v6 = vld [vmem:[%s6640_s3 + $0x2c8] sm:$0xff]  ;;  %v2299_v61 = vld [vmem:[%s6640_s3 + $0x358] sm:$0xff] }
  0x37   : > { %479 = vst [vmem:[#allocation2 + $0x181] sm:$0xff] %v401_v48  ;;  %v5679_v58 = vadd.f32 %v5385_v32, %v334_v23  ;;  %v5682_v0 = vadd.f32 %v5385_v32, %v335_v28  ;;  %4783 = vmatpush3.bf16.msra.mxu0 %v5562_v24  ;;  %4254 = vmatprep.mubr.f32.mxu0 %v5452_v9  ;;  %480 = vst [vmem:[#allocation2 + $0x189] sm:$0xff] %v402_v43  ;;  %v5877_v44 = vld [vmem:[#allocation2 + $0xa2] sm:$0xff]  ;;  %v2596_v47 = vld [vmem:[%s6640_s3 + $0x398] sm:$0xff] }
  0x38   : > { %v403_v2 = vmax.f32 %v5662_v60, 0.0  ;;  %v336_v4 = vmul.f32 %v5380_v31, %v297_v33  ;;  %v337_v10 = vmul.f32 %v5380_v31, %v298_v45  ;;  %4785 = vmatprep.subr.bf16.mxu0 %v5613_v5  ;;  %4655 = vmatpush3.bf16.msra.mxu1 %v5570_v35  ;;  %v4788_v11 = vpack.c.bf16 %v1989_v41, %v1988_v34  ;;  %v530_v33 = vld [vmem:[%s6640_s3 + $0x48] sm:$0xff]  ;;  %v1992_v45 = vld [vmem:[%s6640_s3 + $0x2d0] sm:$0xff]  ;;  %v2303_v60 = vld [vmem:[%s6640_s3 + $0x378] sm:$0xff] }
  0x39   : > { %v404_v12 = vmax.f32 %v5676_v56, 0.0  ;;  %v405_v24 = vmax.f32 %v5679_v58, 0.0  ;;  %v406_v20 = vmax.f32 %v5682_v0, 0.0  ;;  %3935 = vmatmul.mubr.f32.gmra.mrb[4].mxu1 %v5446_v3  ;;  %4657 = vmatprep.subr.bf16.mxu1 %v4656_v42  ;;  %v4660_v23 = vpack.c.bf16 %v528_v49, %v527_v46  ;;  %v529_v3 = vld [vmem:[%s6640_s3 + $0x40] sm:$0xff]  ;;  %v1993_v46 = vld [vmem:[%s6640_s3 + $0x2d8] sm:$0xff]  ;;  %v2301_v62 = vld [vmem:[%s6640_s3 + $0x368] sm:$0xff] }
  0x3a   : > { %481 = vst [vmem:[#allocation2 + $0x1a1] sm:$0xff] %v403_v2  ;;  %v5706_v35 = vadd.f32 %v5385_v32, %v336_v4  ;;  %v5709_v28 = vadd.f32 %v5385_v32, %v337_v10  ;;  %4255 = vmatmul.mubr.f32.gmra.mrb[4].mxu0 %v5473_v22  ;;  %3937 = vmatprep.mubr.f32.mxu1 %v5452_v9  ;;  %v1995_v4 = vld [vmem:[%s6640_s3 + $0x2e8] sm:$0xff]  ;;  %v2600_v19 = vld [vmem:[%s6640_s3 + $0x3b8] sm:$0xff] }
  0x3b   : > { %482 = vst [vmem:[#allocation2 + $0x1a9] sm:$0xff] %v404_v12  ;;  %483 = vst [vmem:[#allocation2 + $0x1c1] sm:$0xff] %v405_v24  ;;  %4787 = vmatpush3.bf16.msra.mxu0 %v5613_v5  ;;  %4257 = vmatprep.mubr.f32.mxu0 %v5484_v29  ;;  %v4792_v41 = vpack.c.bf16 %v1991_v6, %v1990_v21  ;;  %v4664_v5 = vpack.c.bf16 %v530_v33, %v529_v3  ;;  %v1996_v6 = vld [vmem:[%s6640_s3 + $0x2f0] sm:$0xff]  ;;  %v300_v33 = vld [vmem:[%s5358_s13 + $0xf8] sm:$0xff] }
  0x3c   : > { %484 = vst [vmem:[#allocation2 + $0x1c9] sm:$0xff] %v406_v20  ;;  %v407_v9 = vmax.f32 %v5706_v35, 0.0  ;;  %v408_v34 = vmax.f32 %v5709_v28, 0.0  ;;  %4789 = vmatprep.subr.bf16.mxu0 %v4788_v11  ;;  %4659 = vmatpush3.bf16.msra.mxu1 %v4656_v42  ;;  %v532_v42 = vld [vmem:[%s6640_s3 + $0x58] sm:$0xff]  ;;  %v4796_v49 = vpack.c.bf16 %v1993_v46, %v1992_v45  ;;  %v299_v3 = vld [vmem:[%s5358_s13 + $0xf0] sm:$0xff]  ;;  %v339_v46 = vmul.f32 %v5380_v31, %v300_v33  ;;  %v5893_v63 = vld [vmem:[#allocation2 + $0xc2] sm:$0xff] }
  0x3d   : > { %3938 = vmatmul.mubr.f32.gmra.mrb[6].mxu1 %v5473_v22  ;;  %4661 = vmatprep.subr.bf16.mxu1 %v4660_v23  ;;  %v531_v22 = vld [vmem:[%s6640_s3 + $0x50] sm:$0xff]  ;;  %v338_v45 = vmul.f32 %v5380_v31, %v299_v3  ;;  %v2289_v31 = vld [vmem:[%s6640_s3 + $0x308] sm:$0xff]  ;;  %v1070_v35 = vld [vmem:[%s6640_s3 + $0x118] sm:$0xff] }
  0x3e   : > { %485 = vst [vmem:[#allocation2 + $0x1e1] sm:$0xff] %v407_v9  ;;  %486 = vst [vmem:[#allocation2 + $0x1e9] sm:$0xff] %v408_v34  ;;  %4258 = vmatmul.mubr.f32.gmra.mrb[6].mxu0 %v5486_v30  ;;  %3940 = vmatprep.mubr.f32.mxu1 %v5484_v29  ;;  %v1994_v29 = vld [vmem:[%s6640_s3 + $0x2e0] sm:$0xff]  ;;  %v4668_v10 = vpack.c.bf16 %v532_v42, %v531_v22  ;;  %v5789_v22 = vadd.f32 %v5385_v32, %v339_v46  ;;  %v5843_v3 = vld [vmem:[#allocation2 + $0x4a] sm:$0xff] }
  0x3f   : > { %4791 = vmatpush3.bf16.msra.mxu0 %v4788_v11  ;;  %4260 = vmatprep.mubr.f32.mxu0 %v5492_v36  ;;  %v534_v11 = vld [vmem:[%s6640_s3 + $0x68] sm:$0xff]  ;;  %v4800_v21 = vpack.c.bf16 %v1995_v4, %v1994_v29  ;;  %v2288_v42 = vld [vmem:[%s6640_s3 + $0x300] sm:$0xff] }
  0x40   : > { %4793 = vmatprep.subr.bf16.mxu0 %v4792_v41  ;;  %4663 = vmatpush3.bf16.msra.mxu1 %v4660_v23  ;;  %6674 = vst [vmem:[#allocation9_spill] sm:$0xff] %v5789_v22  ;;  %v6644_v4 = vmax.f32 %v5789_v22, 0.0  ;;  %v2300_v46 = vld [vmem:[%s6640_s3 + $0x360] sm:$0xff]  ;;  %v2594_v58 = vld [vmem:[%s6640_s3 + $0x388] sm:$0xff] }
  0x41   : > { %3941 = vmatmul.mubr.f32.gmra.mrb[8].mxu1 %v5486_v30  ;;  %4665 = vmatprep.subr.bf16.mxu1 %v4664_v5  ;;  %v533_v30 = vld [vmem:[%s6640_s3 + $0x60] sm:$0xff]  ;;  %v6107_v22 = vld [vmem:[#allocation2 + $0x128] sm:$0xff] }
  0x42   : > { %4261 = vmatmul.mubr.f32.gmra.mrb[8].mxu0 %v5519_v51  ;;  %3943 = vmatprep.mubr.f32.mxu1 %v5492_v36  ;;  %v1997_v36 = vld [vmem:[%s6640_s3 + $0x2f8] sm:$0xff]  ;;  %v4672_v23 = vpack.c.bf16 %v534_v11, %v533_v30  ;;  %v4808_v30 = vpack.c.bf16 %v2289_v31, %v2288_v42  ;;  %488 = vst [vmem:[#allocation2 + $0x209] sm:$0xff] %v6644_v4  ;;  %v5909_v17 = vld [vmem:[#allocation2 + $0xe2] sm:$0xff]  ;;  %v1036_v26 = vld [vmem:[#allocation2 + $0xa] sm:$0xff] }
  0x43   : > { %4795 = vmatpush3.bf16.msra.mxu0 %v4792_v41  ;;  %4263 = vmatprep.mubr.f32.mxu0 %v5523_v54  ;;  %v535_v41 = vld [vmem:[%s6640_s3 + $0x70] sm:$0xff]  ;;  %v2291_v11 = vld [vmem:[%s6640_s3 + $0x318] sm:$0xff]  ;;  %v5925_v56 = vld [vmem:[#allocation2 + $0x102] sm:$0xff] }
  0x44   : > { %4797 = vmatprep.subr.bf16.mxu0 %v4796_v49  ;;  %4667 = vmatpush3.bf16.msra.mxu1 %v4664_v5  ;;  %v4804_v5 = vpack.c.bf16 %v1997_v36, %v1996_v6  ;;  %v5827_v6 = vld [vmem:[#allocation2 + $0x2a] sm:$0xff]  ;;  %v2593_v42 = vld [vmem:[%s6640_s3 + $0x380] sm:$0xff] }
  0x45   : > { %3944 = vmatmul.mubr.f32.gmra.mrb[10].mxu1 %v5519_v51  ;;  %4669 = vmatprep.subr.bf16.mxu1 %v4668_v10  ;;  %v536_v51 = vld [vmem:[%s6640_s3 + $0x78] sm:$0xff]  ;;  %v489_v31 = vld [vmem:[#allocation2] sm:$0xff]  ;;  %v6078_v4 = vld [vmem:[#allocation2 + $0xe8] sm:$0xff] }
  0x46   : > { %4264 = vmatmul.mubr.f32.gmra.mrb[10].mxu0 %v5525_v55  ;;  %3946 = vmatprep.mubr.f32.mxu1 %v5523_v54  ;;  %v5786_v54 = vadd.f32 %v5385_v32, %v338_v45  ;;  %v1067_v32 = vld [vmem:[%s6640_s3 + $0x100] sm:$0xff]  ;;  %v2298_v45 = vld [vmem:[%s6640_s3 + $0x350] sm:$0xff]  ;;  %6681 = vst [vmem:[#allocation16_spill] sm:$0xff] %v6078_v4  ;;  %v2602_v57 = vld [vmem:[%s6640_s3 + $0x3c8] sm:$0xff] }
  0x47   : > { %4799 = vmatpush3.bf16.msra.mxu0 %v4796_v49  ;;  %4266 = vmatprep.mubr.f32.mxu0 %v5538_v1  ;;  %v4676_v49 = vpack.c.bf16 %v536_v51, %v535_v41  ;;  %v2294_v41 = vld [vmem:[%s6640_s3 + $0x330] sm:$0xff]  ;;  %v2296_v51 = vld [vmem:[%s6640_s3 + $0x340] sm:$0xff]  ;;  %v6136_v37 = vld [vmem:[#allocation2 + $0x168] sm:$0xff] }
  0x48   : > { %4801 = vmatprep.subr.bf16.mxu0 %v4800_v21  ;;  %4671 = vmatpush3.bf16.msra.mxu1 %v4668_v10  ;;  %6673 = vst [vmem:[#allocation8_spill] sm:$0xff] %v5786_v54  ;;  %v6645_v29 = vmax.f32 %v5786_v54, 0.0  ;;  %v5809_v10 = vld [vmem:[#allocation2 + $0x22] sm:$0xff] }
  0x49   : > { %3947 = vmatmul.mubr.f32.gmra.mrb[12].mxu1 %v5525_v55  ;;  %4673 = vmatprep.subr.bf16.mxu1 %v4672_v23  ;;  %v1068_v55 = vld [vmem:[%s6640_s3 + $0x108] sm:$0xff]  ;;  %v2601_v54 = vld [vmem:[%s6640_s3 + $0x3c0] sm:$0xff] }
  0x4a   : > { %4267 = vmatmul.mubr.f32.gmra.mrb[12].mxu0 %v5556_v16  ;;  %3949 = vmatprep.mubr.f32.mxu1 %v5538_v1  ;;  %487 = vst [vmem:[#allocation2 + $0x201] sm:$0xff] %v6645_v29  ;;  %v2290_v1 = vld [vmem:[%s6640_s3 + $0x310] sm:$0xff]  ;;  %v5941_v0 = vld [vmem:[#allocation2 + $0x122] sm:$0xff] }
  0x4b   : > { %4803 = vmatpush3.bf16.msra.mxu0 %v4800_v21  ;;  %4269 = vmatprep.mubr.f32.mxu0 %v5564_v25  ;;  %v5822_v21 = vpack.c.bf16 %v1068_v55, %v1067_v32  ;;  %v4812_v36 = vpack.c.bf16 %v2291_v11, %v2290_v1  ;;  %v5957_v32 = vld [vmem:[#allocation2 + $0x20] sm:$0xff]  ;;  %v5971_v1 = vld [vmem:[#allocation2 + $0x28] sm:$0xff] }
  0x4c   : > { %4805 = vmatprep.subr.bf16.mxu0 %v4804_v5  ;;  %4675 = vmatpush3.bf16.msra.mxu1 %v4672_v23  ;;  %v2292_v23 = vld [vmem:[%s6640_s3 + $0x320] sm:$0xff]  ;;  %v5975_v11 = vld [vmem:[#allocation2 + $0x14a] sm:$0xff] }
  0x4d   : > { %3950 = vmatmul.mubr.f32.gmra.mrb[14].mxu1 %v5556_v16  ;;  %4677 = vmatprep.subr.bf16.mxu1 %v4676_v49  ;;  %v5829_v16 = vld [vmem:[#allocation2 + $0x42] sm:$0xff] }
  0x4e   : > { %4270 = vmatmul.mubr.f32.gmra.mrb[14].mxu0 %v5566_v27  ;;  %3952 = vmatprep.mubr.f32.mxu1 %v5564_v25  ;;  %v2293_v25 = vld [vmem:[%s6640_s3 + $0x328] sm:$0xff]  ;;  %v1071_v55 = vld [vmem:[%s6640_s3 + $0x120] sm:$0xff] }
  0x4f   : > { %4807 = vmatpush3.bf16.msra.mxu0 %v4804_v5  ;;  %4328 = vmatprep.mubr.f32.mxu0 %v5809_v10  ;;  %v4816_v33 = vpack.c.bf16 %v2293_v25, %v2292_v23  ;;  %v2302_v5 = vld [vmem:[%s6640_s3 + $0x370] sm:$0xff]  ;;  %v5959_v28 = vld [vmem:[#allocation2 + $0x142] sm:$0xff]  ;;  %v1074_v25 = vld [vmem:[%s6640_s3 + $0x138] sm:$0xff] }
  0x50   : > { %4809 = vmatprep.subr.bf16.mxu0 %v4808_v30  ;;  %4679 = vmatpush3.bf16.msra.mxu1 %v4676_v49  ;;  %v1069_v49 = vld [vmem:[%s6640_s3 + $0x110] sm:$0xff]  ;;  %v6080_v29 = vld [vmem:[#allocation2 + $0x100] sm:$0xff] }
  0x51   : > { %3953 = vmatmul.mubr.f32.gmra.mrb[16].mxu1 %v5566_v27  ;;  %4681 = vmatprep.subr.bf16.mxu1 %v5822_v21  ;;  %v5845_v27 = vld [vmem:[#allocation2 + $0x62] sm:$0xff]  ;;  %6682 = vst [vmem:[#allocation17_spill] sm:$0xff] %v6080_v29 }
  0x52   : > { %4329 = vmatmul.mubr.f32.vlgmr.msra.gmra.mrb[0].mxu0 %v5827_v6  ;;  %3955 = vmatprep.mubr.f32.mxu1 %v395_v50  ;;  %v5859_v50 = vld [vmem:[#allocation2 + $0x6a] sm:$0xff] }
  0x53   : > { %4811 = vmatpush3.bf16.msra.mxu0 %v4808_v30  ;;  %4331 = vmatprep.mubr.f32.mxu0 %v5829_v16  ;;  %v1072_v30 = vld [vmem:[%s6640_s3 + $0x128] sm:$0xff] }
  0x54   : > { %4813 = vmatprep.subr.bf16.mxu0 %v4812_v36  ;;  %v4688_v23 = vpack.c.bf16 %v1072_v30, %v1071_v55  ;;  %v6047_v55 = vld [vmem:[#allocation2 + $0x1ca] sm:$0xff]  ;;  %v6049_v30 = vld [vmem:[#allocation2 + $0xc0] sm:$0xff] }
  0x55   : > { %3956 = vmatmul.mubr.f32.gmra.mrb[18].mxu1 %v396_v52  ;;  %v4820_v52 = vpack.c.bf16 %v2295_v38, %v2294_v41  ;;  %v5993_v41 = vld [vmem:[#allocation2 + $0x16a] sm:$0xff]  ;;  %v5995_v38 = vld [vmem:[#allocation2 + $0x60] sm:$0xff]  ;;  %6678 = vst [vmem:[#allocation13_spill] sm:$0xff] %v6049_v30 }
  0x56   : > { %4332 = vmatmul.mubr.f32.gmra.mrb[2].mxu0 %v5843_v3  ;;  %3958 = vmatprep.mubr.f32.mxu1 %v397_v53  ;;  %v5875_v53 = vld [vmem:[#allocation2 + $0x8a] sm:$0xff] }
  0x57   : > { %4334 = vmatprep.mubr.f32.mxu0 %v5845_v27  ;;  %4815 = vmatpush3.bf16.msra.mxu0 %v4812_v36  ;;  %v5979_v36 = vld [vmem:[#allocation2 + $0x162] sm:$0xff] }
  0x58   : > { %4817 = vmatprep.subr.bf16.mxu0 %v4816_v33 }
  0x59   : > { %3959 = vmatmul.mubr.f32.gmra.mrb[20].mxu1 %v398_v59  ;;  %v4824_v59 = vpack.c.bf16 %v2297_v40, %v2296_v51  ;;  %v1075_v40 = vld [vmem:[%s6640_s3 + $0x140] sm:$0xff] }
  0x5a   : > { %4335 = vmatmul.mubr.f32.gmra.mrb[4].mxu0 %v5859_v50  ;;  %3961 = vmatprep.mubr.f32.mxu1 %v399_v14  ;;  %v5891_v14 = vld [vmem:[#allocation2 + $0xaa] sm:$0xff] }
  0x5b   : > { %4337 = vmatprep.mubr.f32.mxu0 %v5861_v39  ;;  %4819 = vmatpush3.bf16.msra.mxu0 %v4816_v33  ;;  %v5990_v33 = vld [vmem:[#allocation2 + $0x48] sm:$0xff] }
  0x5c   : > { %4821 = vmatprep.subr.bf16.mxu0 %v4820_v52 }
  0x5d   : > { %3962 = vmatmul.mubr.f32.gmra.mrb[22].mxu1 %v400_v15  ;;  %v4828_v15 = vpack.c.bf16 %v2299_v61, %v2298_v45  ;;  %v6008_v45 = vld [vmem:[#allocation2 + $0x68] sm:$0xff] }
  0x5e   : > { %4338 = vmatmul.mubr.f32.gmra.mrb[6].mxu0 %v5875_v53  ;;  %3964 = vmatprep.mubr.f32.mxu1 %v401_v48  ;;  %v5907_v48 = vld [vmem:[#allocation2 + $0xca] sm:$0xff] }
  0x5f   : > { %4340 = vmatprep.mubr.f32.mxu0 %v5877_v44  ;;  %4823 = vmatpush3.bf16.msra.mxu0 %v4820_v52  ;;  %v5997_v52 = vld [vmem:[#allocation2 + $0x182] sm:$0xff]  ;;  %v6011_v61 = vld [vmem:[#allocation2 + $0x18a] sm:$0xff] }
  0x60   : > { %4825 = vmatprep.subr.bf16.mxu0 %v4824_v59 }
  0x61   : > { %3965 = vmatmul.mubr.f32.gmra.mrb[24].mxu1 %v402_v43  ;;  %v4832_v43 = vpack.c.bf16 %v2301_v62, %v2300_v46  ;;  %v6015_v46 = vld [vmem:[#allocation2 + $0x1a2] sm:$0xff] }
  0x62   : > { %4341 = vmatmul.mubr.f32.gmra.mrb[8].mxu0 %v5891_v14  ;;  %3967 = vmatprep.mubr.f32.mxu1 %v403_v2  ;;  %v5923_v2 = vld [vmem:[#allocation2 + $0xea] sm:$0xff] }
  0x63   : > { %4343 = vmatprep.mubr.f32.mxu0 %v5893_v63  ;;  %4827 = vmatpush3.bf16.msra.mxu0 %v4824_v59  ;;  %v1076_v59 = vld [vmem:[%s6640_s3 + $0x148] sm:$0xff] }
  0x64   : > { %4829 = vmatprep.subr.bf16.mxu0 %v4828_v15  ;;  %v4696_v62 = vpack.c.bf16 %v1076_v59, %v1075_v40  ;;  %v6062_v40 = vld [vmem:[#allocation2 + $0xc8] sm:$0xff] }
  0x65   : > { %3968 = vmatmul.mubr.f32.gmra.mrb[26].mxu1 %v404_v12  ;;  %v4836_v12 = vpack.c.bf16 %v2303_v60, %v2302_v5  ;;  %v1078_v5 = vld [vmem:[%s6640_s3 + $0x158] sm:$0xff]  ;;  %v6026_v60 = vld [vmem:[#allocation2 + $0x88] sm:$0xff]  ;;  %6679 = vst [vmem:[#allocation14_spill] sm:$0xff] %v6062_v40 }
  0x66   : > { %4344 = vmatmul.mubr.f32.gmra.mrb[10].mxu0 %v5907_v48  ;;  %3970 = vmatprep.mubr.f32.mxu1 %v405_v24  ;;  %v5939_v24 = vld [vmem:[#allocation2 + $0x10a] sm:$0xff]  ;;  %6675 = vst [vmem:[#allocation10_spill] sm:$0xff] %v6026_v60 }
  0x67   : > { %4346 = vmatprep.mubr.f32.mxu0 %v5909_v17  ;;  %4831 = vmatpush3.bf16.msra.mxu0 %v4828_v15  ;;  %v6013_v15 = vld [vmem:[#allocation2 + $0x80] sm:$0xff]  ;;  %v6065_v59 = vld [vmem:[#allocation2 + $0x1ea] sm:$0xff] }
  0x68   : > { %4833 = vmatprep.subr.bf16.mxu0 %v4832_v43 }
  0x69   : > { %3971 = vmatmul.mubr.f32.gmra.mrb[28].mxu1 %v406_v20  ;;  %v5943_v20 = vpack.c.bf16 %v2594_v58, %v2593_v42  ;;  %v6031_v42 = vld [vmem:[#allocation2 + $0xa0] sm:$0xff] }
  0x6a   : > { %4347 = vmatmul.mubr.f32.gmra.mrb[12].mxu0 %v5923_v2  ;;  %3973 = vmatprep.mubr.f32.mxu1 %v407_v9  ;;  %v5955_v9 = vld [vmem:[#allocation2 + $0x12a] sm:$0xff]  ;;  %6676 = vst [vmem:[#allocation11_spill] sm:$0xff] %v6031_v42  ;;  %v6033_v58 = vld [vmem:[#allocation2 + $0x1c2] sm:$0xff] }
  0x6b   : > { %4349 = vmatprep.mubr.f32.mxu0 %v5925_v56  ;;  %4835 = vmatpush3.bf16.msra.mxu0 %v4832_v43  ;;  %v1077_v43 = vld [vmem:[%s6640_s3 + $0x150] sm:$0xff] }
  0x6c   : > { %4837 = vmatprep.subr.bf16.mxu0 %v4836_v12 }
  0x6d   : > { %3974 = vmatmul.mubr.f32.gmra.mrb[30].mxu1 %v408_v34  ;;  %v4684_v34 = vpack.c.bf16 %v1070_v35, %v1069_v49  ;;  %v1079_v49 = vld [vmem:[%s6640_s3 + $0x160] sm:$0xff]  ;;  %v1080_v35 = vld [vmem:[%s6640_s3 + $0x168] sm:$0xff] }
  0x6e   : > { %4350 = vmatmul.mubr.f32.gmra.mrb[14].mxu0 %v5939_v24  ;;  %4008 = vmatprep.mubr.f32.mxu1 %v489_v31  ;;  %v4700_v31 = vpack.c.bf16 %v1078_v5, %v1077_v43  ;;  %v1980_v43 = vld [vmem:[#allocation2 + $0x202] sm:$0xff] }
  0x6f   : > { %4352 = vmatprep.mubr.f32.mxu0 %v5941_v0  ;;  %4839 = vmatpush3.bf16.msra.mxu0 %v4836_v12  ;;  %v6029_v12 = vld [vmem:[#allocation2 + $0x1aa] sm:$0xff] }
  0x70   : > { %4841 = vmatprep.subr.bf16.mxu0 %v5943_v20 }
  0x71   : > { %4009 = vmatmul.mubr.f32.vlgmr.msra.gmra.mrb[0].mxu1 %v5197_v7  ;;  %v5977_v7 = vld [vmem:[#allocation2 + $0x40] sm:$0xff] }
  0x72   : > { %4353 = vmatmul.mubr.f32.gmra.mrb[16].mxu0 %v5955_v9  ;;  %4683 = vmatpush3.bf16.msra.mxu1 %v5822_v21  ;;  %v1073_v21 = vld [vmem:[%s6640_s3 + $0x130] sm:$0xff] }
  0x73   : > { %4011 = vmatprep.mubr.f32.mxu1 %v5957_v32  ;;  %4355 = vmatprep.mubr.f32.mxu0 %v5959_v28  ;;  %v4692_v51 = vpack.c.bf16 %v1074_v25, %v1073_v21  ;;  %v4704_v21 = vpack.c.bf16 %v1080_v35, %v1079_v49  ;;  %v1081_v25 = vld [vmem:[%s6640_s3 + $0x170] sm:$0xff]  ;;  %v1372_v49 = vld [vmem:[%s6640_s3 + $0x180] sm:$0xff]  ;;  %v1373_v35 = vld [vmem:[%s6640_s3 + $0x188] sm:$0xff] }
  0x74   : > { %4685 = vmatprep.subr.bf16.mxu1 %v4684_v34 }
  0x75   : > { %4012 = vmatmul.mubr.f32.gmra.mrb[2].mxu1 %v5971_v1 }
  0x76   : > { %4356 = vmatmul.mubr.f32.gmra.mrb[18].mxu0 %v5975_v11  ;;  %4014 = vmatprep.mubr.f32.mxu1 %v5977_v7 }
  0x77   : > { %4358 = vmatprep.mubr.f32.mxu0 %v5979_v36  ;;  %4687 = vmatpush3.bf16.msra.mxu1 %v4684_v34  ;;  %v6044_v34 = vld [vmem:[#allocation2 + $0xa8] sm:$0xff] }
  0x78   : > { %4689 = vmatprep.subr.bf16.mxu1 %v4688_v23  ;;  %6677 = vst [vmem:[#allocation12_spill] sm:$0xff] %v6044_v34 }
  0x79   : > { %4015 = vmatmul.mubr.f32.gmra.mrb[4].mxu1 %v5990_v33 }
  0x7a   : > { %4359 = vmatmul.mubr.f32.gmra.mrb[20].mxu0 %v5993_v41  ;;  %4017 = vmatprep.mubr.f32.mxu1 %v5995_v38 }
  0x7b   : > { %4361 = vmatprep.mubr.f32.mxu0 %v5997_v52  ;;  %4691 = vmatpush3.bf16.msra.mxu1 %v4688_v23  ;;  %v6051_v23 = vld [vmem:[#allocation2 + $0x1e2] sm:$0xff] }
  0x7c   : > { %4693 = vmatprep.subr.bf16.mxu1 %v4692_v51 }
  0x7d   : > { %4018 = vmatmul.mubr.f32.gmra.mrb[6].mxu1 %v6008_v45 }
  0x7e   : > { %4362 = vmatmul.mubr.f32.gmra.mrb[22].mxu0 %v6011_v61  ;;  %4020 = vmatprep.mubr.f32.mxu1 %v6013_v15 }
  0x7f   : > { %4364 = vmatprep.mubr.f32.mxu0 %v6015_v46  ;;  %4695 = vmatpush3.bf16.msra.mxu1 %v4692_v51  ;;  %v1082_v51 = vld [vmem:[%s6640_s3 + $0x178] sm:$0xff] }
  0x80   : > { %4697 = vmatprep.subr.bf16.mxu1 %v4696_v62  ;;  %v4708_v5 = vpack.c.bf16 %v1082_v51, %v1081_v25  ;;  %v6082_v25 = vpack.c.bf16 %v1373_v35, %v1372_v49  ;;  %v2595_v51 = vld [vmem:[%s6640_s3 + $0x390] sm:$0xff]  ;;  %v2597_v35 = vld [vmem:[%s6640_s3 + $0x3a0] sm:$0xff] }
  0x81   : > { %4021 = vmatmul.mubr.f32.gmra.mrb[8].mxu1 %v6026_v60  ;;  %v4844_v49 = vpack.c.bf16 %v2596_v47, %v2595_v51  ;;  %v6111_v47 = vld [vmem:[#allocation2 + $0x140] sm:$0xff]  ;;  %v2599_v51 = vld [vmem:[%s6640_s3 + $0x3b0] sm:$0xff] }
  0x82   : > { %4365 = vmatmul.mubr.f32.gmra.mrb[24].mxu0 %v6029_v12  ;;  %4023 = vmatprep.mubr.f32.mxu1 %v6031_v42 }
  0x83   : > { %4367 = vmatprep.mubr.f32.mxu0 %v6033_v58  ;;  %4699 = vmatpush3.bf16.msra.mxu1 %v4696_v62  ;;  %v6067_v62 = vld [vmem:[#allocation2 + $0xe0] sm:$0xff] }
  0x84   : > { %4701 = vmatprep.subr.bf16.mxu1 %v4700_v31  ;;  %6680 = vst [vmem:[#allocation15_spill] sm:$0xff] %v6067_v62 }
  0x85   : > { %4024 = vmatmul.mubr.f32.gmra.mrb[10].mxu1 %v6044_v34 }
  0x86   : > { %4368 = vmatmul.mubr.f32.gmra.mrb[26].mxu0 %v6047_v55  ;;  %4026 = vmatprep.mubr.f32.mxu1 %v6049_v30 }
  0x87   : > { %4370 = vmatprep.mubr.f32.mxu0 %v6051_v23  ;;  %4703 = vmatpush3.bf16.msra.mxu1 %v4700_v31  ;;  %v1981_v31 = vld [vmem:[#allocation2 + $0x20a] sm:$0xff] }
  0x88   : > { %4705 = vmatprep.subr.bf16.mxu1 %v4704_v21 }
  0x89   : > { %4027 = vmatmul.mubr.f32.gmra.mrb[12].mxu1 %v6062_v40 }
  0x8a   : > { %4371 = vmatmul.mubr.f32.gmra.mrb[28].mxu0 %v6065_v59  ;;  %4029 = vmatprep.mubr.f32.mxu1 %v6067_v62 }
  0x8b   : > { %4373 = vmatprep.mubr.f32.mxu0 %v1980_v43  ;;  %4707 = vmatpush3.bf16.msra.mxu1 %v4704_v21  ;;  %v6092_v43 = vld [vmem:[#allocation2 + $0x108] sm:$0xff]  ;;  %v6095_v21 = vld [vmem:[#allocation2 + $0x120] sm:$0xff] }
  0x8c   : > { %4709 = vmatprep.subr.bf16.mxu1 %v4708_v5  ;;  %6683 = vst [vmem:[#allocation18_spill] sm:$0xff] %v6092_v43 }
  0x8d   : > { %4030 = vmatmul.mubr.f32.gmra.mrb[14].mxu1 %v6078_v4 }
  0x8e   : > { %4374 = vmatmul.mubr.f32.gmra.mrb[30].mxu0 %v1981_v31  ;;  %4032 = vmatprep.mubr.f32.mxu1 %v6080_v29  ;;  %v2598_v31 = vld [vmem:[%s6640_s3 + $0x3a8] sm:$0xff] }
  0x8f   : > { %4408 = vmatprep.mubr.f32.mxu0 %v5977_v7  ;;  %4711 = vmatpush3.bf16.msra.mxu1 %v4708_v5  ;;  %v4848_v5 = vpack.c.bf16 %v2598_v31, %v2597_v35  ;;  %v6125_v35 = vld [vmem:[#allocation2 + $0x160] sm:$0xff]  ;;  %v4852_v31 = vpack.c.bf16 %v2600_v19, %v2599_v51  ;;  %v4856_v19 = vpack.c.bf16 %v2602_v57, %v2601_v54  ;;  %v2603_v51 = vld [vmem:[%s6640_s3 + $0x3d0] sm:$0xff] }
  0x90   : > { %4713 = vmatprep.subr.bf16.mxu1 %v6082_v25  ;;  %v2605_v54 = vld [vmem:[%s6640_s3 + $0x3e0] sm:$0xff] }
  0x91   : > { %4033 = vmatmul.mubr.f32.gmra.mrb[16].mxu1 %v6092_v43 }
  0x92   : > { %4409 = vmatmul.mubr.f32.vlgmr.msra.gmra.mrb[0].mxu0 %v5990_v33  ;;  %4035 = vmatprep.mubr.f32.mxu1 %v6095_v21 }
  0x93   : > { %4843 = vmatpush3.bf16.msra.mxu0 %v5943_v20  ;;  %4411 = vmatprep.mubr.f32.mxu0 %v5995_v38  ;;  %v6122_v20 = vld [vmem:[#allocation2 + $0x148] sm:$0xff] }
  0x94   : > { %4845 = vmatprep.subr.bf16.mxu0 %v4844_v49 }
  0x95   : > { %4036 = vmatmul.mubr.f32.gmra.mrb[18].mxu1 %v6107_v22 }
  0x96   : > { %4412 = vmatmul.mubr.f32.gmra.mrb[2].mxu0 %v6008_v45  ;;  %4038 = vmatprep.mubr.f32.mxu1 %v6111_v47 }
  0x97   : > { %4414 = vmatprep.mubr.f32.mxu0 %v6013_v15  ;;  %4847 = vmatpush3.bf16.msra.mxu0 %v4844_v49  ;;  %v6139_v49 = vld [vmem:[#allocation2 + $0x180] sm:$0xff] }
  0x98   : > { %4849 = vmatprep.subr.bf16.mxu0 %v4848_v5 }
  0x99   : > { %4039 = vmatmul.mubr.f32.gmra.mrb[20].mxu1 %v6122_v20 }
  0x9a   : > { %4415 = vmatmul.mubr.f32.gmra.mrb[4].mxu0 %v6026_v60  ;;  %4041 = vmatprep.mubr.f32.mxu1 %v6125_v35  ;;  %v2604_v60 = vld [vmem:[%s6640_s3 + $0x3d8] sm:$0xff] }
  0x9b   : > { %4417 = vmatprep.mubr.f32.mxu0 %v6031_v42  ;;  %4851 = vmatpush3.bf16.msra.mxu0 %v4848_v5  ;;  %v6150_v42 = vld [vmem:[#allocation2 + $0x188] sm:$0xff]  ;;  %v6153_v5 = vld [vmem:[#allocation2 + $0x1a0] sm:$0xff]  ;;  %v4860_v57 = vpack.c.bf16 %v2604_v60, %v2603_v51  ;;  %v2607_v51 = vld [vmem:[%s6640_s3 + $0x3f0] sm:$0xff] }
  0x9c   : > { %4853 = vmatprep.subr.bf16.mxu0 %v4852_v31 }
  0x9d   : > { %4042 = vmatmul.mubr.f32.gmra.mrb[22].mxu1 %v6136_v37 }
  0x9e   : > { %4418 = vmatmul.mubr.f32.gmra.mrb[6].mxu0 %v6044_v34  ;;  %4044 = vmatprep.mubr.f32.mxu1 %v6139_v49  ;;  %v2606_v34 = vld [vmem:[%s6640_s3 + $0x3e8] sm:$0xff] }
  0x9f   : > { %4420 = vmatprep.mubr.f32.mxu0 %v6049_v30  ;;  %4855 = vmatpush3.bf16.msra.mxu0 %v4852_v31  ;;  %v6164_v30 = vld [vmem:[#allocation2 + $0x1a8] sm:$0xff]  ;;  %v6167_v31 = vld [vmem:[#allocation2 + $0x1c0] sm:$0xff]  ;;  %v4864_v60 = vpack.c.bf16 %v2606_v34, %v2605_v54 }
  0xa0   : > { %4857 = vmatprep.subr.bf16.mxu0 %v4856_v19  ;;  %v2898_v54 = vld [vmem:[%s6640_s3 + $0x400] sm:$0xff] }
  0xa1   : > { %4045 = vmatmul.mubr.f32.gmra.mrb[24].mxu1 %v6150_v42 }
  0xa2   : > { %4421 = vmatmul.mubr.f32.gmra.mrb[8].mxu0 %v6062_v40  ;;  %4047 = vmatprep.mubr.f32.mxu1 %v6153_v5  ;;  %v2608_v40 = vld [vmem:[%s6640_s3 + $0x3f8] sm:$0xff] }
  0xa3   : > { %4423 = vmatprep.mubr.f32.mxu0 %v6067_v62  ;;  %4859 = vmatpush3.bf16.msra.mxu0 %v4856_v19  ;;  %v6178_v62 = vld [vmem:[#allocation2 + $0x1c8] sm:$0xff]  ;;  %v6181_v19 = vld [vmem:[#allocation2 + $0x1e0] sm:$0xff]  ;;  %v4868_v34 = vpack.c.bf16 %v2608_v40, %v2607_v51  ;;  %v1374_v51 = vld [vmem:[%s6640_s3 + $0x190] sm:$0xff] }
  0xa4   : > { %4861 = vmatprep.subr.bf16.mxu0 %v4860_v57 }
  0xa5   : > { %4048 = vmatmul.mubr.f32.gmra.mrb[26].mxu1 %v6164_v30 }
  0xa6   : > { %4424 = vmatmul.mubr.f32.gmra.mrb[10].mxu0 %v6078_v4  ;;  %4050 = vmatprep.mubr.f32.mxu1 %v6167_v31  ;;  %v2899_v4 = vld [vmem:[%s6640_s3 + $0x408] sm:$0xff] }
  0xa7   : > { %4426 = vmatprep.mubr.f32.mxu0 %v6080_v29  ;;  %4863 = vmatpush3.bf16.msra.mxu0 %v4860_v57  ;;  %v6192_v29 = vld [vmem:[#allocation2 + $0x1e8] sm:$0xff]  ;;  %v6195_v40 = vpack.c.bf16 %v2899_v4, %v2898_v54  ;;  %v1376_v4 = vld [vmem:[%s6640_s3 + $0x1a0] sm:$0xff] }
  0xa8   : > { %4865 = vmatprep.subr.bf16.mxu0 %v4864_v60  ;;  %v1035_v57 = vld [vmem:[#allocation2 + $0x2] sm:$0xff] }
  0xa9   : > { %4051 = vmatmul.mubr.f32.gmra.mrb[28].mxu1 %v6178_v62  ;;  %v1377_v54 = vld [vmem:[%s6640_s3 + $0x1a8] sm:$0xff] }
  0xaa   : > { %4427 = vmatmul.mubr.f32.gmra.mrb[12].mxu0 %v6092_v43  ;;  %4053 = vmatprep.mubr.f32.mxu1 %v6181_v19  ;;  %v1375_v43 = vld [vmem:[%s6640_s3 + $0x198] sm:$0xff] }
  0xab   : > { %4429 = vmatprep.mubr.f32.mxu0 %v6095_v21  ;;  %4867 = vmatpush3.bf16.msra.mxu0 %v4864_v60  ;;  %v4716_v60 = vpack.c.bf16 %v1375_v43, %v1374_v51  ;;  %v4720_v43 = vpack.c.bf16 %v1377_v54, %v1376_v4  ;;  %v1385_v51 = vld [vmem:[%s6640_s3 + $0x1e8] sm:$0xff]  ;;  %v1387_v4 = vld [vmem:[%s6640_s3 + $0x1f8] sm:$0xff]  ;;  %v2286_v54 = vld [vmem:[#allocation2 + $0x220] sm:$0xff] }
  0xac   : > { %4869 = vmatprep.subr.bf16.mxu0 %v4868_v34 }
  0xad   : > { %4054 = vmatmul.mubr.f32.gmra.mrb[30].mxu1 %v6192_v29 }
  0xae   : > { %4430 = vmatmul.mubr.f32.gmra.mrb[14].mxu0 %v6107_v22  ;;  %4088 = vmatprep.mubr.f32.mxu1 %v1035_v57  ;;  %v1383_v57 = vld [vmem:[%s6640_s3 + $0x1d8] sm:$0xff] }
  0xaf   : > { %4432 = vmatprep.mubr.f32.mxu0 %v6111_v47  ;;  %4871 = vmatpush3.bf16.msra.mxu0 %v4868_v34  ;;  %v1379_v34 = vld [vmem:[%s6640_s3 + $0x1b8] sm:$0xff] }
  0xb0   : > { %4873 = vmatprep.subr.bf16.mxu0 %v6195_v40 }
  0xb1   : > { %4089 = vmatmul.mubr.f32.vlgmr.msra.gmra.mrb[0].mxu1 %v1036_v26  ;;  %v1378_v26 = vld [vmem:[%s6640_s3 + $0x1b0] sm:$0xff] }
  0xb2   : > { %4433 = vmatmul.mubr.f32.gmra.mrb[16].mxu0 %v6122_v20  ;;  %4715 = vmatpush3.bf16.msra.mxu1 %v6082_v25  ;;  %v1381_v25 = vld [vmem:[%s6640_s3 + $0x1c8] sm:$0xff] }
  0xb3   : > { %4091 = vmatprep.mubr.f32.mxu1 %v5809_v10  ;;  %4435 = vmatprep.mubr.f32.mxu0 %v6125_v35  ;;  %v4724_v10 = vpack.c.bf16 %v1379_v34, %v1378_v26  ;;  %v2901_v26 = vld [vmem:[%s6640_s3 + $0x418] sm:$0xff]  ;;  %v5185_v34 = vld [vmem:[#allocation2 + $0x8] sm:$0xff] }
  0xb4   : > { %4717 = vmatprep.subr.bf16.mxu1 %v4716_v60 }
  0xb5   : > { %4092 = vmatmul.mubr.f32.gmra.mrb[2].mxu1 %v5827_v6  ;;  %v1380_v6 = vld [vmem:[%s6640_s3 + $0x1c0] sm:$0xff] }
  0xb6   : > { %4436 = vmatmul.mubr.f32.gmra.mrb[18].mxu0 %v6136_v37  ;;  %4094 = vmatprep.mubr.f32.mxu1 %v5829_v16  ;;  %v4728_v16 = vpack.c.bf16 %v1381_v25, %v1380_v6  ;;  %v2903_v6 = vld [vmem:[%s6640_s3 + $0x428] sm:$0xff] }
  0xb7   : > { %4438 = vmatprep.mubr.f32.mxu0 %v6139_v49  ;;  %4719 = vmatpush3.bf16.msra.mxu1 %v4716_v60  ;;  %v2565_v25 = vld [vmem:[#allocation2 + $0x81] sm:$0xff] }
  0xb8   : > { %4721 = vmatprep.subr.bf16.mxu1 %v4720_v43 }
  0xb9   : > { %4095 = vmatmul.mubr.f32.gmra.mrb[4].mxu1 %v5843_v3  ;;  %v1382_v3 = vld [vmem:[%s6640_s3 + $0x1d0] sm:$0xff] }
  0xba   : > { %4439 = vmatmul.mubr.f32.gmra.mrb[20].mxu0 %v6150_v42  ;;  %4097 = vmatprep.mubr.f32.mxu1 %v5845_v27  ;;  %v4732_v27 = vpack.c.bf16 %v1383_v57, %v1382_v3  ;;  %v2905_v3 = vld [vmem:[%s6640_s3 + $0x438] sm:$0xff] }
  0xbb   : > { %4441 = vmatprep.mubr.f32.mxu0 %v6153_v5  ;;  %4723 = vmatpush3.bf16.msra.mxu1 %v4720_v43  ;;  %v2561_v43 = vld [vmem:[#allocation2 + $0x41] sm:$0xff] }
  0xbc   : > { %4725 = vmatprep.subr.bf16.mxu1 %v4724_v10 }
  0xbd   : > { %4098 = vmatmul.mubr.f32.gmra.mrb[6].mxu1 %v5859_v50  ;;  %v1384_v50 = vld [vmem:[%s6640_s3 + $0x1e0] sm:$0xff] }
  0xbe   : > { %4442 = vmatmul.mubr.f32.gmra.mrb[22].mxu0 %v6164_v30  ;;  %4100 = vmatprep.mubr.f32.mxu1 %v5861_v39  ;;  %v6257_v39 = vld [vmem:[#allocation2 + $0x200] sm:$0xff]  ;;  %v4736_v60 = vpack.c.bf16 %v1385_v51, %v1384_v50 }
  0xbf   : > { %4444 = vmatprep.mubr.f32.mxu0 %v6167_v31  ;;  %4727 = vmatpush3.bf16.msra.mxu1 %v4724_v10  ;;  %v2569_v50 = vld [vmem:[#allocation2 + $0xc1] sm:$0xff] }
  0xc0   : > { %4729 = vmatprep.subr.bf16.mxu1 %v4728_v16 }
  0xc1   : > { %4101 = vmatmul.mubr.f32.gmra.mrb[8].mxu1 %v5875_v53  ;;  %v1386_v53 = vld [vmem:[%s6640_s3 + $0x1f0] sm:$0xff] }
  0xc2   : > { %4445 = vmatmul.mubr.f32.gmra.mrb[24].mxu0 %v6178_v62  ;;  %4103 = vmatprep.mubr.f32.mxu1 %v5877_v44  ;;  %v6269_v44 = vld [vmem:[#allocation2 + $0x208] sm:$0xff] }
  0xc3   : > { %4447 = vmatprep.mubr.f32.mxu0 %v6181_v19  ;;  %4731 = vmatpush3.bf16.msra.mxu1 %v4728_v16 }
  0xc4   : > { %4733 = vmatprep.subr.bf16.mxu1 %v4732_v27 }
  0xc5   : > { %4104 = vmatmul.mubr.f32.gmra.mrb[10].mxu1 %v5891_v14  ;;  %v4740_v14 = vpack.c.bf16 %v1387_v4, %v1386_v53  ;;  %v2571_v53 = vld [vmem:[#allocation2 + $0xe1] sm:$0xff] }
  0xc6   : > { %4448 = vmatmul.mubr.f32.gmra.mrb[26].mxu0 %v6192_v29  ;;  %4106 = vmatprep.mubr.f32.mxu1 %v5893_v63  ;;  %v2900_v63 = vld [vmem:[%s6640_s3 + $0x410] sm:$0xff] }
  0xc7   : > { %4450 = vmatprep.mubr.f32.mxu0 %v6257_v39  ;;  %4735 = vmatpush3.bf16.msra.mxu1 %v4732_v27  ;;  %v4876_v10 = vpack.c.bf16 %v2901_v26, %v2900_v63  ;;  %v2907_v27 = vld [vmem:[%s6640_s3 + $0x448] sm:$0xff]  ;;  %v2913_v63 = vld [vmem:[%s6640_s3 + $0x478] sm:$0xff] }
  0xc8   : > { %4737 = vmatprep.subr.bf16.mxu1 %v4736_v60  ;;  %v6332_v26 = vld [vmem:[#allocation2 + $0x121] sm:$0xff] }
  0xc9   : > { %4107 = vmatmul.mubr.f32.gmra.mrb[12].mxu1 %v5907_v48  ;;  %v2562_v48 = vld [vmem:[#allocation2 + $0x49] sm:$0xff] }
  0xca   : > { %4451 = vmatmul.mubr.f32.gmra.mrb[28].mxu0 %v6269_v44  ;;  %4109 = vmatprep.mubr.f32.mxu1 %v5909_v17  ;;  %v2563_v17 = vld [vmem:[#allocation2 + $0x61] sm:$0xff] }
  0xcb   : > { %4453 = vmatprep.mubr.f32.mxu0 %v2286_v54  ;;  %4739 = vmatpush3.bf16.msra.mxu1 %v4736_v60  ;;  %v2909_v60 = vld [vmem:[%s6640_s3 + $0x458] sm:$0xff]  ;;  %v2911_v54 = vld [vmem:[%s6640_s3 + $0x468] sm:$0xff] }
  0xcc   : > { %4741 = vmatprep.subr.bf16.mxu1 %v4740_v14 }
  0xcd   : > { %4110 = vmatmul.mubr.f32.gmra.mrb[14].mxu1 %v5923_v2  ;;  %v2902_v2 = vld [vmem:[%s6640_s3 + $0x420] sm:$0xff] }
  0xce   : > { %4454 = vmatmul.mubr.f32.gmra.mrb[30].mxu0 %v5185_v34  ;;  %4112 = vmatprep.mubr.f32.mxu1 %v5925_v56  ;;  %v2564_v56 = vld [vmem:[#allocation2 + $0x69] sm:$0xff]  ;;  %v4880_v16 = vpack.c.bf16 %v2903_v6, %v2902_v2  ;;  %v6691_v6 = vld [vmem:[#allocation14_spill] sm:$0xff] }
  0xcf   : > { %4488 = vmatprep.mubr.f32.mxu0 %v2561_v43  ;;  %4743 = vmatpush3.bf16.msra.mxu1 %v4740_v14  ;;  %v2573_v14 = vld [vmem:[#allocation2 + $0x101] sm:$0xff]  ;;  %v6690_v2 = vld [vmem:[#allocation5_spill] sm:$0xff] }
  0xd0   : > { %4904 = vmatprep.subr.bf16.mxu1 %v5303_v8 }
  0xd1   : > { %4113 = vmatmul.mubr.f32.gmra.mrb[16].mxu1 %v5939_v24  ;;  %v2904_v24 = vld [vmem:[%s6640_s3 + $0x430] sm:$0xff] }
  0xd2   : > { %4489 = vmatmul.mubr.f32.vlgmr.msra.gmra.mrb[0].mxu0 %v2562_v48  ;;  %4115 = vmatprep.mubr.f32.mxu1 %v5941_v0  ;;  %v2566_v0 = vld [vmem:[#allocation2 + $0x89] sm:$0xff]  ;;  %v4884_v57 = vpack.c.bf16 %v2905_v3, %v2904_v24  ;;  %v6339_v48 = vld [vmem:[#allocation2 + $0x141] sm:$0xff] }
  0xd3   : > { %4875 = vmatpush3.bf16.msra.mxu0 %v6195_v40  ;;  %4491 = vmatprep.mubr.f32.mxu0 %v2563_v17  ;;  %v2567_v40 = vld [vmem:[#allocation2 + $0xa1] sm:$0xff]  ;;  %v5186_v17 = vld [vmem:[#allocation2 + $0x1c9] sm:$0xff] }
  0xd4   : > { %4877 = vmatprep.subr.bf16.mxu0 %v4876_v10  ;;  %v2591_v3 = vld [vmem:[#allocation2 + $0x221] sm:$0xff] }
  0xd5   : > { %4116 = vmatmul.mubr.f32.gmra.mrb[18].mxu1 %v5955_v9  ;;  %v2906_v9 = vld [vmem:[%s6640_s3 + $0x440] sm:$0xff] }
  0xd6   : > { %4492 = vmatmul.mubr.f32.gmra.mrb[2].mxu0 %v2564_v56  ;;  %4118 = vmatprep.mubr.f32.mxu1 %v5959_v28  ;;  %v2568_v28 = vld [vmem:[#allocation2 + $0xa9] sm:$0xff]  ;;  %v4888_v51 = vpack.c.bf16 %v2907_v27, %v2906_v9 }
  0xd7   : > { %4494 = vmatprep.mubr.f32.mxu0 %v2565_v25  ;;  %4879 = vmatpush3.bf16.msra.mxu0 %v4876_v10  ;;  %v5187_v10 = vld [vmem:[#allocation2 + $0x1e1] sm:$0xff]  ;;  %v5188_v56 = vld [vmem:[#allocation2 + $0x1e9] sm:$0xff] }
  0xd8   : > { %4881 = vmatprep.subr.bf16.mxu0 %v4880_v16  ;;  %v6692_v25 = vld [vmem:[#allocation15_spill] sm:$0xff]  ;;  %v6699_v27 = vld [vmem:[#allocation17_spill] sm:$0xff] }
  0xd9   : > { %4119 = vmatmul.mubr.f32.gmra.mrb[20].mxu1 %v5975_v11  ;;  %v2908_v11 = vld [vmem:[%s6640_s3 + $0x450] sm:$0xff] }
  0xda   : > { %4495 = vmatmul.mubr.f32.gmra.mrb[4].mxu0 %v2566_v0  ;;  %4121 = vmatprep.mubr.f32.mxu1 %v5979_v36  ;;  %v2570_v36 = vld [vmem:[#allocation2 + $0xc9] sm:$0xff]  ;;  %v4892_v4 = vpack.c.bf16 %v2909_v60, %v2908_v11  ;;  %v6695_v0 = vld [vmem:[#allocation6_spill] sm:$0xff] }
  0xdb   : > { %4497 = vmatprep.mubr.f32.mxu0 %v2567_v40  ;;  %4883 = vmatpush3.bf16.msra.mxu0 %v4880_v16  ;;  %v6693_v16 = vld [vmem:[#allocation8_spill] sm:$0xff]  ;;  %v6701_v11 = vld [vmem:[#allocation18_spill] sm:$0xff] }
  0xdc   : > { %4885 = vmatprep.subr.bf16.mxu0 %v4884_v57  ;;  %v6694_v24 = vmax.f32 %v6693_v16, 0.0  ;;  %v6696_v40 = vld [vmem:[#allocation16_spill] sm:$0xff] }
  0xdd   : > { %4122 = vmatmul.mubr.f32.gmra.mrb[22].mxu1 %v5993_v41  ;;  %v2910_v41 = vld [vmem:[%s6640_s3 + $0x460] sm:$0xff]  ;;  %v2867_v60 = vld [vmem:[#allocation2 + $0x4a] sm:$0xff] }
  0xde   : > { %4498 = vmatmul.mubr.f32.gmra.mrb[6].mxu0 %v2568_v28  ;;  %4124 = vmatprep.mubr.f32.mxu1 %v5997_v52  ;;  %v2572_v52 = vld [vmem:[#allocation2 + $0xe9] sm:$0xff]  ;;  %v4896_v43 = vpack.c.bf16 %v2911_v54, %v2910_v41 }
  0xdf   : > { %4500 = vmatprep.mubr.f32.mxu0 %v2569_v50  ;;  %4887 = vmatpush3.bf16.msra.mxu0 %v4884_v57  ;;  %v6697_v57 = vld [vmem:[#allocation9_spill] sm:$0xff]  ;;  %v2866_v50 = vld [vmem:[#allocation2 + $0x42] sm:$0xff] }
  0xe0   : > { %4889 = vmatprep.subr.bf16.mxu0 %v4888_v51  ;;  %v6698_v9 = vmax.f32 %v6697_v57, 0.0  ;;  %v2592_v28 = vld [vmem:[#allocation2 + $0x229] sm:$0xff] }
  0xe1   : > { %4125 = vmatmul.mubr.f32.gmra.mrb[24].mxu1 %v6011_v61  ;;  %v2912_v61 = vld [vmem:[%s6640_s3 + $0x470] sm:$0xff]  ;;  %v2872_v41 = vld [vmem:[#allocation2 + $0xa2] sm:$0xff] }
  0xe2   : > { %4501 = vmatmul.mubr.f32.gmra.mrb[8].mxu0 %v2570_v36  ;;  %4127 = vmatprep.mubr.f32.mxu1 %v6015_v46  ;;  %v2574_v46 = vld [vmem:[#allocation2 + $0x109] sm:$0xff]  ;;  %v4900_v34 = vpack.c.bf16 %v2913_v63, %v2912_v61 }
  0xe3   : > { %4503 = vmatprep.mubr.f32.mxu0 %v2571_v53  ;;  %4891 = vmatpush3.bf16.msra.mxu0 %v4888_v51  ;;  %v6700_v51 = vld [vmem:[#allocation7_spill] sm:$0xff]  ;;  %v2869_v53 = vld [vmem:[#allocation2 + $0x6a] sm:$0xff] }
  0xe4   : > { %4893 = vmatprep.subr.bf16.mxu0 %v4892_v4  ;;  %v2868_v36 = vld [vmem:[#allocation2 + $0x62] sm:$0xff] }
  0xe5   : > { %4128 = vmatmul.mubr.f32.gmra.mrb[26].mxu1 %v6029_v12  ;;  %v6337_v12 = vld [vmem:[#allocation2 + $0x129] sm:$0xff] }
  0xe6   : > { %4504 = vmatmul.mubr.f32.gmra.mrb[10].mxu0 %v2572_v52  ;;  %4130 = vmatprep.mubr.f32.mxu1 %v6033_v58  ;;  %v6345_v58 = vld [vmem:[#allocation2 + $0x149] sm:$0xff] }
  0xe7   : > { %4506 = vmatprep.mubr.f32.mxu0 %v2573_v14  ;;  %4895 = vmatpush3.bf16.msra.mxu0 %v4892_v4  ;;  %v2870_v4 = vld [vmem:[#allocation2 + $0x82] sm:$0xff]  ;;  %v2889_v52 = vld [vmem:[#allocation2 + $0x1aa] sm:$0xff] }
  0xe8   : > { %4897 = vmatprep.subr.bf16.mxu0 %v4896_v43  ;;  %v2874_v54 = vld [vmem:[#allocation2 + $0xc2] sm:$0xff] }
  0xe9   : > { %4131 = vmatmul.mubr.f32.gmra.mrb[28].mxu1 %v6047_v55  ;;  %v6347_v55 = vld [vmem:[#allocation2 + $0x161] sm:$0xff]  ;;  %v1672_v63 = vld [vmem:[#allocation2 + $0x1c9] sm:$0xff] }
  0xea   : > { %4507 = vmatmul.mubr.f32.gmra.mrb[12].mxu0 %v2574_v46  ;;  %4133 = vmatprep.mubr.f32.mxu1 %v6051_v23  ;;  %v6354_v23 = vld [vmem:[#allocation2 + $0x169] sm:$0xff] }
  0xeb   : > { %4509 = vmatprep.mubr.f32.mxu0 %v6332_v26  ;;  %4899 = vmatpush3.bf16.msra.mxu0 %v4896_v43  ;;  %v2890_v14 = vld [vmem:[#allocation2 + $0x1c2] sm:$0xff]  ;;  %v2891_v43 = vld [vmem:[#allocation2 + $0x1ca] sm:$0xff] }
  0xec   : > { %4901 = vmatprep.subr.bf16.mxu0 %v4900_v34  ;;  %v2892_v61 = vld [vmem:[#allocation2 + $0x1e2] sm:$0xff]  ;;  %v2893_v46 = vld [vmem:[#allocation2 + $0x1ea] sm:$0xff] }
  0xed   : > { %4134 = vmatmul.mubr.f32.gmra.mrb[30].mxu1 %v6065_v59  ;;  %v6686_v59 = vld [vmem:[#allocation11_spill] sm:$0xff] }
  0xee   : > { %4510 = vmatmul.mubr.f32.gmra.mrb[14].mxu0 %v6337_v12  ;;  %4168 = vmatprep.mubr.f32.mxu1 %v5957_v32  ;;  %v6356_v32 = vld [vmem:[#allocation2 + $0x181] sm:$0xff] }
  0xef   : > { %4512 = vmatprep.mubr.f32.mxu0 %v6339_v48  ;;  %4903 = vmatpush3.bf16.msra.mxu0 %v4900_v34  ;;  %v2894_v34 = vld [vmem:[#allocation2 + $0x202] sm:$0xff] }
  0xf1   : > { %4169 = vmatmul.mubr.f32.vlgmr.msra.gmra.mrb[0].mxu1 %v5971_v1  ;;  %v6363_v1 = vld [vmem:[#allocation2 + $0x189] sm:$0xff] }
  0xf2   : > { %4513 = vmatmul.mubr.f32.gmra.mrb[16].mxu0 %v6345_v58  ;;  %4912 = vmatpush3.bf16.msra.mxu1 %v5303_v8  ;;  %v6366_v8 = vld [vmem:[#allocation2 + $0x1a1] sm:$0xff] }
  0xf3   : > { %4171 = vmatprep.mubr.f32.mxu1 %v5977_v7  ;;  %4515 = vmatprep.mubr.f32.mxu0 %v6347_v55  ;;  %v6373_v7 = vld [vmem:[#allocation2 + $0x1a9] sm:$0xff] }
  0xf4   : > { %4905 = vmatprep.subr.bf16.mxu1 %v5324_v13 }
  0xf5   : > { %4172 = vmatmul.mubr.f32.gmra.mrb[2].mxu1 %v5990_v33  ;;  %v6376_v33 = vld [vmem:[#allocation2 + $0x1c1] sm:$0xff] }
  0xf6   : > { %4516 = vmatmul.mubr.f32.gmra.mrb[18].mxu0 %v6354_v23  ;;  %4174 = vmatprep.mubr.f32.mxu1 %v5995_v38  ;;  %v6684_v38 = vld [vmem:[#allocation3_spill] sm:$0xff] }
  0xf7   : > { %4518 = vmatprep.mubr.f32.mxu0 %v6356_v32  ;;  %4913 = vmatpush3.bf16.msra.mxu1 %v5324_v13  ;;  %v6685_v13 = vld [vmem:[#allocation10_spill] sm:$0xff] }
  0xf8   : > { %4906 = vmatprep.subr.bf16.mxu1 %v5339_v18 }
  0xf9   : > { %4175 = vmatmul.mubr.f32.gmra.mrb[4].mxu1 %v6008_v45  ;;  %v6687_v45 = vld [vmem:[#allocation4_spill] sm:$0xff] }
  0xfa   : > { %4519 = vmatmul.mubr.f32.gmra.mrb[20].mxu0 %v6363_v1  ;;  %4177 = vmatprep.mubr.f32.mxu1 %v6013_v15  ;;  %v6688_v15 = vld [vmem:[#allocation12_spill] sm:$0xff] }
  0xfb   : > { %4521 = vmatprep.mubr.f32.mxu0 %v6366_v8  ;;  %4914 = vmatpush3.bf16.msra.mxu1 %v5339_v18  ;;  %v6689_v18 = vld [vmem:[#allocation13_spill] sm:$0xff] }
  0xfc   : > { %4907 = vmatprep.subr.bf16.mxu1 %v6684_v38 }
  0xfd   : > { %4178 = vmatmul.mubr.f32.gmra.mrb[6].mxu1 %v6685_v13 }
  0xfe   : > { %4522 = vmatmul.mubr.f32.gmra.mrb[22].mxu0 %v6373_v7  ;;  %4180 = vmatprep.mubr.f32.mxu1 %v6686_v59 }
  0xff   : > { %4524 = vmatprep.mubr.f32.mxu0 %v6376_v33  ;;  %4915 = vmatpush3.bf16.msra.mxu1 %v6684_v38 }
 0x100   : > { %4908 = vmatprep.subr.bf16.mxu1 %v6687_v45 }
 0x101   : > { %4181 = vmatmul.mubr.f32.gmra.mrb[8].mxu1 %v6688_v15 }
 0x102   : > { %4525 = vmatmul.mubr.f32.gmra.mrb[24].mxu0 %v5186_v17  ;;  %4183 = vmatprep.mubr.f32.mxu1 %v6689_v18 }
 0x103   : > { %4527 = vmatprep.mubr.f32.mxu0 %v5187_v10  ;;  %4916 = vmatpush3.bf16.msra.mxu1 %v6687_v45 }
 0x104   : > { %4909 = vmatprep.subr.bf16.mxu1 %v6690_v2 }
 0x105   : > { %4184 = vmatmul.mubr.f32.gmra.mrb[10].mxu1 %v6691_v6 }
 0x106   : > { %4528 = vmatmul.mubr.f32.gmra.mrb[26].mxu0 %v5188_v56  ;;  %4186 = vmatprep.mubr.f32.mxu1 %v6692_v25 }
 0x107   : > { %4530 = vmatprep.mubr.f32.mxu0 %v6694_v24  ;;  %4917 = vmatpush3.bf16.msra.mxu1 %v6690_v2 }
 0x108   : > { %4910 = vmatprep.subr.bf16.mxu1 %v6695_v0 }
 0x109   : > { %4187 = vmatmul.mubr.f32.gmra.mrb[12].mxu1 %v6696_v40 }
 0x10a   : > { %4531 = vmatmul.mubr.f32.gmra.mrb[28].mxu0 %v6698_v9  ;;  %4189 = vmatprep.mubr.f32.mxu1 %v6699_v27 }
 0x10b   : > { %4533 = vmatprep.mubr.f32.mxu0 %v2591_v3  ;;  %4918 = vmatpush3.bf16.msra.mxu1 %v6695_v0 }
 0x10c   : > { %4911 = vmatprep.subr.bf16.mxu1 %v6700_v51 }
 0x10d   : > { %4190 = vmatmul.mubr.f32.gmra.mrb[14].mxu1 %v6701_v11 }
 0x10e   : > { %4534 = vmatmul.mubr.f32.gmra.mrb[30].mxu0 %v2592_v28  ;;  %4192 = vmatprep.mubr.f32.mxu1 %v6095_v21  ;;  %v2871_v21 = vld [vmem:[#allocation2 + $0x8a] sm:$0xff] }
 0x10f   : > { %4568 = vmatprep.mubr.f32.mxu0 %v2866_v50  ;;  %4919 = vmatpush3.bf16.msra.mxu1 %v6700_v51 }
 0x111   : > { %4193 = vmatmul.mubr.f32.gmra.mrb[16].mxu1 %v6107_v22  ;;  %v2873_v22 = vld [vmem:[#allocation2 + $0xaa] sm:$0xff] }
 0x112   : > { %4569 = vmatmul.mubr.f32.vlgmr.msra.gmra.mrb[0].mxu0 %v2867_v60  ;;  %4195 = vmatprep.mubr.f32.mxu1 %v6111_v47  ;;  %v2875_v47 = vld [vmem:[#allocation2 + $0xca] sm:$0xff] }
 0x113   : > { %4571 = vmatprep.mubr.f32.mxu0 %v2868_v36 }
 0x115   : > { %4196 = vmatmul.mubr.f32.gmra.mrb[18].mxu1 %v6122_v20  ;;  %v2876_v20 = vld [vmem:[#allocation2 + $0xe2] sm:$0xff] }
 0x116   : > { %4572 = vmatmul.mubr.f32.gmra.mrb[2].mxu0 %v2869_v53  ;;  %4198 = vmatprep.mubr.f32.mxu1 %v6125_v35  ;;  %v2878_v35 = vld [vmem:[#allocation2 + $0x102] sm:$0xff] }
 0x117   : > { %4574 = vmatprep.mubr.f32.mxu0 %v2870_v4 }
 0x119   : > { %4199 = vmatmul.mubr.f32.gmra.mrb[20].mxu1 %v6136_v37  ;;  %v2877_v37 = vld [vmem:[#allocation2 + $0xea] sm:$0xff] }
 0x11a   : > { %4575 = vmatmul.mubr.f32.gmra.mrb[4].mxu0 %v2871_v21  ;;  %4201 = vmatprep.mubr.f32.mxu1 %v6139_v49  ;;  %v2880_v49 = vld [vmem:[#allocation2 + $0x122] sm:$0xff] }
 0x11b   : > { %4577 = vmatprep.mubr.f32.mxu0 %v2872_v41 }
 0x11d   : > { %4202 = vmatmul.mubr.f32.gmra.mrb[22].mxu1 %v6150_v42  ;;  %v2879_v42 = vld [vmem:[#allocation2 + $0x10a] sm:$0xff] }
 0x11e   : > { %4578 = vmatmul.mubr.f32.gmra.mrb[6].mxu0 %v2873_v22  ;;  %4204 = vmatprep.mubr.f32.mxu1 %v6153_v5  ;;  %v2882_v5 = vld [vmem:[#allocation2 + $0x142] sm:$0xff] }
 0x11f   : > { %4580 = vmatprep.mubr.f32.mxu0 %v2874_v54 }
 0x121   : > { %4205 = vmatmul.mubr.f32.gmra.mrb[24].mxu1 %v6164_v30  ;;  %v2881_v30 = vld [vmem:[#allocation2 + $0x12a] sm:$0xff] }
 0x122   : > { %4581 = vmatmul.mubr.f32.gmra.mrb[8].mxu0 %v2875_v47  ;;  %4207 = vmatprep.mubr.f32.mxu1 %v6167_v31  ;;  %v2884_v31 = vld [vmem:[#allocation2 + $0x162] sm:$0xff] }
 0x123   : > { %4583 = vmatprep.mubr.f32.mxu0 %v2876_v20 }
 0x125   : > { %4208 = vmatmul.mubr.f32.gmra.mrb[26].mxu1 %v6178_v62  ;;  %v2883_v62 = vld [vmem:[#allocation2 + $0x14a] sm:$0xff] }
 0x126   : > { %4584 = vmatmul.mubr.f32.gmra.mrb[10].mxu0 %v2877_v37  ;;  %4210 = vmatprep.mubr.f32.mxu1 %v6181_v19  ;;  %v2886_v19 = vld [vmem:[#allocation2 + $0x182] sm:$0xff] }
 0x127   : > { %4586 = vmatprep.mubr.f32.mxu0 %v2878_v35 }
 0x129   : > { %4211 = vmatmul.mubr.f32.gmra.mrb[28].mxu1 %v6192_v29  ;;  %v2885_v29 = vld [vmem:[#allocation2 + $0x16a] sm:$0xff] }
 0x12a   : > { %4587 = vmatmul.mubr.f32.gmra.mrb[12].mxu0 %v2879_v42  ;;  %4213 = vmatprep.mubr.f32.mxu1 %v6257_v39  ;;  %v2887_v39 = vld [vmem:[#allocation2 + $0x18a] sm:$0xff] }
 0x12b   : > { %4589 = vmatprep.mubr.f32.mxu0 %v2880_v49 }
 0x12d   : > { %4214 = vmatmul.mubr.f32.gmra.mrb[30].mxu1 %v6269_v44  ;;  %v2888_v44 = vld [vmem:[#allocation2 + $0x1a2] sm:$0xff] }
 0x12e   : > { %4590 = vmatmul.mubr.f32.gmra.mrb[14].mxu0 %v2881_v30  ;;  %4272 = vmatprep.mubr.f32.mxu1 %v6332_v26  ;;  %v1673_v26 = vld [vmem:[#allocation2 + $0x1e1] sm:$0xff] }
 0x12f   : > { %4592 = vmatprep.mubr.f32.mxu0 %v2882_v5 }
 0x131   : > { %4273 = vmatmul.mubr.f32.vlgmr.msra.gmra.mrb[16].mxu1 %v6337_v12  ;;  %v1674_v12 = vld [vmem:[#allocation2 + $0x1e9] sm:$0xff] }
 0x132   : > { %4593 = vmatmul.mubr.f32.gmra.mrb[16].mxu0 %v2883_v62  ;;  %4275 = vmatprep.mubr.f32.mxu1 %v6339_v48  ;;  %v2895_v48 = vld [vmem:[#allocation2 + $0x20a] sm:$0xff] }
 0x133   : > { %4595 = vmatprep.mubr.f32.mxu0 %v2884_v31 }
 0x135   : > { %4276 = vmatmul.mubr.f32.gmra.mrb[18].mxu1 %v6345_v58  ;;  %v1675_v58 = vld [vmem:[#allocation2 + $0x201] sm:$0xff] }
 0x136   : > { %4596 = vmatmul.mubr.f32.gmra.mrb[18].mxu0 %v2885_v29  ;;  %4278 = vmatprep.mubr.f32.mxu1 %v6347_v55  ;;  %v2896_v55 = vld [vmem:[#allocation2 + $0x222] sm:$0xff] }
 0x137   : > { %4598 = vmatprep.mubr.f32.mxu0 %v2886_v19 }
 0x139   : > { %4279 = vmatmul.mubr.f32.gmra.mrb[20].mxu1 %v6354_v23  ;;  %v1676_v23 = vld [vmem:[#allocation2 + $0x209] sm:$0xff] }
 0x13a   : > { %4599 = vmatmul.mubr.f32.gmra.mrb[20].mxu0 %v2887_v39  ;;  %4281 = vmatprep.mubr.f32.mxu1 %v6356_v32  ;;  %v2897_v32 = vld [vmem:[#allocation2 + $0x22a] sm:$0xff] }
 0x13b   : > { %4601 = vmatprep.mubr.f32.mxu0 %v2888_v44 }
 0x13d   : > { %4282 = vmatmul.mubr.f32.gmra.mrb[22].mxu1 %v6363_v1 }
 0x13e   : > { %4602 = vmatmul.mubr.f32.gmra.mrb[22].mxu0 %v2889_v52  ;;  %4284 = vmatprep.mubr.f32.mxu1 %v6366_v8 }
 0x13f   : > { %4604 = vmatprep.mubr.f32.mxu0 %v2890_v14 }
 0x141   : > { %4285 = vmatmul.mubr.f32.gmra.mrb[24].mxu1 %v6373_v7 }
 0x142   : > { %4605 = vmatmul.mubr.f32.gmra.mrb[24].mxu0 %v2891_v43  ;;  %4287 = vmatprep.mubr.f32.mxu1 %v6376_v33 }
 0x143   : > { %4607 = vmatprep.mubr.f32.mxu0 %v2892_v61 }
 0x145   : > { %4288 = vmatmul.mubr.f32.gmra.mrb[26].mxu1 %v1672_v63 }
 0x146   : > { %4608 = vmatmul.mubr.f32.gmra.mrb[26].mxu0 %v2893_v46  ;;  %4290 = vmatprep.mubr.f32.mxu1 %v1673_v26 }
 0x147   : > { %4610 = vmatprep.mubr.f32.mxu0 %v2894_v34 }
 0x149   : > { %4291 = vmatmul.mubr.f32.gmra.mrb[28].mxu1 %v1674_v12 }
 0x14a   : > { %4611 = vmatmul.mubr.f32.gmra.mrb[28].mxu0 %v2895_v48  ;;  %4293 = vmatprep.mubr.f32.mxu1 %v1675_v58 }
 0x14b   : > { %4613 = vmatprep.mubr.f32.mxu0 %v2896_v55 }
 0x14d   : > { %4294 = vmatmul.mubr.f32.gmra.mrb[30].mxu1 %v1676_v23 }
 0x14e   : > { %4614 = vmatmul.mubr.f32.gmra.mrb[30].mxu0 %v2897_v32 }
 0x1c4   : > { %v4170_v1 = vpop.f32.mrb[0].mxu1 }
 0x1c5   : > { %v1454_v8 = vpop.f32.mrb[1].mxu1 }
 0x1c8   : > { %v4173_v7 = vpop.f32.mrb[2].mxu1 }
 0x1c9   : > { %v1464_v33 = vpop.f32.mrb[3].mxu1 }
 0x1cc   : > { %v4176_v38 = vpop.f32.mrb[4].mxu1 }
 0x1cd   : > { %v1474_v13 = vpop.f32.mrb[5].mxu1 }
 0x1d0   : > { %v4179_v59 = vpop.f32.mrb[6].mxu1 }
 0x1d1   : > { %v1484_v45 = vpop.f32.mrb[7].mxu1 }
 0x1d4   : > { %v4182_v15 = vpop.f32.mrb[8].mxu1 }
 0x1d5   : > { %v1494_v17 = vpop.f32.mrb[9].mxu1 }
 0x1d8   : > { %v4185_v18 = vpop.f32.mrb[10].mxu1 }
 0x1d9   : > { %v1504_v10 = vpop.f32.mrb[11].mxu1 }
 0x1dc   : > { %v4188_v2 = vpop.f32.mrb[12].mxu1 }
 0x1dd   : > { %v1514_v6 = vpop.f32.mrb[13].mxu1 }
 0x1e0   : > { %v4191_v56 = vpop.f32.mrb[14].mxu1 }
 0x1e1   : > { %v1524_v25 = vpop.f32.mrb[15].mxu1 }
 0x1e5   : > { %v4570_v16 = vpop.f32.mrb[0].mxu0 }
 0x1e6   : > { %v6437_v24 = vadd.f32 %v4570_v16, %v4170_v1  ;;  %v2980_v3 = vpop.f32.mrb[1].mxu0 }
 0x1e7   : > { %v6439_v0 = vadd.f32 %v2980_v3, %v1454_v8 }
 0x1e8   : > { %3172 = vst [vmem:[%s6435_s7 + $0x8] sm:$0xff] %v6437_v24 }
 0x1e9   : > { %3171 = vst [vmem:[%s6435_s7] sm:$0xff] %v6439_v0  ;;  %v4573_v40 = vpop.f32.mrb[2].mxu0  ;;  %v3203_v27 = vadd.f32 %v6439_v0, %v6437_v24 }
 0x1ea   : > { %v6445_v57 = vadd.f32 %v4573_v40, %v4173_v7  ;;  %v2990_v9 = vpop.f32.mrb[3].mxu0 }
 0x1eb   : > { %v6449_v28 = vadd.f32 %v2990_v9, %v1464_v33 }
 0x1ec   : > { %3174 = vst [vmem:[%s6435_s7 + $0x18] sm:$0xff] %v6445_v57 }
 0x1ed   : > { %3173 = vst [vmem:[%s6435_s7 + $0x10] sm:$0xff] %v6449_v28  ;;  %v3204_v50 = vadd.f32 %v6449_v28, %v3203_v27  ;;  %v4576_v51 = vpop.f32.mrb[4].mxu0 }
 0x1ee   : > { %v6456_v11 = vadd.f32 %v4576_v51, %v4176_v38  ;;  %v3000_v60 = vpop.f32.mrb[5].mxu0 }
 0x1ef   : > { %v6458_v36 = vadd.f32 %v3000_v60, %v1474_v13  ;;  %v3205_v53 = vadd.f32 %v6445_v57, %v3204_v50 }
 0x1f0   : > { %3176 = vst [vmem:[%s6435_s7 + $0x28] sm:$0xff] %v6456_v11 }
 0x1f1   : > { %3175 = vst [vmem:[%s6435_s7 + $0x20] sm:$0xff] %v6458_v36  ;;  %v3206_v4 = vadd.f32 %v6458_v36, %v3205_v53  ;;  %v4579_v21 = vpop.f32.mrb[6].mxu0 }
 0x1f2   : > { %v6466_v41 = vadd.f32 %v4579_v21, %v4179_v59  ;;  %v3010_v22 = vpop.f32.mrb[7].mxu0 }
 0x1f3   : > { %v6468_v54 = vadd.f32 %v3010_v22, %v1484_v45  ;;  %v3207_v47 = vadd.f32 %v6456_v11, %v3206_v4 }
 0x1f4   : > { %3178 = vst [vmem:[%s6435_s7 + $0x38] sm:$0xff] %v6466_v41 }
 0x1f5   : > { %3177 = vst [vmem:[%s6435_s7 + $0x30] sm:$0xff] %v6468_v54  ;;  %v3208_v20 = vadd.f32 %v6468_v54, %v3207_v47  ;;  %v4582_v37 = vpop.f32.mrb[8].mxu0 }
 0x1f6   : > { %v6476_v35 = vadd.f32 %v4582_v37, %v4182_v15  ;;  %v3020_v42 = vpop.f32.mrb[9].mxu0 }
 0x1f7   : > { %v6478_v49 = vadd.f32 %v3020_v42, %v1494_v17  ;;  %v3209_v30 = vadd.f32 %v6466_v41, %v3208_v20 }
 0x1f8   : > { %3180 = vst [vmem:[%s6435_s7 + $0x48] sm:$0xff] %v6476_v35 }
 0x1f9   : > { %3179 = vst [vmem:[%s6435_s7 + $0x40] sm:$0xff] %v6478_v49  ;;  %v3210_v5 = vadd.f32 %v6478_v49, %v3209_v30  ;;  %v4585_v62 = vpop.f32.mrb[10].mxu0 }
 0x1fa   : > { %v6486_v31 = vadd.f32 %v4585_v62, %v4185_v18  ;;  %v3030_v29 = vpop.f32.mrb[11].mxu0 }
 0x1fb   : > { %v6488_v19 = vadd.f32 %v3030_v29, %v1504_v10  ;;  %v3211_v39 = vadd.f32 %v6476_v35, %v3210_v5 }
 0x1fc   : > { %3182 = vst [vmem:[%s6435_s7 + $0x58] sm:$0xff] %v6486_v31 }
 0x1fd   : > { %3181 = vst [vmem:[%s6435_s7 + $0x50] sm:$0xff] %v6488_v19  ;;  %v3212_v44 = vadd.f32 %v6488_v19, %v3211_v39  ;;  %v4588_v52 = vpop.f32.mrb[12].mxu0 }
 0x1fe   : > { %v6496_v14 = vadd.f32 %v4588_v52, %v4188_v2  ;;  %v3040_v43 = vpop.f32.mrb[13].mxu0 }
 0x1ff   : > { %v6498_v61 = vadd.f32 %v3040_v43, %v1514_v6  ;;  %v3213_v63 = vadd.f32 %v6486_v31, %v3212_v44 }
 0x200   : > { %3184 = vst [vmem:[%s6435_s7 + $0x68] sm:$0xff] %v6496_v14 }
 0x201   : > { %3183 = vst [vmem:[%s6435_s7 + $0x60] sm:$0xff] %v6498_v61  ;;  %v3214_v46 = vadd.f32 %v6498_v61, %v3213_v63  ;;  %v4591_v26 = vpop.f32.mrb[14].mxu0 }
 0x202   : > { %v6506_v34 = vadd.f32 %v4591_v26, %v4191_v56  ;;  %v3050_v12 = vpop.f32.mrb[15].mxu0 }
 0x203   : > { %v6508_v48 = vadd.f32 %v3050_v12, %v1524_v25  ;;  %v3215_v58 = vadd.f32 %v6496_v14, %v3214_v46 }
 0x204   : > { %3186 = vst [vmem:[%s6435_s7 + $0x78] sm:$0xff] %v6506_v34  ;;  %v4274_v55 = vpop.f32.mrb[16].mxu1 }
 0x205   : > { %3185 = vst [vmem:[%s6435_s7 + $0x70] sm:$0xff] %v6508_v48  ;;  %v3216_v23 = vadd.f32 %v6508_v48, %v3215_v58  ;;  %v4594_v32 = vpop.f32.mrb[16].mxu0  ;;  %v1839_v1 = vpop.f32.mrb[17].mxu1 }
 0x206   : > { %v6516_v8 = vadd.f32 %v4594_v32, %v4274_v55  ;;  %v3060_v7 = vpop.f32.mrb[17].mxu0 }
 0x207   : > { %v6518_v33 = vadd.f32 %v3060_v7, %v1839_v1  ;;  %v3217_v38 = vadd.f32 %v6506_v34, %v3216_v23 }
 0x208   : > { %3188 = vst [vmem:[%s6435_s7 + $0x88] sm:$0xff] %v6516_v8  ;;  %v4277_v13 = vpop.f32.mrb[18].mxu1 }
 0x209   : > { %3187 = vst [vmem:[%s6435_s7 + $0x80] sm:$0xff] %v6518_v33  ;;  %v3218_v59 = vadd.f32 %v6518_v33, %v3217_v38  ;;  %v4597_v45 = vpop.f32.mrb[18].mxu0  ;;  %v1849_v15 = vpop.f32.mrb[19].mxu1 }
 0x20a   : > { %v6526_v17 = vadd.f32 %v4597_v45, %v4277_v13  ;;  %v3070_v18 = vpop.f32.mrb[19].mxu0 }
 0x20b   : > { %v6528_v10 = vadd.f32 %v3070_v18, %v1849_v15  ;;  %v3219_v2 = vadd.f32 %v6516_v8, %v3218_v59 }
 0x20c   : > { %3190 = vst [vmem:[%s6435_s7 + $0x98] sm:$0xff] %v6526_v17  ;;  %v4280_v6 = vpop.f32.mrb[20].mxu1 }
 0x20d   : > { %3189 = vst [vmem:[%s6435_s7 + $0x90] sm:$0xff] %v6528_v10  ;;  %v3220_v56 = vadd.f32 %v6528_v10, %v3219_v2  ;;  %v4600_v25 = vpop.f32.mrb[20].mxu0  ;;  %v1859_v16 = vpop.f32.mrb[21].mxu1 }
 0x20e   : > { %v6536_v3 = vadd.f32 %v4600_v25, %v4280_v6  ;;  %v3080_v40 = vpop.f32.mrb[21].mxu0 }
 0x20f   : > { %v6538_v9 = vadd.f32 %v3080_v40, %v1859_v16  ;;  %v3221_v27 = vadd.f32 %v6526_v17, %v3220_v56 }
 0x210   : > { %3192 = vst [vmem:[%s6435_s7 + $0xa8] sm:$0xff] %v6536_v3  ;;  %v4283_v50 = vpop.f32.mrb[22].mxu1 }
 0x211   : > { %3191 = vst [vmem:[%s6435_s7 + $0xa0] sm:$0xff] %v6538_v9  ;;  %v3222_v51 = vadd.f32 %v6538_v9, %v3221_v27  ;;  %v4603_v60 = vpop.f32.mrb[22].mxu0  ;;  %v1869_v53 = vpop.f32.mrb[23].mxu1 }
 0x212   : > { %v6546_v4 = vadd.f32 %v4603_v60, %v4283_v50  ;;  %v3090_v21 = vpop.f32.mrb[23].mxu0 }
 0x213   : > { %v6548_v22 = vadd.f32 %v3090_v21, %v1869_v53  ;;  %v3223_v47 = vadd.f32 %v6536_v3, %v3222_v51 }
 0x214   : > { %3194 = vst [vmem:[%s6435_s7 + $0xb8] sm:$0xff] %v6546_v4  ;;  %v4286_v20 = vpop.f32.mrb[24].mxu1 }
 0x215   : > { %3193 = vst [vmem:[%s6435_s7 + $0xb0] sm:$0xff] %v6548_v22  ;;  %v3224_v37 = vadd.f32 %v6548_v22, %v3223_v47  ;;  %v4606_v42 = vpop.f32.mrb[24].mxu0  ;;  %v1879_v30 = vpop.f32.mrb[25].mxu1 }
 0x216   : > { %v6556_v5 = vadd.f32 %v4606_v42, %v4286_v20  ;;  %v3100_v62 = vpop.f32.mrb[25].mxu0 }
 0x217   : > { %v4945_v29 = vadd.f32 %v3100_v62, %v1879_v30  ;;  %v3225_v39 = vadd.f32 %v6546_v4, %v3224_v37 }
 0x218   : > { %3196 = vst [vmem:[%s6435_s7 + $0xc8] sm:$0xff] %v6556_v5  ;;  %v4289_v44 = vpop.f32.mrb[26].mxu1 }
 0x219   : > { %3195 = vst [vmem:[%s6435_s7 + $0xc0] sm:$0xff] %v4945_v29  ;;  %v3226_v52 = vadd.f32 %v4945_v29, %v3225_v39  ;;  %v4609_v43 = vpop.f32.mrb[26].mxu0  ;;  %v1889_v63 = vpop.f32.mrb[27].mxu1 }
 0x21a   : > { %v4946_v46 = vadd.f32 %v4609_v43, %v4289_v44  ;;  %v3110_v26 = vpop.f32.mrb[27].mxu0 }
 0x21b   : > { %v4947_v12 = vadd.f32 %v3110_v26, %v1889_v63  ;;  %v3227_v58 = vadd.f32 %v6556_v5, %v3226_v52 }
 0x21c   : > { %3198 = vst [vmem:[%s6435_s7 + $0xd8] sm:$0xff] %v4946_v46  ;;  %v4292_v55 = vpop.f32.mrb[28].mxu1 }
 0x21d   : > { %3197 = vst [vmem:[%s6435_s7 + $0xd0] sm:$0xff] %v4947_v12  ;;  %v3228_v23 = vadd.f32 %v4947_v12, %v3227_v58  ;;  %v4612_v32 = vpop.f32.mrb[28].mxu0  ;;  %v1899_v1 = vpop.f32.mrb[29].mxu1 }
 0x21e   : > { %v4948_v7 = vadd.f32 %v4612_v32, %v4292_v55  ;;  %v3120_v38 = vpop.f32.mrb[29].mxu0 }
 0x21f   : > { %v4949_v13 = vadd.f32 %v3120_v38, %v1899_v1  ;;  %v3229_v59 = vadd.f32 %v4946_v46, %v3228_v23 }
 0x220   : > { %3200 = vst [vmem:[%s6435_s7 + $0xe8] sm:$0xff] %v4948_v7  ;;  %v4295_v45 = vpop.f32.mrb[30].mxu1 }
 0x221   : > { %3199 = vst [vmem:[%s6435_s7 + $0xe0] sm:$0xff] %v4949_v13  ;;  %v3230_v15 = vadd.f32 %v4949_v13, %v3229_v59  ;;  %v4615_v18 = vpop.f32.mrb[30].mxu0  ;;  %v1909_v2 = vpop.f32.mrb[31].mxu1 }
 0x222   : > { %v4950_v6 = vadd.f32 %v4615_v18, %v4295_v45  ;;  %v3130_v56 = vpop.f32.mrb[31].mxu0 }
 0x223   : > { %v4951_v25 = vadd.f32 %v3130_v56, %v1909_v2  ;;  %v3231_v16 = vadd.f32 %v4948_v7, %v3230_v15 }
 0x224   : > { %3202 = vst [vmem:[%s6435_s7 + $0xf8] sm:$0xff] %v4950_v6 }
 0x225   : > { %3201 = vst [vmem:[%s6435_s7 + $0xf0] sm:$0xff] %v4951_v25  ;;  %v3232_v40 = vadd.f32 %v4951_v25, %v3231_v16 }
 0x227   : > { %v3233_v27 = vadd.f32 %v4950_v6, %v3232_v40 }
 0x229   : > { %v3234_v50 = vrot.slane %v3233_v27, 4 }
 0x22b   : > { %v3235_v51 = vadd.f32 %v3234_v50, %v3233_v27 }
 0x22d   : > { %v3236_v60 = vrot.slane %v3235_v51, 2 }
 0x22f   : > { %v3237_v53 = vadd.f32 %v3236_v60, %v3235_v51 }
 0x231   : > { %v3238_v21 = vrot.slane %v3237_v53, 1 }
 0x233   : > { %v3239_v47 = vadd.f32 %v3238_v21, %v3237_v53 }
 0x235   : > { %v3240_v20 = vmul.f32 0.00390625, %v3239_v47 }
 0x237   : > { %3342 = vst [vmem:[%s265_s9] sm:$0x1] %v3240_v20  ;;  %v3249_v37 = vsub.f32 %v6478_v49, %v3240_v20  ;;  %v3251_v42 = vsub.f32 %v6488_v19, %v3240_v20  ;;  %v3252_v30 = vsub.f32 %v6486_v31, %v3240_v20  ;;  %v3253_v62 = vsub.f32 %v6498_v61, %v3240_v20 }
 0x238   : > { %v3254_v39 = vsub.f32 %v6496_v14, %v3240_v20  ;;  %v3255_v44 = vsub.f32 %v6508_v48, %v3240_v20  ;;  %v3256_v52 = vsub.f32 %v6506_v34, %v3240_v20  ;;  %v3257_v43 = vsub.f32 %v6518_v33, %v3240_v20 }
 0x239   : > { %v3258_v63 = vsub.f32 %v6516_v8, %v3240_v20  ;;  %v3259_v26 = vsub.f32 %v6528_v10, %v3240_v20  ;;  %v3260_v49 = vsub.f32 %v6526_v17, %v3240_v20  ;;  %v3261_v19 = vsub.f32 %v6538_v9, %v3240_v20 }
 0x23a   : > { %v3262_v31 = vsub.f32 %v6536_v3, %v3240_v20  ;;  %v3263_v61 = vsub.f32 %v6548_v22, %v3240_v20  ;;  %v3264_v14 = vsub.f32 %v6546_v4, %v3240_v20  ;;  %v6588_v58 = vsub.f32 %v4945_v29, %v3240_v20 }
 0x23b   : > { %v6591_v34 = vsub.f32 %v6556_v5, %v3240_v20  ;;  %v6593_v48 = vsub.f32 %v4947_v12, %v3240_v20  ;;  %v6595_v8 = vsub.f32 %v4946_v46, %v3240_v20  ;;  %v6597_v33 = vsub.f32 %v4949_v13, %v3240_v20 }
 0x23c   : > { %v6599_v17 = vsub.f32 %v4948_v7, %v3240_v20  ;;  %v6601_v10 = vsub.f32 %v4951_v25, %v3240_v20  ;;  %v6603_v3 = vsub.f32 %v4950_v6, %v3240_v20  ;;  %v3241_v9 = vsub.f32 %v6439_v0, %v3240_v20 }
 0x23d   : > { %v3242_v4 = vsub.f32 %v6437_v24, %v3240_v20  ;;  %v3243_v22 = vsub.f32 %v6449_v28, %v3240_v20  ;;  %v3244_v12 = vsub.f32 %v6445_v57, %v3240_v20  ;;  %v3245_v46 = vsub.f32 %v6458_v36, %v3240_v20 }
 0x23e   : > { %v3273_v5 = vmul.f32 %v3241_v9, %v3241_v9  ;;  %v3246_v32 = vsub.f32 %v6456_v11, %v3240_v20  ;;  %v3247_v38 = vsub.f32 %v6468_v54, %v3240_v20  ;;  %v3248_v24 = vsub.f32 %v6466_v41, %v3240_v20 }
 0x23f   : > { %v3274_v29 = vmul.f32 %v3242_v4, %v3242_v4  ;;  %v3275_v55 = vmul.f32 %v3243_v22, %v3243_v22  ;;  %v3276_v1 = vmul.f32 %v3244_v12, %v3244_v12  ;;  %v3277_v13 = vmul.f32 %v3245_v46, %v3245_v46 }
 0x240   : > { %v3278_v59 = vmul.f32 %v3246_v32, %v3246_v32  ;;  %v3279_v45 = vmul.f32 %v3247_v38, %v3247_v38  ;;  %v3250_v57 = vsub.f32 %v6476_v35, %v3240_v20  ;;  %v3280_v18 = vmul.f32 %v3248_v24, %v3248_v24 }
 0x241   : > { %v3305_v23 = vadd.f32 %v3274_v29, %v3273_v5  ;;  %v3281_v2 = vmul.f32 %v3249_v37, %v3249_v37  ;;  %v3283_v25 = vmul.f32 %v3251_v42, %v3251_v42  ;;  %v3284_v40 = vmul.f32 %v3252_v30, %v3252_v30 }
 0x242   : > { %v3282_v56 = vmul.f32 %v3250_v57, %v3250_v57  ;;  %v3285_v27 = vmul.f32 %v3253_v62, %v3253_v62  ;;  %v3286_v51 = vmul.f32 %v3254_v39, %v3254_v39  ;;  %v3287_v60 = vmul.f32 %v3255_v44, %v3255_v44 }
 0x243   : > { %v3306_v7 = vadd.f32 %v3305_v23, %v3275_v55  ;;  %v3288_v21 = vmul.f32 %v3256_v52, %v3256_v52  ;;  %v3289_v9 = vmul.f32 %v3257_v43, %v3257_v43  ;;  %v3290_v20 = vmul.f32 %v3258_v63, %v3258_v63 }
 0x244   : > { %v3291_v37 = vmul.f32 %v3259_v26, %v3259_v26  ;;  %v3292_v5 = vmul.f32 %v3260_v49, %v3260_v49  ;;  %v3293_v42 = vmul.f32 %v3261_v19, %v3261_v19  ;;  %v3294_v30 = vmul.f32 %v3262_v31, %v3262_v31 }
 0x245   : > { %v3307_v0 = vadd.f32 %v3306_v7, %v3276_v1  ;;  %v3295_v62 = vmul.f32 %v3263_v61, %v3263_v61  ;;  %v3296_v39 = vmul.f32 %v3264_v14, %v3264_v14  ;;  %v3297_v44 = vmul.f32 %v6588_v58, %v6588_v58 }
 0x246   : > { %v3298_v43 = vmul.f32 %v6591_v34, %v6591_v34  ;;  %v3299_v26 = vmul.f32 %v6593_v48, %v6593_v48  ;;  %v3300_v19 = vmul.f32 %v6595_v8, %v6595_v8  ;;  %v3301_v61 = vmul.f32 %v6597_v33, %v6597_v33 }
 0x247   : > { %v3308_v28 = vadd.f32 %v3307_v0, %v3277_v13  ;;  %v3302_v58 = vmul.f32 %v6599_v17, %v6599_v17  ;;  %v3303_v34 = vmul.f32 %v6601_v10, %v6601_v10  ;;  %v3304_v48 = vmul.f32 %v6603_v3, %v6603_v3 }
 0x249   : > { %v3309_v15 = vadd.f32 %v3308_v28, %v3278_v59 }
 0x24b   : > { %v3310_v36 = vadd.f32 %v3309_v15, %v3279_v45 }
 0x24d   : > { %v3311_v6 = vadd.f32 %v3310_v36, %v3280_v18 }
 0x24f   : > { %v3312_v11 = vadd.f32 %v3311_v6, %v3281_v2 }
 0x251   : > { %v3313_v16 = vadd.f32 %v3312_v11, %v3282_v56 }
 0x253   : > { %v3314_v54 = vadd.f32 %v3313_v16, %v3283_v25 }
 0x255   : > { %v3315_v50 = vadd.f32 %v3314_v54, %v3284_v40 }
 0x257   : > { %v3316_v41 = vadd.f32 %v3315_v50, %v3285_v27 }
 0x259   : > { %v3317_v53 = vadd.f32 %v3316_v41, %v3286_v51 }
 0x25b   : > { %v3318_v47 = vadd.f32 %v3317_v53, %v3287_v60 }
 0x25d   : > { %v3319_v35 = vadd.f32 %v3318_v47, %v3288_v21 }
 0x25f   : > { %v3320_v4 = vadd.f32 %v3319_v35, %v3289_v9 }
 0x261   : > { %v3321_v22 = vadd.f32 %v3320_v4, %v3290_v20 }
 0x263   : > { %v3322_v29 = vadd.f32 %v3321_v22, %v3291_v37 }
 0x265   : > { %v3323_v12 = vadd.f32 %v3322_v29, %v3292_v5 }
 0x267   : > { %v3324_v46 = vadd.f32 %v3323_v12, %v3293_v42 }
 0x269   : > { %v3325_v55 = vadd.f32 %v3324_v46, %v3294_v30 }
 0x26b   : > { %v3326_v23 = vadd.f32 %v3325_v55, %v3295_v62 }
 0x26d   : > { %v3327_v52 = vadd.f32 %v3326_v23, %v3296_v39 }
 0x26f   : > { %v3328_v63 = vadd.f32 %v3327_v52, %v3297_v44 }
 0x271   : > { %v3329_v49 = vadd.f32 %v3328_v63, %v3298_v43 }
 0x273   : > { %v3330_v31 = vadd.f32 %v3329_v49, %v3299_v26 }
 0x275   : > { %v3331_v14 = vadd.f32 %v3330_v31, %v3300_v19 }
 0x277   : > { %v3332_v32 = vadd.f32 %v3331_v14, %v3301_v61 }
 0x279   : > { %v3333_v1 = vadd.f32 %v3332_v32, %v3302_v58 }
 0x27b   : > { %v3334_v7 = vadd.f32 %v3333_v1, %v3303_v34 }
 0x27d   : > { %v3335_v38 = vadd.f32 %v3334_v7, %v3304_v48 }
 0x27f   : > { %v3336_v8 = vrot.slane %v3335_v38, 4 }
 0x281   : > { %v3337_v13 = vadd.f32 %v3336_v8, %v3335_v38 }
 0x283   : > { %v3338_v0 = vrot.slane %v3337_v13, 2 }
 0x285   : > { %v3339_v24 = vadd.f32 %v3338_v0, %v3337_v13 }
 0x287   : > { %v3340_v59 = vrot.slane %v3339_v24, 1 }
 0x289   : > { %v3341_v33 = vadd.f32 %v3340_v59, %v3339_v24 }
 0x28b   : > { %3343 = vst [vmem:[%s268_s12] sm:$0x1] %v3341_v33 }
 0x28c PF: > { %s17_s21 = sadd.s32 1, %s5195_s21  }
 0x28d   : > { %p14_p4 = scmp.ge.s32.totalorder %s17_s21, 4  }
 0x28f   :  { %16 = sbr.rel (!%p14_p4) target bundleno = 1 (0x1), region = 93 }

</bundles_post_ra>
